<compile_context>
chip_gen: v5e
topology: v5e:2x2
jax: 0.10.0
libtpu: 0.0.40
codegen_flags: <defaults>
</compile_context>

<pallas_src>
import jax
import jax.numpy as jnp
from jax import lax
from jax.experimental import pallas as pl
from jax.experimental.pallas import tpu as pltpu

IN_FEATURES = 3 * 224 * 224          # 150528
HIDDEN = 100
OUT_FEATURES = 2

O_PAD = 128                          # lane-dense padded output / W2 columns
TK = 12544                           # 150528 / 12544 = 12 reduction steps (12544 = 128*98)


def _disc_kernel(x_ref, w1_ref, b1_ref, w2_ref, b2_ref, out_ref, acc_ref):
    """Fused  relu(x @ W1^T + b1) @ W2 + b2  with a K-tiled first matmul.

    W1 stays in native [100, K] layout; the contraction is A @ B^T
    (dot_general contracting the lane dim of both operands), so the 60 MB
    weight stream is read without any transpose/pad copy in HBM.
    The hidden activation accumulates in a VMEM scratch; bias + ReLU and the
    tiny second matmul run in-kernel on the last grid step.
    """
    k = pl.program_id(0)

    @pl.when(k == 0)
    def _():
        acc_ref[...] = jnp.zeros_like(acc_ref)

    # [B, TK] x [HIDDEN, TK] -> [B, HIDDEN]   (contract the TK/lane dim)
    acc_ref[...] += lax.dot_general(
        x_ref[...], w1_ref[...],
        dimension_numbers=(((1,), (1,)), ((), ())),
        preferred_element_type=jnp.float32,
    )

    @pl.when(k == pl.num_programs(0) - 1)
    def _():
        h = jnp.maximum(acc_ref[...] + b1_ref[...], 0.0)          # ReLU(x@W1^T + b1)
        out = jnp.dot(h, w2_ref[...], preferred_element_type=jnp.float32)
        out_ref[...] = (out + b2_ref[...]).astype(out_ref.dtype)


def pack_params(w1, b1, w2, b2):
    """One-time parameter packing (call once, NOT per forward call).

    The big W1 passes through untouched (native [100, 150528] layout).  Only
    the tiny second-layer tensors are reshaped / lane-padded to 128 so the
    kernel's output store is lane-dense.
    """
    b1_2d = b1.reshape(1, HIDDEN)
    w2_p = jnp.zeros((HIDDEN, O_PAD), jnp.float32).at[:, :OUT_FEATURES].set(w2.T)
    b2_p = jnp.zeros((1, O_PAD), jnp.float32).at[0, :OUT_FEATURES].set(b2)
    return w1, b1_2d, w2_p, b2_p


@jax.jit
def discriminator_forward(x, alpha, w1, b1_2d, w2_p, b2_p):
    """x: [B, 150528] f32; w1: [100, 150528] (native PyTorch layout);
       b1_2d: [1, 100]; w2_p: [100, 128]; b2_p: [1, 128].  Returns [B, 2]."""
    # ReverseLayerF only affects the backward pass; forward is identity.
    del alpha

    B = x.shape[0]
    n_k = IN_FEATURES // TK

    out_p = pl.pallas_call(
        _disc_kernel,
        out_shape=jax.ShapeDtypeStruct((B, O_PAD), jnp.float32),
        grid_spec=pltpu.PrefetchScalarGridSpec(
            num_scalar_prefetch=0,
            grid=(n_k,),
            in_specs=[
                pl.BlockSpec((B, TK), lambda k: (0, k)),               # x chunk
                pl.BlockSpec((HIDDEN, TK), lambda k: (0, k)),          # W1 chunk (native)
                pl.BlockSpec((1, HIDDEN), lambda k: (0, 0)),           # b1
                pl.BlockSpec((HIDDEN, O_PAD), lambda k: (0, 0)),       # W2 (padded, resident)
                pl.BlockSpec((1, O_PAD), lambda k: (0, 0)),            # b2 (padded, resident)
            ],
            out_specs=pl.BlockSpec((B, O_PAD), lambda k: (0, 0)),
            scratch_shapes=[pltpu.VMEM((B, HIDDEN), jnp.float32)],
        ),
        compiler_params=pltpu.CompilerParams(
            dimension_semantics=("arbitrary",),
            vmem_limit_bytes=32 * 1024 * 1024,   # explicit: safe on v5e/v6e/v7x
        ),
    )(x, w1, b1_2d, w2_p, b2_p)

    return out_p[:, :OUT_FEATURES]


def init_params(key):
    """Deterministic PyTorch-style (uniform +-1/sqrt(fan_in)) initialization."""
    k1, k2, k3, k4 = jax.random.split(key, 4)
    bound1 = 1.0 / jnp.sqrt(IN_FEATURES)
    bound2 = 1.0 / jnp.sqrt(HIDDEN)
    w1 = jax.random.uniform(k1, (HIDDEN, IN_FEATURES), jnp.float32, -bound1, bound1)
    b1 = jax.random.uniform(k2, (HIDDEN,), jnp.float32, -bound1, bound1)
    w2 = jax.random.uniform(k3, (OUT_FEATURES, HIDDEN), jnp.float32, -bound2, bound2)
    b2 = jax.random.uniform(k4, (OUT_FEATURES,), jnp.float32, -bound2, bound2)
    return w1, b1, w2, b2


if __name__ == "__main__":
    key = jax.random.PRNGKey(0)
    k_x, k_p = jax.random.split(key)

    batch = 2
    x = jax.random.normal(k_x, (batch, IN_FEATURES), jnp.float32)
    alpha = 1.0

    w1, b1, w2, b2 = init_params(k_p)

    # One-time packing (hoisted out of the per-call forward path).
    packed = pack_params(w1, b1, w2, b2)
    packed = jax.block_until_ready(packed)

    out = discriminator_forward(x, alpha, *packed)
    out = jax.block_until_ready(out)

    # Pure-JAX reference for a correctness sanity check.
    ref = jnp.maximum(x @ w1.T + b1, 0.0) @ w2.T + b2
    assert out.shape == (batch, OUT_FEATURES)
    assert jnp.allclose(out, ref, atol=2e-3, rtol=2e-3), "mismatch vs reference"

    print("KERNEL_OK")
</pallas_src>

<mosaic_0001>
module attributes {stable_mosaic.version = 11 : i64} {
  func.func @_disc_kernel(%arg0: i32, %arg1: memref<2x12544xf32, #tpu.memory_space<vmem>>, %arg2: memref<100x12544xf32, #tpu.memory_space<vmem>>, %arg3: memref<1x100xf32, #tpu.memory_space<vmem>>, %arg4: memref<100x128xf32, #tpu.memory_space<vmem>>, %arg5: memref<1x128xf32, #tpu.memory_space<vmem>>, %arg6: memref<2x128xf32, #tpu.memory_space<vmem>>, %arg7: memref<2x100xf32, #tpu.memory_space<vmem>>) attributes {dimension_semantics = [#tpu.dimension_semantics<arbitrary>], iteration_bounds = array<i64: 12>, scalar_prefetch = 0 : i64, scratch_operands = 1 : i64, tpu.core_type = #tpu.core_type<tc>, window_params = [{transform_indices = @transform_0, window_bounds = array<i64: 2, 12544>}, {transform_indices = @transform_1, window_bounds = array<i64: 100, 12544>}, {pipeline_mode = #tpu.pipeline_mode<synchronous>, transform_indices = @transform_2, window_bounds = array<i64: 1, 100>}, {pipeline_mode = #tpu.pipeline_mode<synchronous>, transform_indices = @transform_3, window_bounds = array<i64: 100, 128>}, {pipeline_mode = #tpu.pipeline_mode<synchronous>, transform_indices = @transform_4, window_bounds = array<i64: 1, 128>}, {pipeline_mode = #tpu.pipeline_mode<synchronous>, transform_indices = @transform_5, window_bounds = array<i64: 2, 128>}]} {
    %c0_i32 = arith.constant 0 : i32
    %0 = arith.cmpi eq, %arg0, %c0_i32 : i32
    %1 = arith.extui %0 : i1 to i32
    %c0_i32_0 = arith.constant 0 : i32
    %2 = arith.cmpi ne, %1, %c0_i32_0 : i32
    scf.if %2 {
      %cst_9 = arith.constant 0.000000e+00 : f32
      %12 = vector.broadcast %cst_9 : f32 to vector<2x100xf32>
      %c0_10 = arith.constant 0 : index
      %c0_11 = arith.constant 0 : index
      %13 = vector.load %arg7[%c0_10, %c0_11] : memref<2x100xf32, #tpu.memory_space<vmem>>, vector<2x100xf32>
      tpu.vector_store %arg7[%c0_10, %c0_11], %12 {strides = array<i32>} : memref<2x100xf32, #tpu.memory_space<vmem>>, vector<2x100xf32>,
    } else {
    }
    %c0 = arith.constant 0 : index
    %c0_1 = arith.constant 0 : index
    %3 = vector.load %arg7[%c0, %c0_1] : memref<2x100xf32, #tpu.memory_space<vmem>>, vector<2x100xf32>
    %c0_2 = arith.constant 0 : index
    %c0_3 = arith.constant 0 : index
    %4 = vector.load %arg1[%c0_2, %c0_3] : memref<2x12544xf32, #tpu.memory_space<vmem>>, vector<2x12544xf32>
    %c0_4 = arith.constant 0 : index
    %c0_5 = arith.constant 0 : index
    %5 = vector.load %arg2[%c0_4, %c0_5] : memref<100x12544xf32, #tpu.memory_space<vmem>>, vector<100x12544xf32>
    %cst = arith.constant dense<0.000000e+00> : vector<2x100xf32>
    %6 = tpu.matmul %4, %5, %cst {dimension_numbers = #tpu.dot_dimension_numbers<[1], [1], [0], [0], [0, 0, 1, 0], [], []>} : vector<2x12544xf32>, vector<100x12544xf32>, vector<2x100xf32> -> vector<2x100xf32>
    %7 = arith.addf %3, %6 : vector<2x100xf32>
    %c0_6 = arith.constant 0 : index
    %c0_7 = arith.constant 0 : index
    %8 = vector.load %arg7[%c0_6, %c0_7] : memref<2x100xf32, #tpu.memory_space<vmem>>, vector<2x100xf32>
    tpu.vector_store %arg7[%c0_6, %c0_7], %7 {strides = array<i32>} : memref<2x100xf32, #tpu.memory_space<vmem>>, vector<2x100xf32>,
    %c11_i32 = arith.constant 11 : i32
    %9 = arith.cmpi eq, %arg0, %c11_i32 : i32
    %10 = arith.extui %9 : i1 to i32
    %c0_i32_8 = arith.constant 0 : i32
    %11 = arith.cmpi ne, %10, %c0_i32_8 : i32
    scf.if %11 {
      %c0_9 = arith.constant 0 : index
      %c0_10 = arith.constant 0 : index
      %12 = vector.load %arg7[%c0_9, %c0_10] : memref<2x100xf32, #tpu.memory_space<vmem>>, vector<2x100xf32>
      %c0_11 = arith.constant 0 : index
      %c0_12 = arith.constant 0 : index
      %13 = vector.load %arg3[%c0_11, %c0_12] : memref<1x100xf32, #tpu.memory_space<vmem>>, vector<1x100xf32>
      %14 = vector.broadcast %13 : vector<1x100xf32> to vector<2x100xf32>
      %15 = arith.addf %12, %14 : vector<2x100xf32>
      %cst_13 = arith.constant 0.000000e+00 : f32
      %16 = vector.broadcast %cst_13 : f32 to vector<2x100xf32>
      %17 = arith.maximumf %15, %16 : vector<2x100xf32>
      %c0_14 = arith.constant 0 : index
      %c0_15 = arith.constant 0 : index
      %18 = vector.load %arg4[%c0_14, %c0_15] : memref<100x128xf32, #tpu.memory_space<vmem>>, vector<100x128xf32>
      %cst_16 = arith.constant dense<0.000000e+00> : vector<2x128xf32>
      %19 = tpu.matmul %17, %18, %cst_16 {dimension_numbers = #tpu.dot_dimension_numbers<[1], [0], [0], [1], [0, 0, 1, 1], [], []>} : vector<2x100xf32>, vector<100x128xf32>, vector<2x128xf32> -> vector<2x128xf32>
      %c0_17 = arith.constant 0 : index
      %c0_18 = arith.constant 0 : index
      %20 = vector.load %arg5[%c0_17, %c0_18] : memref<1x128xf32, #tpu.memory_space<vmem>>, vector<1x128xf32>
      %21 = vector.broadcast %20 : vector<1x128xf32> to vector<2x128xf32>
      %22 = arith.addf %19, %21 : vector<2x128xf32>
      %c0_19 = arith.constant 0 : index
      %c0_20 = arith.constant 0 : index
      %23 = vector.load %arg6[%c0_19, %c0_20] : memref<2x128xf32, #tpu.memory_space<vmem>>, vector<2x128xf32>
      tpu.vector_store %arg6[%c0_19, %c0_20], %22 {strides = array<i32>} : memref<2x128xf32, #tpu.memory_space<vmem>>, vector<2x128xf32>,
    } else {
    }
    return
  }
  func.func @transform_0(%arg0: i32) -> (i32, i32) {
    %c0_i32 = arith.constant 0 : i32
    %c0_i32_0 = arith.constant 0 : i32
    return %c0_i32, %arg0 : i32, i32
  }
  func.func @transform_1(%arg0: i32) -> (i32, i32) {
    %c0_i32 = arith.constant 0 : i32
    %c0_i32_0 = arith.constant 0 : i32
    return %c0_i32, %arg0 : i32, i32
  }
  func.func @transform_2(%arg0: i32) -> (i32, i32) {
    %c0_i32 = arith.constant 0 : i32
    %c0_i32_0 = arith.constant 0 : i32
    %c0_i32_1 = arith.constant 0 : i32
    return %c0_i32, %c0_i32_0 : i32, i32
  }
  func.func @transform_3(%arg0: i32) -> (i32, i32) {
    %c0_i32 = arith.constant 0 : i32
    %c0_i32_0 = arith.constant 0 : i32
    %c0_i32_1 = arith.constant 0 : i32
    return %c0_i32, %c0_i32_0 : i32, i32
  }
  func.func @transform_4(%arg0: i32) -> (i32, i32) {
    %c0_i32 = arith.constant 0 : i32
    %c0_i32_0 = arith.constant 0 : i32
    %c0_i32_1 = arith.constant 0 : i32
    return %c0_i32, %c0_i32_0 : i32, i32
  }
  func.func @transform_5(%arg0: i32) -> (i32, i32) {
    %c0_i32 = arith.constant 0 : i32
    %c0_i32_0 = arith.constant 0 : i32
    %c0_i32_1 = arith.constant 0 : i32
    return %c0_i32, %c0_i32_0 : i32, i32
  }
}

</mosaic_0001>

<bundles_post_ra>
// kernel: discriminator_forward.1
= control target key start
LH: loop header
LB: loop body
LE: loop exit
PB: predicated region body
PF: predicated region fallthrough
CT: control target
= control target key end

     0   :  { %10 = vsyncpa [#allocation4], 0  ;;  %s5842_s0 = inlined_call_operand.hbm [shape: f32[2,150528], index: 0, kind: input, shape index: {}]   ;;  %s5843_s1 = inlined_call_operand.hbm [shape: f32[100,150528], index: 1, kind: input, shape index: {}]   ;;  %s5844_s2 = inlined_call_operand.hbm [shape: f32[1,100], index: 2, kind: input, shape index: {}]   ;;  %s5845_s3 = inlined_call_operand.hbm [shape: f32[100,128], index: 3, kind: input, shape index: {}]   ;;  %s5846_s4 = inlined_call_operand.hbm [shape: f32[1,128], index: 4, kind: input, shape index: {}]   ;;  %s5847_s5 = inlined_call_operand.hbm [shape: f32[2,128], index: 5, kind: output, shape index: {}]  }
   0x1   :  { %12 = vsyncpa [#allocation4 + $0x1], 0 }
   0x2   :  { %13 = vsyncpa [#allocation7], 0 }
   0x3   :  { %15 = vsyncpa [#allocation7 + $0x1], 0 }
   0x4   :  { %16 = vsyncpa [#allocation10], 0 }
   0x5   :  { %17 = vsyncpa [#allocation5], 0  ;;  %s4389_s18 = smov 0   ;;  %s4391_s19 = smov 0  }
   0x6   :  { %s4393_s20 = smov 0   ;;  %s4395_s21 = smov 0  }
   0x7 LB: > { %s4408_s22 = sadd.s32 4294967295, %s4347_s21   ;;  %p43_p0 = scmp.ne.s32.totalorder %s4339_s19, %s4335_s18  ;;  %s4347_s21 = sphi %s4395_s21, %s5856_s21   ;;  %s4343_s20 = sphi %s4393_s20, %s5855_s20   ;;  %s4339_s19 = sphi %s4391_s19, %s5854_s19   ;;  %s4335_s18 = sphi %s4389_s18, %s5853_s18  }
   0x8   : > { %p44_p1 = scmp.eq.s32.totalorder %s4408_s22, 0  ;;  %p4004_p2 = scmp.ge.s32.totalorder %s4347_s21, 1 }
   0x9   : > { %p164_p3 = scmp.lt.s32.totalorder %s4347_s21, 13  ;;  %p4005_p4 = scmp.ne.s32.totalorder %s4408_s22, 0 }
   0xa   : > { %p4417_p5 = por %p44_p1, %p43_p0  ;;  %s176_s26 = sshll.u32 %s5844_s2, 4  ;;  %s177_s26 = int_to_ptr.hbm [resolvable:$true] %s176_s26 }
   0xb   : > { %p4424_p6 = pnand %p4004_p2, %p164_p3  ;;  %s4349_s28 = smov [#allocation8]  }
   0xc   : > { %s178_s29 = sshll.u32 %s4349_s28, 4  ;;  %s187_s7 = sshll.u32 %s5845_s3, 4  ;;  %s179_s29 = int_to_ptr.vmem [resolvable:$true] %s178_s29  ;;  %s188_s7 = int_to_ptr.hbm [resolvable:$true] %s187_s7 }
   0xd   : > { %p4049_p7 = pneg %p4424_p6  ;;  %s4350_s9 = smov [#allocation9]  }
   0xe   : > { %s189_s10 = sshll.u32 %s4350_s9, 4  ;;  %s4351_s11 = smov 128   ;;  %s190_s10 = int_to_ptr.vmem [resolvable:$true] %s189_s10 }
   0xf   : > { %p4435_p8 = pnand %p4049_p7, %p44_p1  ;;  %s4352_s12 = smov 8  }
  0x10   : > { %s202_s15 = sshll.u32 %s5846_s4, 4  ;;  %s4353_s16 = smov [#allocation11]   ;;  %s203_s15 = int_to_ptr.hbm [resolvable:$true] %s202_s15 }
  0x11   : > { %4052 = dma.hbm_to_vmem [thread:$0]  (!%p4435_p8), %s177_s26, 16, %s179_s29, [#allocation7]  }
  0x12   : > { %4055 = dma.hbm_to_vmem [thread:$0]  (!%p4435_p8), %s188_s7, 1664, %s190_s10, [#allocation10], %s4351_s11, %s4351_s11, %s4352_s12  }
  0x13   : > { %s204_s17 = sshll.u32 %s4353_s16, 4  ;;  %s4449_s18 = sadd.s32 1, %s4347_s21   ;;  %s205_s17 = int_to_ptr.vmem [resolvable:$true] %s204_s17 }
  0x14   : > { %4058 = dma.hbm_to_vmem [thread:$0]  (!%p4435_p8), %s203_s15, 16, %s205_s17, [#allocation10]  }
  0x15   : > { %s27_s24 = ssub.s32 %s4347_s21, %s4449_s18  ;;  %s30_s25 = sadd.s32 1, %s4343_s20 }
  0x16   : > { %p28_p9 = scmp.eq.s32.totalorder %s27_s24, 0  ;;  %p37_p10 = scmp.ne.s32.totalorder %s4343_s20, %s4339_s19 }
  0x17   : > { %p38_p11 = scmp.eq.s32.totalorder %s4347_s21, 0  ;;  %p4069_p12 = scmp.lt.s32.totalorder %s4347_s21, 12 }
  0x18   : > { %s4459_s26 = scalar_select %p28_p9, %s4343_s20, %s30_s25  }
  0x19   : > { %p39_p13 = por %p38_p11, %p37_p10  ;;  %s215_s28 = sand.u32 1, %s4343_s20  }
  0x1a   : > { %s4025_s29 = smul.u32 196, %s215_s28  ;;  %s216_s14 = scalar_lea.sflag [#allocation4], %s215_s28 }
  0x1b   : > { %s4023_s30 = smul.u32 196, %s4347_s21  ;;  %p4463_p0 = pnand %p4069_p12, %p39_p13 }
  0x1c   : > { %s4026_s7 = smul.u32 10192, %s215_s28  ;;  %s219_s11 = scalar_lea.vmem [#allocation3], %s4025_s29 }
  0x1d   : > { %s224_s10 = scalar_lea.hbm %s5842_s0, %s4023_s30  ;;  %s228_s12 = sshll.u32 %s219_s11, 4  ;;  %s229_s12 = int_to_ptr.vmem [resolvable:$true] %s228_s12 }
  0x1e   : > { %s226_s13 = sshll.u32 %s224_s10, 4  ;;  %p4213_p3 = pneg %p4463_p0  ;;  %s227_s13 = int_to_ptr.hbm [resolvable:$true] %s226_s13 }
  0x1f   : > { %s4209_s15 = sshra.s32 %s227_s13, 4  ;;  %s4216_s25 = scalar_lea.hbm %s5842_s0, 2352  ;;  %s4210_s15 = int_to_ptr.hbm [resolvable:$true] %s4209_s15 }
  0x20   : > { %s4211_s16 = scalar_lea.hbm %s4210_s15, 196  ;;  %p4217_p9 = scmp.lt.s32.totalorder %s4210_s15, %s5842_s0 }
  0x21   : > { %p4212_p2 = scmp.ne.s32.totalorder %s4210_s15, %s4211_s16  ;;  %p4218_p10 = scmp.lt.s32.totalorder %s4216_s25, %s4211_s16 }
  0x23   : > { %p4214_p7 = pnand %p4213_p3, %p4212_p2  ;;  %p4219_p11 = por %p4218_p10, %p4217_p9 }
  0x25   : > { %p4215_p8 = pneg %p4214_p7 }
  0x27   : > { %p4220_p12 = pnand %p4219_p11, %p4215_p8 }
  0x29   : > { %4223 = shalt.err (!%p4220_p12)
}
  0x2a   : > { %4062 = dma.hbm_to_vmem [thread:$0]  (!%p4463_p0), %s227_s13, 3136, %s229_s12, %s216_s14  }
  0x2b   : > { %s235_s28 = sand.u32 1, %s4347_s21   ;;  %s239_s8 = scalar_lea.vmem [#allocation6], %s4026_s7 }
  0x2c   : > { %s247_s9 = sshll.u32 %s239_s8, 4  ;;  %s4024_s10 = smul.u32 784, %s4347_s21  ;;  %s248_s9 = int_to_ptr.vmem [resolvable:$true] %s247_s9 }
  0x2d   : > { %s236_s16 = scalar_lea.sflag [#allocation7], %s235_s28  ;;  %s4246_s13 = scalar_lea.hbm %s5843_s1, 122304 }
  0x2e   : > { %s244_s24 = scalar_lea.hbm %s5843_s1, %s4024_s10 }
  0x2f   : > { %s245_s15 = sshll.u32 %s244_s24, 4  ;;  %s246_s15 = int_to_ptr.hbm [resolvable:$true] %s245_s15 }
  0x30   : > { %s4239_s25 = sshra.s32 %s246_s15, 4  ;;  %s4240_s25 = int_to_ptr.hbm [resolvable:$true] %s4239_s25 }
  0x31   : > { %s4241_s29 = scalar_lea.hbm %s4240_s25, 10192  ;;  %p4247_p8 = scmp.lt.s32.totalorder %s4240_s25, %s5843_s1 }
  0x32   : > { %p4242_p13 = scmp.ne.s32.totalorder %s4240_s25, %s4241_s29  ;;  %p4248_p9 = scmp.lt.s32.totalorder %s4246_s13, %s4241_s29 }
  0x34   : > { %p4244_p2 = pnand %p4242_p13, %p4213_p3  ;;  %p4249_p10 = por %p4248_p9, %p4247_p8 }
  0x36   : > { %p4245_p7 = pneg %p4244_p2 }
  0x38   : > { %p4250_p11 = pnand %p4249_p10, %p4245_p7 }
  0x3a   : > { %4253 = shalt.err (!%p4250_p11)
}
  0x3b   : > { %s4354_s30 = smov 150528   ;;  %s4355_s28 = smov 12544  }
  0x3c   : > { %s4356_s8 = smov 784   ;;  %259 = sbr.rel (%p4424_p6) target bundleno = 1675 (0x68b), region = 40 }
  0x3d   : > { %4065 = dma.hbm_to_vmem [thread:$0]  (!%p4463_p0), %s246_s15, 163072, %s248_s9, %s236_s16, %s4354_s30, %s4355_s28, %s4356_s8  }
  0x3e   : > { %s261_s10 = sand.u32 (!%p4424_p6), 1, %s4339_s19  }
  0x3f   : > { %s4027_s11 = smul.u32 (!%p4424_p6), 196, %s261_s10  ;;  %s262_s17 = scalar_lea.sflag (!%p4424_p6), [#allocation4], %s261_s10 }
  0x41   : > { %s4502_s24 = scalar_lea.vmem [#allocation3], %s4027_s11 }
  0x42   : > { %4314 = dma.done.wait (%p4417_p5), %s262_s17, 3136  }
  0x43   : > { %4316 = vsyncadd (%p4417_p5), %s262_s17, 4294964160  ;;  %s271_s25 = sand.u32 1, %s4408_s22   ;;  %s4028_s6 = smul.u32 10192, %s261_s10 }
  0x44   : > { %s272_s9 = scalar_lea.sflag [#allocation7], %s271_s25 }
  0x45   : > { %s4509_s15 = scalar_lea.vmem [#allocation6], %s4028_s6 }
  0x46   : > { %4318 = dma.done.wait (%p4417_p5), %s272_s9, 163072  }
  0x47   : > { %4320 = vsyncadd (%p4417_p5), %s272_s9, 4294804224 }
  0x48   : > { %4322 = dma.done.wait (%p44_p1), [#allocation7], 16  }
  0x49   : > { %4324 = vsyncadd (%p44_p1), [#allocation7], 4294967280 }
  0x4a   : > { %4326 = dma.done.wait (%p44_p1), [#allocation10], 1680  }
  0x4b   : > { %4328 = vsyncadd (%p44_p1), [#allocation10], 4294965616  ;;  %323 = sbr.rel (%p4005_p4) target bundleno = 82 (0x52), region = 64 }
  0x50   : > { %vm324_vm0 = vcmask 812032   ;;  %v4357_v0 = vmov 0.0  }
  0x51   : > { %325 = vst.msk [vmem:[#allocation2] sm:$0x3] %vm324_vm0, %v4357_v0 }
  0x52 PF: > { %v1528_v1 = vld [vmem:[%s4509_s15 + $0x24c0] sm:$0xf]  ;;  %v1530_v2 = vld [vmem:[%s4509_s15 + $0x24d0] sm:$0xf]  ;;  %v1529_v3 = vld [vmem:[%s4509_s15 + $0x24c8] sm:$0xf] }
  0x53   : > { %1876 = vmatpush.xpose.msra.mxu0 %v1528_v1  ;;  %1916 = vmatpush.xpose.msra.mxu2 %v1530_v2  ;;  %v1531_v4 = vld [vmem:[%s4509_s15 + $0x24d8] sm:$0xf]  ;;  %v1430_v5 = vld [vmem:[%s4509_s15 + $0x21b0] sm:$0xff]  ;;  %v1432_v6 = vld [vmem:[%s4509_s15 + $0x21c0] sm:$0xff]  ;;  %vm3834_vm1 = vcmask 812032   ;;  %p4016_p1 = scmp.ne.s32.totalorder %s4408_s22, 11 }
  0x54   : > { %1896 = vmatpush.xpose.msra.mxu1 %v1529_v3  ;;  %1936 = vmatpush.xpose.msra.mxu3 %v1531_v4  ;;  %v1431_v7 = vld [vmem:[%s4509_s15 + $0x21b8] sm:$0xff]  ;;  %v1433_v8 = vld [vmem:[%s4509_s15 + $0x21c8] sm:$0xff]  ;;  %v1332_v9 = vld [vmem:[%s4509_s15 + $0x1ea0] sm:$0xff] }
  0x55   : > { %v1334_v10 = vld [vmem:[%s4509_s15 + $0x1eb0] sm:$0xff]  ;;  %v1333_v11 = vld [vmem:[%s4509_s15 + $0x1ea8] sm:$0xff]  ;;  %v1335_v12 = vld [vmem:[%s4509_s15 + $0x1eb8] sm:$0xff] }
  0x56   : > { %v1234_v13 = vld [vmem:[%s4509_s15 + $0x1b90] sm:$0xff]  ;;  %v1236_v14 = vld [vmem:[%s4509_s15 + $0x1ba0] sm:$0xff]  ;;  %v1235_v15 = vld [vmem:[%s4509_s15 + $0x1b98] sm:$0xff] }
  0x57   : > { %1877 = vmatpush.xpose.msra.mxu0 %v1430_v5  ;;  %1917 = vmatpush.xpose.msra.mxu2 %v1432_v6  ;;  %v1237_v16 = vld [vmem:[%s4509_s15 + $0x1ba8] sm:$0xff]  ;;  %v1136_v17 = vld [vmem:[%s4509_s15 + $0x1880] sm:$0xff]  ;;  %v1138_v18 = vld [vmem:[%s4509_s15 + $0x1890] sm:$0xff] }
  0x58   : > { %1897 = vmatpush.xpose.msra.mxu1 %v1431_v7  ;;  %1937 = vmatpush.xpose.msra.mxu3 %v1433_v8  ;;  %v1137_v19 = vld [vmem:[%s4509_s15 + $0x1888] sm:$0xff]  ;;  %v1139_v20 = vld [vmem:[%s4509_s15 + $0x1898] sm:$0xff]  ;;  %v1038_v21 = vld [vmem:[%s4509_s15 + $0x1570] sm:$0xff] }
  0x59   : > { %v1040_v22 = vld [vmem:[%s4509_s15 + $0x1580] sm:$0xff]  ;;  %v1039_v23 = vld [vmem:[%s4509_s15 + $0x1578] sm:$0xff]  ;;  %v1041_v24 = vld [vmem:[%s4509_s15 + $0x1588] sm:$0xff] }
  0x5a   : > { %v940_v25 = vld [vmem:[%s4509_s15 + $0x1260] sm:$0xff]  ;;  %v942_v26 = vld [vmem:[%s4509_s15 + $0x1270] sm:$0xff]  ;;  %v941_v27 = vld [vmem:[%s4509_s15 + $0x1268] sm:$0xff] }
  0x5b   : > { %1878 = vmatpush.xpose.msra.mxu0 %v1332_v9  ;;  %1918 = vmatpush.xpose.msra.mxu2 %v1334_v10  ;;  %v943_v28 = vld [vmem:[%s4509_s15 + $0x1278] sm:$0xff]  ;;  %v842_v29 = vld [vmem:[%s4509_s15 + $0xf50] sm:$0xff]  ;;  %v844_v30 = vld [vmem:[%s4509_s15 + $0xf60] sm:$0xff] }
  0x5c   : > { %1898 = vmatpush.xpose.msra.mxu1 %v1333_v11  ;;  %1938 = vmatpush.xpose.msra.mxu3 %v1335_v12  ;;  %v843_v31 = vld [vmem:[%s4509_s15 + $0xf58] sm:$0xff]  ;;  %v845_v32 = vld [vmem:[%s4509_s15 + $0xf68] sm:$0xff]  ;;  %v744_v33 = vld [vmem:[%s4509_s15 + $0xc40] sm:$0xff] }
  0x5d   : > { %v746_v34 = vld [vmem:[%s4509_s15 + $0xc50] sm:$0xff]  ;;  %v745_v35 = vld [vmem:[%s4509_s15 + $0xc48] sm:$0xff]  ;;  %v747_v36 = vld [vmem:[%s4509_s15 + $0xc58] sm:$0xff] }
  0x5e   : > { %v646_v37 = vld [vmem:[%s4509_s15 + $0x930] sm:$0xff]  ;;  %v648_v38 = vld [vmem:[%s4509_s15 + $0x940] sm:$0xff]  ;;  %v647_v39 = vld [vmem:[%s4509_s15 + $0x938] sm:$0xff] }
  0x5f   : > { %1879 = vmatpush.xpose.msra.mxu0 %v1234_v13  ;;  %1919 = vmatpush.xpose.msra.mxu2 %v1236_v14  ;;  %v649_v40 = vld [vmem:[%s4509_s15 + $0x948] sm:$0xff]  ;;  %v548_v41 = vld [vmem:[%s4509_s15 + $0x620] sm:$0xff]  ;;  %v550_v42 = vld [vmem:[%s4509_s15 + $0x630] sm:$0xff] }
  0x60   : > { %1899 = vmatpush.xpose.msra.mxu1 %v1235_v15  ;;  %1939 = vmatpush.xpose.msra.mxu3 %v1237_v16  ;;  %v549_v43 = vld [vmem:[%s4509_s15 + $0x628] sm:$0xff]  ;;  %v551_v44 = vld [vmem:[%s4509_s15 + $0x638] sm:$0xff]  ;;  %v450_v45 = vld [vmem:[%s4509_s15 + $0x310] sm:$0xff] }
  0x61   : > { %v452_v46 = vld [vmem:[%s4509_s15 + $0x320] sm:$0xff]  ;;  %v451_v47 = vld [vmem:[%s4509_s15 + $0x318] sm:$0xff]  ;;  %v453_v48 = vld [vmem:[%s4509_s15 + $0x328] sm:$0xff] }
  0x62   : > { %v352_v49 = vld [vmem:[%s4509_s15] sm:$0xff]  ;;  %v354_v50 = vld [vmem:[%s4509_s15 + $0x10] sm:$0xff]  ;;  %v353_v53 = vld [vmem:[%s4509_s15 + $0x8] sm:$0xff] }
  0x63   : > { %1880 = vmatpush.xpose.msra.mxu0 %v1136_v17  ;;  %1920 = vmatpush.xpose.msra.mxu2 %v1138_v18  ;;  %v1532_v51 = vld [vmem:[%s4509_s15 + $0x24e0] sm:$0xf]  ;;  %v1534_v52 = vld [vmem:[%s4509_s15 + $0x24f0] sm:$0xf]  ;;  %v355_v54 = vld [vmem:[%s4509_s15 + $0x18] sm:$0xff] }
  0x64   : > { %1900 = vmatpush.xpose.msra.mxu1 %v1137_v19  ;;  %1940 = vmatpush.xpose.msra.mxu3 %v1139_v20  ;;  %v1533_v55 = vld [vmem:[%s4509_s15 + $0x24e8] sm:$0xf]  ;;  %v1535_v56 = vld [vmem:[%s4509_s15 + $0x24f8] sm:$0xf]  ;;  %v1434_v57 = vld [vmem:[%s4509_s15 + $0x21d0] sm:$0xff] }
  0x65   : > { %v1436_v58 = vld [vmem:[%s4509_s15 + $0x21e0] sm:$0xff]  ;;  %v1435_v59 = vld [vmem:[%s4509_s15 + $0x21d8] sm:$0xff]  ;;  %v1437_v60 = vld [vmem:[%s4509_s15 + $0x21e8] sm:$0xff] }
  0x66   : > { %v327_v61 = vld [vmem:[%s4502_s24] sm:$0xff]  ;;  %v1336_v62 = vld [vmem:[%s4509_s15 + $0x1ec0] sm:$0xff] }
  0x67   : > { %1881 = vmatpush.xpose.msra.mxu0 %v1038_v21  ;;  %1921 = vmatpush.xpose.msra.mxu2 %v1040_v22  ;;  %v1338_v63 = vld [vmem:[%s4509_s15 + $0x1ed0] sm:$0xff]  ;;  %1651 = vst [vmem:[#allocation1] ss:$4 sm:$0xff] %v327_v61  ;;  %v1337_v0 = vld [vmem:[%s4509_s15 + $0x1ec8] sm:$0xff]  ;;  %v1339_v1 = vld [vmem:[%s4509_s15 + $0x1ed8] sm:$0xff] }
  0x68   : > { %1901 = vmatpush.xpose.msra.mxu1 %v1039_v23  ;;  %1941 = vmatpush.xpose.msra.mxu3 %v1041_v24  ;;  %v1238_v2 = vld [vmem:[%s4509_s15 + $0x1bb0] sm:$0xff]  ;;  %v1240_v3 = vld [vmem:[%s4509_s15 + $0x1bc0] sm:$0xff]  ;;  %v1239_v4 = vld [vmem:[%s4509_s15 + $0x1bb8] sm:$0xff] }
  0x69   : > { %v1241_v5 = vld [vmem:[%s4509_s15 + $0x1bc8] sm:$0xff]  ;;  %v328_v7 = vld [vmem:[%s4502_s24 + $0x8] sm:$0xff] }
  0x6a   : > { %v1140_v8 = vld [vmem:[%s4509_s15 + $0x18a0] sm:$0xff]  ;;  %v1142_v9 = vld [vmem:[%s4509_s15 + $0x18b0] sm:$0xff]  ;;  %1653 = vst [vmem:[#allocation1 + $0x20] ss:$4 sm:$0xff] %v328_v7  ;;  %v1141_v12 = vld [vmem:[%s4509_s15 + $0x18a8] sm:$0xff] }
  0x6b   : > { %1882 = vmatpush.xpose.msra.mxu0 %v940_v25  ;;  %1922 = vmatpush.xpose.msra.mxu2 %v942_v26  ;;  %v1143_v13 = vld [vmem:[%s4509_s15 + $0x18b8] sm:$0xff]  ;;  %v1042_v15 = vld [vmem:[%s4509_s15 + $0x1590] sm:$0xff]  ;;  %v1044_v16 = vld [vmem:[%s4509_s15 + $0x15a0] sm:$0xff] }
  0x6c   : > { %1902 = vmatpush.xpose.msra.mxu1 %v941_v27  ;;  %1942 = vmatpush.xpose.msra.mxu3 %v943_v28  ;;  %v1043_v17 = vld [vmem:[%s4509_s15 + $0x1598] sm:$0xff]  ;;  %v1045_v18 = vld [vmem:[%s4509_s15 + $0x15a8] sm:$0xff]  ;;  %v944_v19 = vld [vmem:[%s4509_s15 + $0x1280] sm:$0xff] }
  0x6d   : > { %v946_v20 = vld [vmem:[%s4509_s15 + $0x1290] sm:$0xff]  ;;  %v945_v21 = vld [vmem:[%s4509_s15 + $0x1288] sm:$0xff]  ;;  %v947_v22 = vld [vmem:[%s4509_s15 + $0x1298] sm:$0xff] }
  0x6e   : > { %v1656_v6 = vld.sshfl [vmem:[#allocation1 + $0x10] sm:$0xff pattern:$0x73625140]  ;;  %v1654_v10 = vld.sshfl [vmem:[#allocation1] sm:$0xff pattern:$0x73625140] }
  0x6f   : > { %1883 = vmatpush.xpose.msra.mxu0 %v842_v29  ;;  %1923 = vmatpush.xpose.msra.mxu2 %v844_v30  ;;  %v1657_v11 = vld.sshfl [vmem:[#allocation1 + $0x18] sm:$0xff pattern:$0x73625140]  ;;  %v1655_v14 = vld.sshfl [vmem:[#allocation1 + $0x8] sm:$0xff pattern:$0x73625140] }
  0x70   : > { %1903 = vmatpush.xpose.msra.mxu1 %v843_v31  ;;  %1943 = vmatpush.xpose.msra.mxu3 %v845_v32  ;;  %v846_v23 = vld [vmem:[%s4509_s15 + $0xf70] sm:$0xff]  ;;  %v848_v24 = vld [vmem:[%s4509_s15 + $0xf80] sm:$0xff]  ;;  %v847_v25 = vld [vmem:[%s4509_s15 + $0xf78] sm:$0xff] }
  0x71   : > { %v849_v26 = vld [vmem:[%s4509_s15 + $0xf88] sm:$0xff]  ;;  %v748_v27 = vld [vmem:[%s4509_s15 + $0xc60] sm:$0xff]  ;;  %v750_v28 = vld [vmem:[%s4509_s15 + $0xc70] sm:$0xff] }
  0x72   : > { %v749_v29 = vld [vmem:[%s4509_s15 + $0xc68] sm:$0xff]  ;;  %v751_v30 = vld [vmem:[%s4509_s15 + $0xc78] sm:$0xff]  ;;  %v650_v31 = vld [vmem:[%s4509_s15 + $0x950] sm:$0xff] }
  0x73   : > { %1884 = vmatpush.xpose.msra.mxu0 %v744_v33  ;;  %1924 = vmatpush.xpose.msra.mxu2 %v746_v34  ;;  %v652_v32 = vld [vmem:[%s4509_s15 + $0x960] sm:$0xff]  ;;  %v651_v33 = vld [vmem:[%s4509_s15 + $0x958] sm:$0xff]  ;;  %v653_v34 = vld [vmem:[%s4509_s15 + $0x968] sm:$0xff] }
  0x74   : > { %1904 = vmatpush.xpose.msra.mxu1 %v745_v35  ;;  %1944 = vmatpush.xpose.msra.mxu3 %v747_v36  ;;  %v552_v35 = vld [vmem:[%s4509_s15 + $0x640] sm:$0xff]  ;;  %v554_v36 = vld [vmem:[%s4509_s15 + $0x650] sm:$0xff]  ;;  %v1341_v61 = vld [vmem:[%s4509_s15 + $0x1ee8] sm:$0xff] }
  0x75   : > { %v1147_v7 = vld [vmem:[%s4509_s15 + $0x18d8] sm:$0xff] }
  0x77   : > { %1885 = vmatpush.xpose.msra.mxu0 %v646_v37  ;;  %1925 = vmatpush.xpose.msra.mxu2 %v648_v38  ;;  %v553_v37 = vld [vmem:[%s4509_s15 + $0x648] sm:$0xff]  ;;  %v555_v38 = vld [vmem:[%s4509_s15 + $0x658] sm:$0xff] }
  0x78   : > { %1905 = vmatpush.xpose.msra.mxu1 %v647_v39  ;;  %1945 = vmatpush.xpose.msra.mxu3 %v649_v40  ;;  %v454_v39 = vld [vmem:[%s4509_s15 + $0x330] sm:$0xff]  ;;  %v456_v40 = vld [vmem:[%s4509_s15 + $0x340] sm:$0xff] }
  0x7b   : > { %1886 = vmatpush.xpose.msra.mxu0 %v548_v41  ;;  %1926 = vmatpush.xpose.msra.mxu2 %v550_v42  ;;  %v455_v41 = vld [vmem:[%s4509_s15 + $0x338] sm:$0xff]  ;;  %v457_v42 = vld [vmem:[%s4509_s15 + $0x348] sm:$0xff] }
  0x7c   : > { %1906 = vmatpush.xpose.msra.mxu1 %v549_v43  ;;  %1946 = vmatpush.xpose.msra.mxu3 %v551_v44  ;;  %v356_v43 = vld [vmem:[%s4509_s15 + $0x20] sm:$0xff]  ;;  %v358_v44 = vld [vmem:[%s4509_s15 + $0x30] sm:$0xff] }
  0x7f   : > { %1887 = vmatpush.xpose.msra.mxu0 %v450_v45  ;;  %1927 = vmatpush.xpose.msra.mxu2 %v452_v46  ;;  %v1536_v45 = vld [vmem:[%s4509_s15 + $0x2500] sm:$0xf]  ;;  %v1538_v46 = vld [vmem:[%s4509_s15 + $0x2510] sm:$0xf] }
  0x80   : > { %1907 = vmatpush.xpose.msra.mxu1 %v451_v47  ;;  %1947 = vmatpush.xpose.msra.mxu3 %v453_v48  ;;  %v357_v47 = vld [vmem:[%s4509_s15 + $0x28] sm:$0xff]  ;;  %v359_v48 = vld [vmem:[%s4509_s15 + $0x38] sm:$0xff] }
  0x83   : > { %1888 = vmatpush.xpose.msra.mxu0 %v352_v49  ;;  %1928 = vmatpush.xpose.msra.mxu2 %v354_v50  ;;  %v1537_v49 = vld [vmem:[%s4509_s15 + $0x2508] sm:$0xf]  ;;  %v1539_v50 = vld [vmem:[%s4509_s15 + $0x2518] sm:$0xf] }
  0x84   : > { %1908 = vmatpush.xpose.msra.mxu1 %v353_v53  ;;  %1948 = vmatpush.xpose.msra.mxu3 %v355_v54  ;;  %v1438_v53 = vld [vmem:[%s4509_s15 + $0x21f0] sm:$0xff]  ;;  %v1440_v54 = vld [vmem:[%s4509_s15 + $0x2200] sm:$0xff] }
  0x86   : > { %1929 = vmatmul.f32.vlgmr.msra.gmra.mxu2 %v1656_v6  ;;  %1889 = vmatmul.f32.vlgmr.msra.gmra.mxu0 %v1654_v10  ;;  %v1145_v6 = vld [vmem:[%s4509_s15 + $0x18c8] sm:$0xff]  ;;  %v1047_v10 = vld [vmem:[%s4509_s15 + $0x15b8] sm:$0xff] }
  0x87   : > { %1956 = vmatpush.xpose.msrb.mxu0 %v1532_v51  ;;  %1996 = vmatpush.xpose.msrb.mxu2 %v1534_v52  ;;  %v1660_v51 = vld.sshfl [vmem:[#allocation1 + $0x30] sm:$0xff pattern:$0x73625140]  ;;  %v1658_v52 = vld.sshfl [vmem:[#allocation1 + $0x20] sm:$0xff pattern:$0x73625140] }
  0x88   : > { %1976 = vmatpush.xpose.msrb.mxu1 %v1533_v55  ;;  %2016 = vmatpush.xpose.msrb.mxu3 %v1535_v56  ;;  %v1661_v55 = vld.sshfl [vmem:[#allocation1 + $0x38] sm:$0xff pattern:$0x73625140]  ;;  %v1659_v56 = vld.sshfl [vmem:[#allocation1 + $0x28] sm:$0xff pattern:$0x73625140] }
  0x89   : > { %1949 = vmatmul.f32.vlgmr.msra.gmra.mxu3 %v1657_v11  ;;  %1909 = vmatmul.f32.vlgmr.msra.gmra.mxu1 %v1655_v14  ;;  %v1049_v11 = vld [vmem:[%s4509_s15 + $0x15c8] sm:$0xff] }
  0x8a   : > { %v949_v14 = vld [vmem:[%s4509_s15 + $0x12a8] sm:$0xff] }
  0x8b   : > { %1957 = vmatpush.xpose.msrb.mxu0 %v1434_v57  ;;  %1997 = vmatpush.xpose.msrb.mxu2 %v1436_v58  ;;  %v1439_v57 = vld [vmem:[%s4509_s15 + $0x21f8] sm:$0xff]  ;;  %v1441_v58 = vld [vmem:[%s4509_s15 + $0x2208] sm:$0xff] }
  0x8c   : > { %1977 = vmatpush.xpose.msrb.mxu1 %v1435_v59  ;;  %2017 = vmatpush.xpose.msrb.mxu3 %v1437_v60  ;;  %v1340_v59 = vld [vmem:[%s4509_s15 + $0x1ee0] sm:$0xff]  ;;  %v1342_v60 = vld [vmem:[%s4509_s15 + $0x1ef0] sm:$0xff] }
  0x8f   : > { %1958 = vmatpush.xpose.msrb.mxu0 %v1336_v62  ;;  %1998 = vmatpush.xpose.msrb.mxu2 %v1338_v63  ;;  %v1343_v62 = vld [vmem:[%s4509_s15 + $0x1ef8] sm:$0xff]  ;;  %v1242_v63 = vld [vmem:[%s4509_s15 + $0x1bd0] sm:$0xff] }
  0x90   : > { %1978 = vmatpush.xpose.msrb.mxu1 %v1337_v0  ;;  %2018 = vmatpush.xpose.msrb.mxu3 %v1339_v1  ;;  %v1244_v0 = vld [vmem:[%s4509_s15 + $0x1be0] sm:$0xff] }
  0x91   : > { %v329_v1 = vld [vmem:[%s4502_s24 + $0x10] sm:$0xff] }
  0x92   : > { %1662 = vst [vmem:[#allocation1] ss:$4 sm:$0xff] %v329_v1  ;;  %v1050_v1 = vld [vmem:[%s4509_s15 + $0x15d0] sm:$0xff] }
  0x93   : > { %1959 = vmatpush.xpose.msrb.mxu0 %v1238_v2  ;;  %1999 = vmatpush.xpose.msrb.mxu2 %v1240_v3  ;;  %v1243_v2 = vld [vmem:[%s4509_s15 + $0x1bd8] sm:$0xff]  ;;  %v1245_v3 = vld [vmem:[%s4509_s15 + $0x1be8] sm:$0xff] }
  0x94   : > { %1979 = vmatpush.xpose.msrb.mxu1 %v1239_v4  ;;  %2019 = vmatpush.xpose.msrb.mxu3 %v1241_v5  ;;  %v1144_v4 = vld [vmem:[%s4509_s15 + $0x18c0] sm:$0xff]  ;;  %v1146_v5 = vld [vmem:[%s4509_s15 + $0x18d0] sm:$0xff] }
  0x97   : > { %1960 = vmatpush.xpose.msrb.mxu0 %v1140_v8  ;;  %2000 = vmatpush.xpose.msrb.mxu2 %v1142_v9  ;;  %v1046_v8 = vld [vmem:[%s4509_s15 + $0x15b0] sm:$0xff]  ;;  %v1048_v9 = vld [vmem:[%s4509_s15 + $0x15c0] sm:$0xff] }
  0x98   : > { %1980 = vmatpush.xpose.msrb.mxu1 %v1141_v12  ;;  %2020 = vmatpush.xpose.msrb.mxu3 %v1143_v13  ;;  %v948_v12 = vld [vmem:[%s4509_s15 + $0x12a0] sm:$0xff]  ;;  %v950_v13 = vld [vmem:[%s4509_s15 + $0x12b0] sm:$0xff] }
  0x9b   : > { %1961 = vmatpush.xpose.msrb.mxu0 %v1042_v15  ;;  %2001 = vmatpush.xpose.msrb.mxu2 %v1044_v16  ;;  %v951_v15 = vld [vmem:[%s4509_s15 + $0x12b8] sm:$0xff]  ;;  %v850_v16 = vld [vmem:[%s4509_s15 + $0xf90] sm:$0xff] }
  0x9c   : > { %1981 = vmatpush.xpose.msrb.mxu1 %v1043_v17  ;;  %2021 = vmatpush.xpose.msrb.mxu3 %v1045_v18  ;;  %v852_v17 = vld [vmem:[%s4509_s15 + $0xfa0] sm:$0xff]  ;;  %v851_v18 = vld [vmem:[%s4509_s15 + $0xf98] sm:$0xff] }
  0x9f   : > { %1962 = vmatpush.xpose.msrb.mxu0 %v944_v19  ;;  %2002 = vmatpush.xpose.msrb.mxu2 %v946_v20  ;;  %v853_v19 = vld [vmem:[%s4509_s15 + $0xfa8] sm:$0xff]  ;;  %v752_v20 = vld [vmem:[%s4509_s15 + $0xc80] sm:$0xff] }
  0xa0   : > { %1982 = vmatpush.xpose.msrb.mxu1 %v945_v21  ;;  %2022 = vmatpush.xpose.msrb.mxu3 %v947_v22  ;;  %v754_v21 = vld [vmem:[%s4509_s15 + $0xc90] sm:$0xff]  ;;  %v753_v22 = vld [vmem:[%s4509_s15 + $0xc88] sm:$0xff] }
  0xa3   : > { %1963 = vmatpush.xpose.msrb.mxu0 %v846_v23  ;;  %2003 = vmatpush.xpose.msrb.mxu2 %v848_v24  ;;  %v755_v23 = vld [vmem:[%s4509_s15 + $0xc98] sm:$0xff]  ;;  %v654_v24 = vld [vmem:[%s4509_s15 + $0x970] sm:$0xff] }
  0xa4   : > { %1983 = vmatpush.xpose.msrb.mxu1 %v847_v25  ;;  %2023 = vmatpush.xpose.msrb.mxu3 %v849_v26  ;;  %v656_v25 = vld [vmem:[%s4509_s15 + $0x980] sm:$0xff]  ;;  %v655_v26 = vld [vmem:[%s4509_s15 + $0x978] sm:$0xff] }
  0xa7   : > { %1964 = vmatpush.xpose.msrb.mxu0 %v748_v27  ;;  %2004 = vmatpush.xpose.msrb.mxu2 %v750_v28  ;;  %v657_v27 = vld [vmem:[%s4509_s15 + $0x988] sm:$0xff]  ;;  %v556_v28 = vld [vmem:[%s4509_s15 + $0x660] sm:$0xff] }
  0xa8   : > { %1984 = vmatpush.xpose.msrb.mxu1 %v749_v29  ;;  %2024 = vmatpush.xpose.msrb.mxu3 %v751_v30  ;;  %v558_v29 = vld [vmem:[%s4509_s15 + $0x670] sm:$0xff]  ;;  %v557_v30 = vld [vmem:[%s4509_s15 + $0x668] sm:$0xff] }
  0xab   : > { %1965 = vmatpush.xpose.msrb.mxu0 %v650_v31  ;;  %2005 = vmatpush.xpose.msrb.mxu2 %v652_v32  ;;  %v559_v31 = vld [vmem:[%s4509_s15 + $0x678] sm:$0xff]  ;;  %v458_v32 = vld [vmem:[%s4509_s15 + $0x350] sm:$0xff] }
  0xac   : > { %1985 = vmatpush.xpose.msrb.mxu1 %v651_v33  ;;  %2025 = vmatpush.xpose.msrb.mxu3 %v653_v34  ;;  %v460_v33 = vld [vmem:[%s4509_s15 + $0x360] sm:$0xff]  ;;  %v459_v34 = vld [vmem:[%s4509_s15 + $0x358] sm:$0xff] }
  0xaf   : > { %1966 = vmatpush.xpose.msrb.mxu0 %v552_v35  ;;  %2006 = vmatpush.xpose.msrb.mxu2 %v554_v36  ;;  %v461_v35 = vld [vmem:[%s4509_s15 + $0x368] sm:$0xff]  ;;  %v360_v36 = vld [vmem:[%s4509_s15 + $0x40] sm:$0xff] }
  0xb0   : > { %1986 = vmatpush.xpose.msrb.mxu1 %v553_v37  ;;  %2026 = vmatpush.xpose.msrb.mxu3 %v555_v38  ;;  %v362_v37 = vld [vmem:[%s4509_s15 + $0x50] sm:$0xff]  ;;  %v1540_v38 = vld [vmem:[%s4509_s15 + $0x2520] sm:$0xf] }
  0xb3   : > { %1967 = vmatpush.xpose.msrb.mxu0 %v454_v39  ;;  %2007 = vmatpush.xpose.msrb.mxu2 %v456_v40  ;;  %v1542_v39 = vld [vmem:[%s4509_s15 + $0x2530] sm:$0xf]  ;;  %v361_v40 = vld [vmem:[%s4509_s15 + $0x48] sm:$0xff] }
  0xb4   : > { %1987 = vmatpush.xpose.msrb.mxu1 %v455_v41  ;;  %2027 = vmatpush.xpose.msrb.mxu3 %v457_v42  ;;  %v363_v41 = vld [vmem:[%s4509_s15 + $0x58] sm:$0xff] }
  0xb5   : > { %v1664_v42 = vld.sshfl [vmem:[#allocation1] sm:$0xff pattern:$0x73625140] }
  0xb7   : > { %1968 = vmatpush.xpose.msrb.mxu0 %v356_v43  ;;  %2008 = vmatpush.xpose.msrb.mxu2 %v358_v44  ;;  %v1666_v43 = vld.sshfl [vmem:[#allocation1 + $0x10] sm:$0xff pattern:$0x73625140]  ;;  %v1541_v44 = vld [vmem:[%s4509_s15 + $0x2528] sm:$0xf] }
  0xb8   : > { %1988 = vmatpush.xpose.msrb.mxu1 %v357_v47  ;;  %2028 = vmatpush.xpose.msrb.mxu3 %v359_v48  ;;  %v1667_v47 = vld.sshfl [vmem:[#allocation1 + $0x18] sm:$0xff pattern:$0x73625140] }
  0xb9   : > { %v1442_v48 = vld [vmem:[%s4509_s15 + $0x2210] sm:$0xff] }
  0xba   : > { %2009 = vmatmul.f32.vlgmr.msrb.gmra.mxu2 %v1660_v51  ;;  %1969 = vmatmul.f32.vlgmr.msrb.gmra.mxu0 %v1658_v52  ;;  %v1445_v51 = vld [vmem:[%s4509_s15 + $0x2228] sm:$0xff]  ;;  %v1344_v52 = vld [vmem:[%s4509_s15 + $0x1f00] sm:$0xff] }
  0xbb   : > { %2036 = vmatpush.xpose.msra.mxu0 %v1536_v45  ;;  %2076 = vmatpush.xpose.msra.mxu2 %v1538_v46  ;;  %v1543_v45 = vld [vmem:[%s4509_s15 + $0x2538] sm:$0xf] }
  0xbc   : > { %2056 = vmatpush.xpose.msra.mxu1 %v1537_v49  ;;  %2096 = vmatpush.xpose.msra.mxu3 %v1539_v50  ;;  %v1665_v46 = vld.sshfl [vmem:[#allocation1 + $0x8] sm:$0xff pattern:$0x73625140] }
  0xbd   : > { %2029 = vmatmul.f32.vlgmr.msrb.gmra.mxu3 %v1661_v55  ;;  %1989 = vmatmul.f32.vlgmr.msrb.gmra.mxu1 %v1659_v56  ;;  %v1444_v49 = vld [vmem:[%s4509_s15 + $0x2220] sm:$0xff]  ;;  %v1443_v50 = vld [vmem:[%s4509_s15 + $0x2218] sm:$0xff]  ;;  %v1246_v56 = vld [vmem:[%s4509_s15 + $0x1bf0] sm:$0xff] }
  0xbe   : > { %v1347_v55 = vld [vmem:[%s4509_s15 + $0x1f18] sm:$0xff] }
  0xbf   : > { %2037 = vmatpush.xpose.msra.mxu0 %v1438_v53  ;;  %2077 = vmatpush.xpose.msra.mxu2 %v1440_v54  ;;  %v1346_v53 = vld [vmem:[%s4509_s15 + $0x1f10] sm:$0xff]  ;;  %v1345_v54 = vld [vmem:[%s4509_s15 + $0x1f08] sm:$0xff] }
  0xc0   : > { %2057 = vmatpush.xpose.msra.mxu1 %v1439_v57  ;;  %2097 = vmatpush.xpose.msra.mxu3 %v1441_v58  ;;  %v1248_v57 = vld [vmem:[%s4509_s15 + $0x1c00] sm:$0xff] }
  0xc1   : > { %v330_v58 = vld [vmem:[%s4502_s24 + $0x18] sm:$0xff] }
  0xc2   : > { %1663 = vst [vmem:[#allocation1 + $0x20] ss:$4 sm:$0xff] %v330_v58  ;;  %v1054_v58 = vld [vmem:[%s4509_s15 + $0x15f0] sm:$0xff] }
  0xc3   : > { %2038 = vmatpush.xpose.msra.mxu0 %v1340_v59  ;;  %2078 = vmatpush.xpose.msra.mxu2 %v1342_v60  ;;  %v1247_v59 = vld [vmem:[%s4509_s15 + $0x1bf8] sm:$0xff]  ;;  %v1249_v60 = vld [vmem:[%s4509_s15 + $0x1c08] sm:$0xff] }
  0xc4   : > { %2058 = vmatpush.xpose.msra.mxu1 %v1341_v61  ;;  %2098 = vmatpush.xpose.msra.mxu3 %v1343_v62  ;;  %v1148_v61 = vld [vmem:[%s4509_s15 + $0x18e0] sm:$0xff]  ;;  %v1150_v62 = vld [vmem:[%s4509_s15 + $0x18f0] sm:$0xff] }
  0xc7   : > { %2039 = vmatpush.xpose.msra.mxu0 %v1242_v63  ;;  %2079 = vmatpush.xpose.msra.mxu2 %v1244_v0  ;;  %v1149_v63 = vld [vmem:[%s4509_s15 + $0x18e8] sm:$0xff]  ;;  %v1151_v0 = vld [vmem:[%s4509_s15 + $0x18f8] sm:$0xff] }
  0xc8   : > { %2059 = vmatpush.xpose.msra.mxu1 %v1243_v2  ;;  %2099 = vmatpush.xpose.msra.mxu3 %v1245_v3  ;;  %v1052_v2 = vld [vmem:[%s4509_s15 + $0x15e0] sm:$0xff]  ;;  %v1051_v3 = vld [vmem:[%s4509_s15 + $0x15d8] sm:$0xff] }
  0xcb   : > { %2040 = vmatpush.xpose.msra.mxu0 %v1144_v4  ;;  %2080 = vmatpush.xpose.msra.mxu2 %v1146_v5  ;;  %v1053_v4 = vld [vmem:[%s4509_s15 + $0x15e8] sm:$0xff]  ;;  %v952_v5 = vld [vmem:[%s4509_s15 + $0x12c0] sm:$0xff] }
  0xcc   : > { %2060 = vmatpush.xpose.msra.mxu1 %v1145_v6  ;;  %2100 = vmatpush.xpose.msra.mxu3 %v1147_v7  ;;  %v954_v6 = vld [vmem:[%s4509_s15 + $0x12d0] sm:$0xff]  ;;  %v953_v7 = vld [vmem:[%s4509_s15 + $0x12c8] sm:$0xff] }
  0xcf   : > { %2041 = vmatpush.xpose.msra.mxu0 %v1046_v8  ;;  %2081 = vmatpush.xpose.msra.mxu2 %v1048_v9  ;;  %v955_v8 = vld [vmem:[%s4509_s15 + $0x12d8] sm:$0xff]  ;;  %v854_v9 = vld [vmem:[%s4509_s15 + $0xfb0] sm:$0xff] }
  0xd0   : > { %2061 = vmatpush.xpose.msra.mxu1 %v1047_v10  ;;  %2101 = vmatpush.xpose.msra.mxu3 %v1049_v11  ;;  %v856_v10 = vld [vmem:[%s4509_s15 + $0xfc0] sm:$0xff]  ;;  %v855_v11 = vld [vmem:[%s4509_s15 + $0xfb8] sm:$0xff] }
  0xd3   : > { %2042 = vmatpush.xpose.msra.mxu0 %v948_v12  ;;  %2082 = vmatpush.xpose.msra.mxu2 %v950_v13  ;;  %v857_v12 = vld [vmem:[%s4509_s15 + $0xfc8] sm:$0xff]  ;;  %v756_v13 = vld [vmem:[%s4509_s15 + $0xca0] sm:$0xff] }
  0xd4   : > { %2062 = vmatpush.xpose.msra.mxu1 %v949_v14  ;;  %2102 = vmatpush.xpose.msra.mxu3 %v951_v15  ;;  %v758_v14 = vld [vmem:[%s4509_s15 + $0xcb0] sm:$0xff]  ;;  %v757_v15 = vld [vmem:[%s4509_s15 + $0xca8] sm:$0xff] }
  0xd7   : > { %2043 = vmatpush.xpose.msra.mxu0 %v850_v16  ;;  %2083 = vmatpush.xpose.msra.mxu2 %v852_v17  ;;  %v759_v16 = vld [vmem:[%s4509_s15 + $0xcb8] sm:$0xff]  ;;  %v658_v17 = vld [vmem:[%s4509_s15 + $0x990] sm:$0xff] }
  0xd8   : > { %2063 = vmatpush.xpose.msra.mxu1 %v851_v18  ;;  %2103 = vmatpush.xpose.msra.mxu3 %v853_v19  ;;  %v660_v18 = vld [vmem:[%s4509_s15 + $0x9a0] sm:$0xff]  ;;  %v659_v19 = vld [vmem:[%s4509_s15 + $0x998] sm:$0xff] }
  0xdb   : > { %2044 = vmatpush.xpose.msra.mxu0 %v752_v20  ;;  %2084 = vmatpush.xpose.msra.mxu2 %v754_v21  ;;  %v661_v20 = vld [vmem:[%s4509_s15 + $0x9a8] sm:$0xff]  ;;  %v560_v21 = vld [vmem:[%s4509_s15 + $0x680] sm:$0xff] }
  0xdc   : > { %2064 = vmatpush.xpose.msra.mxu1 %v753_v22  ;;  %2104 = vmatpush.xpose.msra.mxu3 %v755_v23  ;;  %v562_v22 = vld [vmem:[%s4509_s15 + $0x690] sm:$0xff]  ;;  %v561_v23 = vld [vmem:[%s4509_s15 + $0x688] sm:$0xff] }
  0xdf   : > { %2045 = vmatpush.xpose.msra.mxu0 %v654_v24  ;;  %2085 = vmatpush.xpose.msra.mxu2 %v656_v25  ;;  %v563_v24 = vld [vmem:[%s4509_s15 + $0x698] sm:$0xff]  ;;  %v462_v25 = vld [vmem:[%s4509_s15 + $0x370] sm:$0xff] }
  0xe0   : > { %2065 = vmatpush.xpose.msra.mxu1 %v655_v26  ;;  %2105 = vmatpush.xpose.msra.mxu3 %v657_v27  ;;  %v464_v26 = vld [vmem:[%s4509_s15 + $0x380] sm:$0xff]  ;;  %v463_v27 = vld [vmem:[%s4509_s15 + $0x378] sm:$0xff] }
  0xe3   : > { %2046 = vmatpush.xpose.msra.mxu0 %v556_v28  ;;  %2086 = vmatpush.xpose.msra.mxu2 %v558_v29  ;;  %v465_v28 = vld [vmem:[%s4509_s15 + $0x388] sm:$0xff]  ;;  %v364_v29 = vld [vmem:[%s4509_s15 + $0x60] sm:$0xff] }
  0xe4   : > { %2066 = vmatpush.xpose.msra.mxu1 %v557_v30  ;;  %2106 = vmatpush.xpose.msra.mxu3 %v559_v31  ;;  %v366_v30 = vld [vmem:[%s4509_s15 + $0x70] sm:$0xff]  ;;  %v1544_v31 = vld [vmem:[%s4509_s15 + $0x2540] sm:$0xf] }
  0xe7   : > { %2047 = vmatpush.xpose.msra.mxu0 %v458_v32  ;;  %2087 = vmatpush.xpose.msra.mxu2 %v460_v33  ;;  %v1546_v32 = vld [vmem:[%s4509_s15 + $0x2550] sm:$0xf]  ;;  %v365_v33 = vld [vmem:[%s4509_s15 + $0x68] sm:$0xff] }
  0xe8   : > { %2067 = vmatpush.xpose.msra.mxu1 %v459_v34  ;;  %2107 = vmatpush.xpose.msra.mxu3 %v461_v35  ;;  %v367_v34 = vld [vmem:[%s4509_s15 + $0x78] sm:$0xff] }
  0xe9   : > { %v1668_v35 = vld.sshfl [vmem:[#allocation1 + $0x20] sm:$0xff pattern:$0x73625140] }
  0xeb   : > { %2048 = vmatpush.xpose.msra.mxu0 %v360_v36  ;;  %2088 = vmatpush.xpose.msra.mxu2 %v362_v37  ;;  %v1670_v36 = vld.sshfl [vmem:[#allocation1 + $0x30] sm:$0xff pattern:$0x73625140]  ;;  %v1545_v37 = vld [vmem:[%s4509_s15 + $0x2548] sm:$0xf] }
  0xec   : > { %2068 = vmatpush.xpose.msra.mxu1 %v361_v40  ;;  %2108 = vmatpush.xpose.msra.mxu3 %v363_v41  ;;  %v1671_v40 = vld.sshfl [vmem:[#allocation1 + $0x38] sm:$0xff pattern:$0x73625140] }
  0xed   : > { %v1446_v41 = vld [vmem:[%s4509_s15 + $0x2230] sm:$0xff] }
  0xee   : > { %2049 = vmatmul.f32.vlgmr.msra.gmra.mxu0 %v1664_v42  ;;  %2089 = vmatmul.f32.vlgmr.msra.gmra.mxu2 %v1666_v43  ;;  %v1448_v42 = vld [vmem:[%s4509_s15 + $0x2240] sm:$0xff]  ;;  %v1447_v43 = vld [vmem:[%s4509_s15 + $0x2238] sm:$0xff] }
  0xef   : > { %2116 = vmatpush.xpose.msrb.mxu0 %v1540_v38  ;;  %2156 = vmatpush.xpose.msrb.mxu2 %v1542_v39  ;;  %v1547_v38 = vld [vmem:[%s4509_s15 + $0x2558] sm:$0xf] }
  0xf0   : > { %2136 = vmatpush.xpose.msrb.mxu1 %v1541_v44  ;;  %2176 = vmatpush.xpose.msrb.mxu3 %v1543_v45  ;;  %v1669_v39 = vld.sshfl [vmem:[#allocation1 + $0x28] sm:$0xff pattern:$0x73625140] }
  0xf1   : > { %2069 = vmatmul.f32.vlgmr.msra.gmra.mxu1 %v1665_v46  ;;  %2109 = vmatmul.f32.vlgmr.msra.gmra.mxu3 %v1667_v47  ;;  %v1449_v44 = vld [vmem:[%s4509_s15 + $0x2248] sm:$0xff]  ;;  %v1348_v45 = vld [vmem:[%s4509_s15 + $0x1f20] sm:$0xff]  ;;  %v1350_v46 = vld [vmem:[%s4509_s15 + $0x1f30] sm:$0xff] }
  0xf2   : > { %v1349_v47 = vld [vmem:[%s4509_s15 + $0x1f28] sm:$0xff] }
  0xf3   : > { %2117 = vmatpush.xpose.msrb.mxu0 %v1442_v48  ;;  %2157 = vmatpush.xpose.msrb.mxu2 %v1444_v49  ;;  %v1351_v48 = vld [vmem:[%s4509_s15 + $0x1f38] sm:$0xff]  ;;  %v1250_v49 = vld [vmem:[%s4509_s15 + $0x1c10] sm:$0xff] }
  0xf4   : > { %2137 = vmatpush.xpose.msrb.mxu1 %v1443_v50  ;;  %2177 = vmatpush.xpose.msrb.mxu3 %v1445_v51  ;;  %v1252_v50 = vld [vmem:[%s4509_s15 + $0x1c20] sm:$0xff]  ;;  %v331_v51 = vld [vmem:[%s4502_s24 + $0x20] sm:$0xff] }
  0xf5   : > { %1672 = vst [vmem:[#allocation1] ss:$4 sm:$0xff] %v331_v51  ;;  %v1058_v51 = vld [vmem:[%s4509_s15 + $0x1610] sm:$0xff] }
  0xf7   : > { %2118 = vmatpush.xpose.msrb.mxu0 %v1344_v52  ;;  %2158 = vmatpush.xpose.msrb.mxu2 %v1346_v53  ;;  %v1251_v52 = vld [vmem:[%s4509_s15 + $0x1c18] sm:$0xff]  ;;  %v1253_v53 = vld [vmem:[%s4509_s15 + $0x1c28] sm:$0xff] }
  0xf8   : > { %2138 = vmatpush.xpose.msrb.mxu1 %v1345_v54  ;;  %2178 = vmatpush.xpose.msrb.mxu3 %v1347_v55  ;;  %v1152_v54 = vld [vmem:[%s4509_s15 + $0x1900] sm:$0xff]  ;;  %v1154_v55 = vld [vmem:[%s4509_s15 + $0x1910] sm:$0xff] }
  0xfb   : > { %2119 = vmatpush.xpose.msrb.mxu0 %v1246_v56  ;;  %2159 = vmatpush.xpose.msrb.mxu2 %v1248_v57  ;;  %v1153_v56 = vld [vmem:[%s4509_s15 + $0x1908] sm:$0xff]  ;;  %v1155_v57 = vld [vmem:[%s4509_s15 + $0x1918] sm:$0xff] }
  0xfc   : > { %2139 = vmatpush.xpose.msrb.mxu1 %v1247_v59  ;;  %2179 = vmatpush.xpose.msrb.mxu3 %v1249_v60  ;;  %v1056_v59 = vld [vmem:[%s4509_s15 + $0x1600] sm:$0xff]  ;;  %v1055_v60 = vld [vmem:[%s4509_s15 + $0x15f8] sm:$0xff] }
  0xff   : > { %2120 = vmatpush.xpose.msrb.mxu0 %v1148_v61  ;;  %2160 = vmatpush.xpose.msrb.mxu2 %v1150_v62  ;;  %v1057_v61 = vld [vmem:[%s4509_s15 + $0x1608] sm:$0xff]  ;;  %v956_v62 = vld [vmem:[%s4509_s15 + $0x12e0] sm:$0xff] }
 0x100   : > { %2140 = vmatpush.xpose.msrb.mxu1 %v1149_v63  ;;  %2180 = vmatpush.xpose.msrb.mxu3 %v1151_v0  ;;  %v958_v63 = vld [vmem:[%s4509_s15 + $0x12f0] sm:$0xff]  ;;  %v957_v0 = vld [vmem:[%s4509_s15 + $0x12e8] sm:$0xff] }
 0x103   : > { %2121 = vmatpush.xpose.msrb.mxu0 %v1050_v1  ;;  %2161 = vmatpush.xpose.msrb.mxu2 %v1052_v2  ;;  %v959_v1 = vld [vmem:[%s4509_s15 + $0x12f8] sm:$0xff]  ;;  %v858_v2 = vld [vmem:[%s4509_s15 + $0xfd0] sm:$0xff] }
 0x104   : > { %2141 = vmatpush.xpose.msrb.mxu1 %v1051_v3  ;;  %2181 = vmatpush.xpose.msrb.mxu3 %v1053_v4  ;;  %v860_v3 = vld [vmem:[%s4509_s15 + $0xfe0] sm:$0xff]  ;;  %v859_v4 = vld [vmem:[%s4509_s15 + $0xfd8] sm:$0xff] }
 0x107   : > { %2122 = vmatpush.xpose.msrb.mxu0 %v952_v5  ;;  %2162 = vmatpush.xpose.msrb.mxu2 %v954_v6  ;;  %v861_v5 = vld [vmem:[%s4509_s15 + $0xfe8] sm:$0xff]  ;;  %v760_v6 = vld [vmem:[%s4509_s15 + $0xcc0] sm:$0xff] }
 0x108   : > { %2142 = vmatpush.xpose.msrb.mxu1 %v953_v7  ;;  %2182 = vmatpush.xpose.msrb.mxu3 %v955_v8  ;;  %v762_v7 = vld [vmem:[%s4509_s15 + $0xcd0] sm:$0xff]  ;;  %v761_v8 = vld [vmem:[%s4509_s15 + $0xcc8] sm:$0xff] }
 0x10b   : > { %2123 = vmatpush.xpose.msrb.mxu0 %v854_v9  ;;  %2163 = vmatpush.xpose.msrb.mxu2 %v856_v10  ;;  %v763_v9 = vld [vmem:[%s4509_s15 + $0xcd8] sm:$0xff]  ;;  %v662_v10 = vld [vmem:[%s4509_s15 + $0x9b0] sm:$0xff] }
 0x10c   : > { %2143 = vmatpush.xpose.msrb.mxu1 %v855_v11  ;;  %2183 = vmatpush.xpose.msrb.mxu3 %v857_v12  ;;  %v664_v11 = vld [vmem:[%s4509_s15 + $0x9c0] sm:$0xff]  ;;  %v663_v12 = vld [vmem:[%s4509_s15 + $0x9b8] sm:$0xff] }
 0x10f   : > { %2124 = vmatpush.xpose.msrb.mxu0 %v756_v13  ;;  %2164 = vmatpush.xpose.msrb.mxu2 %v758_v14  ;;  %v665_v13 = vld [vmem:[%s4509_s15 + $0x9c8] sm:$0xff]  ;;  %v564_v14 = vld [vmem:[%s4509_s15 + $0x6a0] sm:$0xff] }
 0x110   : > { %2144 = vmatpush.xpose.msrb.mxu1 %v757_v15  ;;  %2184 = vmatpush.xpose.msrb.mxu3 %v759_v16  ;;  %v566_v15 = vld [vmem:[%s4509_s15 + $0x6b0] sm:$0xff]  ;;  %v565_v16 = vld [vmem:[%s4509_s15 + $0x6a8] sm:$0xff] }
 0x113   : > { %2125 = vmatpush.xpose.msrb.mxu0 %v658_v17  ;;  %2165 = vmatpush.xpose.msrb.mxu2 %v660_v18  ;;  %v567_v17 = vld [vmem:[%s4509_s15 + $0x6b8] sm:$0xff]  ;;  %v466_v18 = vld [vmem:[%s4509_s15 + $0x390] sm:$0xff] }
 0x114   : > { %2145 = vmatpush.xpose.msrb.mxu1 %v659_v19  ;;  %2185 = vmatpush.xpose.msrb.mxu3 %v661_v20  ;;  %v468_v19 = vld [vmem:[%s4509_s15 + $0x3a0] sm:$0xff]  ;;  %v467_v20 = vld [vmem:[%s4509_s15 + $0x398] sm:$0xff] }
 0x117   : > { %2126 = vmatpush.xpose.msrb.mxu0 %v560_v21  ;;  %2166 = vmatpush.xpose.msrb.mxu2 %v562_v22  ;;  %v469_v21 = vld [vmem:[%s4509_s15 + $0x3a8] sm:$0xff]  ;;  %v368_v22 = vld [vmem:[%s4509_s15 + $0x80] sm:$0xff] }
 0x118   : > { %2146 = vmatpush.xpose.msrb.mxu1 %v561_v23  ;;  %2186 = vmatpush.xpose.msrb.mxu3 %v563_v24  ;;  %v370_v23 = vld [vmem:[%s4509_s15 + $0x90] sm:$0xff]  ;;  %v1548_v24 = vld [vmem:[%s4509_s15 + $0x2560] sm:$0xf] }
 0x11b   : > { %2127 = vmatpush.xpose.msrb.mxu0 %v462_v25  ;;  %2167 = vmatpush.xpose.msrb.mxu2 %v464_v26  ;;  %v1550_v25 = vld [vmem:[%s4509_s15 + $0x2570] sm:$0xf]  ;;  %v369_v26 = vld [vmem:[%s4509_s15 + $0x88] sm:$0xff] }
 0x11c   : > { %2147 = vmatpush.xpose.msrb.mxu1 %v463_v27  ;;  %2187 = vmatpush.xpose.msrb.mxu3 %v465_v28  ;;  %v371_v27 = vld [vmem:[%s4509_s15 + $0x98] sm:$0xff] }
 0x11d   : > { %v1674_v28 = vld.sshfl [vmem:[#allocation1] sm:$0xff pattern:$0x73625140] }
 0x11f   : > { %2128 = vmatpush.xpose.msrb.mxu0 %v364_v29  ;;  %2168 = vmatpush.xpose.msrb.mxu2 %v366_v30  ;;  %v1676_v29 = vld.sshfl [vmem:[#allocation1 + $0x10] sm:$0xff pattern:$0x73625140]  ;;  %v1549_v30 = vld [vmem:[%s4509_s15 + $0x2568] sm:$0xf] }
 0x120   : > { %2148 = vmatpush.xpose.msrb.mxu1 %v365_v33  ;;  %2188 = vmatpush.xpose.msrb.mxu3 %v367_v34  ;;  %v1677_v33 = vld.sshfl [vmem:[#allocation1 + $0x18] sm:$0xff pattern:$0x73625140] }
 0x121   : > { %v1450_v34 = vld [vmem:[%s4509_s15 + $0x2250] sm:$0xff] }
 0x122   : > { %2129 = vmatmul.f32.vlgmr.msrb.gmra.mxu0 %v1668_v35  ;;  %2169 = vmatmul.f32.vlgmr.msrb.gmra.mxu2 %v1670_v36  ;;  %v1452_v35 = vld [vmem:[%s4509_s15 + $0x2260] sm:$0xff]  ;;  %v1451_v36 = vld [vmem:[%s4509_s15 + $0x2258] sm:$0xff] }
 0x123   : > { %2196 = vmatpush.xpose.msra.mxu0 %v1544_v31  ;;  %2236 = vmatpush.xpose.msra.mxu2 %v1546_v32  ;;  %v1551_v31 = vld [vmem:[%s4509_s15 + $0x2578] sm:$0xf] }
 0x124   : > { %2216 = vmatpush.xpose.msra.mxu1 %v1545_v37  ;;  %2256 = vmatpush.xpose.msra.mxu3 %v1547_v38  ;;  %v1675_v32 = vld.sshfl [vmem:[#allocation1 + $0x8] sm:$0xff pattern:$0x73625140] }
 0x125   : > { %2149 = vmatmul.f32.vlgmr.msrb.gmra.mxu1 %v1669_v39  ;;  %2189 = vmatmul.f32.vlgmr.msrb.gmra.mxu3 %v1671_v40  ;;  %v1453_v37 = vld [vmem:[%s4509_s15 + $0x2268] sm:$0xff]  ;;  %v1352_v38 = vld [vmem:[%s4509_s15 + $0x1f40] sm:$0xff]  ;;  %v1354_v39 = vld [vmem:[%s4509_s15 + $0x1f50] sm:$0xff] }
 0x126   : > { %v1353_v40 = vld [vmem:[%s4509_s15 + $0x1f48] sm:$0xff] }
 0x127   : > { %2197 = vmatpush.xpose.msra.mxu0 %v1446_v41  ;;  %2237 = vmatpush.xpose.msra.mxu2 %v1448_v42  ;;  %v1355_v41 = vld [vmem:[%s4509_s15 + $0x1f58] sm:$0xff]  ;;  %v1254_v42 = vld [vmem:[%s4509_s15 + $0x1c30] sm:$0xff] }
 0x128   : > { %2217 = vmatpush.xpose.msra.mxu1 %v1447_v43  ;;  %2257 = vmatpush.xpose.msra.mxu3 %v1449_v44  ;;  %v1256_v43 = vld [vmem:[%s4509_s15 + $0x1c40] sm:$0xff] }
 0x129   : > { %v332_v44 = vld [vmem:[%s4502_s24 + $0x28] sm:$0xff] }
 0x12a   : > { %1673 = vst [vmem:[#allocation1 + $0x20] ss:$4 sm:$0xff] %v332_v44  ;;  %v1062_v44 = vld [vmem:[%s4509_s15 + $0x1630] sm:$0xff] }
 0x12b   : > { %2198 = vmatpush.xpose.msra.mxu0 %v1348_v45  ;;  %2238 = vmatpush.xpose.msra.mxu2 %v1350_v46  ;;  %v1255_v45 = vld [vmem:[%s4509_s15 + $0x1c38] sm:$0xff]  ;;  %v1257_v46 = vld [vmem:[%s4509_s15 + $0x1c48] sm:$0xff] }
 0x12c   : > { %2218 = vmatpush.xpose.msra.mxu1 %v1349_v47  ;;  %2258 = vmatpush.xpose.msra.mxu3 %v1351_v48  ;;  %v1156_v47 = vld [vmem:[%s4509_s15 + $0x1920] sm:$0xff]  ;;  %v1158_v48 = vld [vmem:[%s4509_s15 + $0x1930] sm:$0xff] }
 0x12f   : > { %2199 = vmatpush.xpose.msra.mxu0 %v1250_v49  ;;  %2239 = vmatpush.xpose.msra.mxu2 %v1252_v50  ;;  %v1157_v49 = vld [vmem:[%s4509_s15 + $0x1928] sm:$0xff]  ;;  %v1159_v50 = vld [vmem:[%s4509_s15 + $0x1938] sm:$0xff] }
 0x130   : > { %2219 = vmatpush.xpose.msra.mxu1 %v1251_v52  ;;  %2259 = vmatpush.xpose.msra.mxu3 %v1253_v53  ;;  %v1060_v52 = vld [vmem:[%s4509_s15 + $0x1620] sm:$0xff]  ;;  %v1059_v53 = vld [vmem:[%s4509_s15 + $0x1618] sm:$0xff] }
 0x133   : > { %2200 = vmatpush.xpose.msra.mxu0 %v1152_v54  ;;  %2240 = vmatpush.xpose.msra.mxu2 %v1154_v55  ;;  %v1061_v54 = vld [vmem:[%s4509_s15 + $0x1628] sm:$0xff]  ;;  %v960_v55 = vld [vmem:[%s4509_s15 + $0x1300] sm:$0xff] }
 0x134   : > { %2220 = vmatpush.xpose.msra.mxu1 %v1153_v56  ;;  %2260 = vmatpush.xpose.msra.mxu3 %v1155_v57  ;;  %v962_v56 = vld [vmem:[%s4509_s15 + $0x1310] sm:$0xff]  ;;  %v961_v57 = vld [vmem:[%s4509_s15 + $0x1308] sm:$0xff] }
 0x137   : > { %2201 = vmatpush.xpose.msra.mxu0 %v1054_v58  ;;  %2241 = vmatpush.xpose.msra.mxu2 %v1056_v59  ;;  %v963_v58 = vld [vmem:[%s4509_s15 + $0x1318] sm:$0xff]  ;;  %v862_v59 = vld [vmem:[%s4509_s15 + $0xff0] sm:$0xff] }
 0x138   : > { %2221 = vmatpush.xpose.msra.mxu1 %v1055_v60  ;;  %2261 = vmatpush.xpose.msra.mxu3 %v1057_v61  ;;  %v864_v60 = vld [vmem:[%s4509_s15 + $0x1000] sm:$0xff]  ;;  %v863_v61 = vld [vmem:[%s4509_s15 + $0xff8] sm:$0xff] }
 0x13b   : > { %2202 = vmatpush.xpose.msra.mxu0 %v956_v62  ;;  %2242 = vmatpush.xpose.msra.mxu2 %v958_v63  ;;  %v865_v62 = vld [vmem:[%s4509_s15 + $0x1008] sm:$0xff]  ;;  %v764_v63 = vld [vmem:[%s4509_s15 + $0xce0] sm:$0xff] }
 0x13c   : > { %2222 = vmatpush.xpose.msra.mxu1 %v957_v0  ;;  %2262 = vmatpush.xpose.msra.mxu3 %v959_v1  ;;  %v766_v0 = vld [vmem:[%s4509_s15 + $0xcf0] sm:$0xff]  ;;  %v765_v1 = vld [vmem:[%s4509_s15 + $0xce8] sm:$0xff] }
 0x13f   : > { %2203 = vmatpush.xpose.msra.mxu0 %v858_v2  ;;  %2243 = vmatpush.xpose.msra.mxu2 %v860_v3  ;;  %v767_v2 = vld [vmem:[%s4509_s15 + $0xcf8] sm:$0xff]  ;;  %v666_v3 = vld [vmem:[%s4509_s15 + $0x9d0] sm:$0xff] }
 0x140   : > { %2223 = vmatpush.xpose.msra.mxu1 %v859_v4  ;;  %2263 = vmatpush.xpose.msra.mxu3 %v861_v5  ;;  %v668_v4 = vld [vmem:[%s4509_s15 + $0x9e0] sm:$0xff]  ;;  %v667_v5 = vld [vmem:[%s4509_s15 + $0x9d8] sm:$0xff] }
 0x143   : > { %2204 = vmatpush.xpose.msra.mxu0 %v760_v6  ;;  %2244 = vmatpush.xpose.msra.mxu2 %v762_v7  ;;  %v669_v6 = vld [vmem:[%s4509_s15 + $0x9e8] sm:$0xff]  ;;  %v568_v7 = vld [vmem:[%s4509_s15 + $0x6c0] sm:$0xff] }
 0x144   : > { %2224 = vmatpush.xpose.msra.mxu1 %v761_v8  ;;  %2264 = vmatpush.xpose.msra.mxu3 %v763_v9  ;;  %v570_v8 = vld [vmem:[%s4509_s15 + $0x6d0] sm:$0xff]  ;;  %v569_v9 = vld [vmem:[%s4509_s15 + $0x6c8] sm:$0xff] }
 0x147   : > { %2205 = vmatpush.xpose.msra.mxu0 %v662_v10  ;;  %2245 = vmatpush.xpose.msra.mxu2 %v664_v11  ;;  %v571_v10 = vld [vmem:[%s4509_s15 + $0x6d8] sm:$0xff]  ;;  %v470_v11 = vld [vmem:[%s4509_s15 + $0x3b0] sm:$0xff] }
 0x148   : > { %2225 = vmatpush.xpose.msra.mxu1 %v663_v12  ;;  %2265 = vmatpush.xpose.msra.mxu3 %v665_v13  ;;  %v472_v12 = vld [vmem:[%s4509_s15 + $0x3c0] sm:$0xff]  ;;  %v471_v13 = vld [vmem:[%s4509_s15 + $0x3b8] sm:$0xff] }
 0x14b   : > { %2206 = vmatpush.xpose.msra.mxu0 %v564_v14  ;;  %2246 = vmatpush.xpose.msra.mxu2 %v566_v15  ;;  %v473_v14 = vld [vmem:[%s4509_s15 + $0x3c8] sm:$0xff]  ;;  %v372_v15 = vld [vmem:[%s4509_s15 + $0xa0] sm:$0xff] }
 0x14c   : > { %2226 = vmatpush.xpose.msra.mxu1 %v565_v16  ;;  %2266 = vmatpush.xpose.msra.mxu3 %v567_v17  ;;  %v374_v16 = vld [vmem:[%s4509_s15 + $0xb0] sm:$0xff]  ;;  %v1552_v17 = vld [vmem:[%s4509_s15 + $0x2580] sm:$0xf] }
 0x14f   : > { %2207 = vmatpush.xpose.msra.mxu0 %v466_v18  ;;  %2247 = vmatpush.xpose.msra.mxu2 %v468_v19  ;;  %v1554_v18 = vld [vmem:[%s4509_s15 + $0x2590] sm:$0xf]  ;;  %v373_v19 = vld [vmem:[%s4509_s15 + $0xa8] sm:$0xff] }
 0x150   : > { %2227 = vmatpush.xpose.msra.mxu1 %v467_v20  ;;  %2267 = vmatpush.xpose.msra.mxu3 %v469_v21  ;;  %v375_v20 = vld [vmem:[%s4509_s15 + $0xb8] sm:$0xff] }
 0x151   : > { %v1678_v21 = vld.sshfl [vmem:[#allocation1 + $0x20] sm:$0xff pattern:$0x73625140] }
 0x153   : > { %2208 = vmatpush.xpose.msra.mxu0 %v368_v22  ;;  %2248 = vmatpush.xpose.msra.mxu2 %v370_v23  ;;  %v1680_v22 = vld.sshfl [vmem:[#allocation1 + $0x30] sm:$0xff pattern:$0x73625140]  ;;  %v1553_v23 = vld [vmem:[%s4509_s15 + $0x2588] sm:$0xf] }
 0x154   : > { %2228 = vmatpush.xpose.msra.mxu1 %v369_v26  ;;  %2268 = vmatpush.xpose.msra.mxu3 %v371_v27  ;;  %v1681_v26 = vld.sshfl [vmem:[#allocation1 + $0x38] sm:$0xff pattern:$0x73625140] }
 0x155   : > { %v1454_v27 = vld [vmem:[%s4509_s15 + $0x2270] sm:$0xff] }
 0x156   : > { %2209 = vmatmul.f32.vlgmr.msra.gmra.mxu0 %v1674_v28  ;;  %2249 = vmatmul.f32.vlgmr.msra.gmra.mxu2 %v1676_v29  ;;  %v1456_v28 = vld [vmem:[%s4509_s15 + $0x2280] sm:$0xff]  ;;  %v1455_v29 = vld [vmem:[%s4509_s15 + $0x2278] sm:$0xff] }
 0x157   : > { %2276 = vmatpush.xpose.msrb.mxu0 %v1548_v24  ;;  %2316 = vmatpush.xpose.msrb.mxu2 %v1550_v25  ;;  %v1555_v24 = vld [vmem:[%s4509_s15 + $0x2598] sm:$0xf] }
 0x158   : > { %2296 = vmatpush.xpose.msrb.mxu1 %v1549_v30  ;;  %2336 = vmatpush.xpose.msrb.mxu3 %v1551_v31  ;;  %v1679_v25 = vld.sshfl [vmem:[#allocation1 + $0x28] sm:$0xff pattern:$0x73625140] }
 0x159   : > { %2229 = vmatmul.f32.vlgmr.msra.gmra.mxu1 %v1675_v32  ;;  %2269 = vmatmul.f32.vlgmr.msra.gmra.mxu3 %v1677_v33  ;;  %v1457_v30 = vld [vmem:[%s4509_s15 + $0x2288] sm:$0xff]  ;;  %v1356_v31 = vld [vmem:[%s4509_s15 + $0x1f60] sm:$0xff]  ;;  %v1358_v32 = vld [vmem:[%s4509_s15 + $0x1f70] sm:$0xff] }
 0x15a   : > { %v1357_v33 = vld [vmem:[%s4509_s15 + $0x1f68] sm:$0xff] }
 0x15b   : > { %2277 = vmatpush.xpose.msrb.mxu0 %v1450_v34  ;;  %2317 = vmatpush.xpose.msrb.mxu2 %v1452_v35  ;;  %v1359_v34 = vld [vmem:[%s4509_s15 + $0x1f78] sm:$0xff]  ;;  %v1258_v35 = vld [vmem:[%s4509_s15 + $0x1c50] sm:$0xff] }
 0x15c   : > { %2297 = vmatpush.xpose.msrb.mxu1 %v1451_v36  ;;  %2337 = vmatpush.xpose.msrb.mxu3 %v1453_v37  ;;  %v1260_v36 = vld [vmem:[%s4509_s15 + $0x1c60] sm:$0xff] }
 0x15d   : > { %v333_v37 = vld [vmem:[%s4502_s24 + $0x30] sm:$0xff] }
 0x15e   : > { %1682 = vst [vmem:[#allocation1] ss:$4 sm:$0xff] %v333_v37  ;;  %v1066_v37 = vld [vmem:[%s4509_s15 + $0x1650] sm:$0xff] }
 0x15f   : > { %2278 = vmatpush.xpose.msrb.mxu0 %v1352_v38  ;;  %2318 = vmatpush.xpose.msrb.mxu2 %v1354_v39  ;;  %v1259_v38 = vld [vmem:[%s4509_s15 + $0x1c58] sm:$0xff]  ;;  %v1261_v39 = vld [vmem:[%s4509_s15 + $0x1c68] sm:$0xff] }
 0x160   : > { %2298 = vmatpush.xpose.msrb.mxu1 %v1353_v40  ;;  %2338 = vmatpush.xpose.msrb.mxu3 %v1355_v41  ;;  %v1160_v40 = vld [vmem:[%s4509_s15 + $0x1940] sm:$0xff]  ;;  %v1162_v41 = vld [vmem:[%s4509_s15 + $0x1950] sm:$0xff] }
 0x163   : > { %2279 = vmatpush.xpose.msrb.mxu0 %v1254_v42  ;;  %2319 = vmatpush.xpose.msrb.mxu2 %v1256_v43  ;;  %v1161_v42 = vld [vmem:[%s4509_s15 + $0x1948] sm:$0xff]  ;;  %v1163_v43 = vld [vmem:[%s4509_s15 + $0x1958] sm:$0xff] }
 0x164   : > { %2299 = vmatpush.xpose.msrb.mxu1 %v1255_v45  ;;  %2339 = vmatpush.xpose.msrb.mxu3 %v1257_v46  ;;  %v1064_v45 = vld [vmem:[%s4509_s15 + $0x1640] sm:$0xff]  ;;  %v1063_v46 = vld [vmem:[%s4509_s15 + $0x1638] sm:$0xff] }
 0x167   : > { %2280 = vmatpush.xpose.msrb.mxu0 %v1156_v47  ;;  %2320 = vmatpush.xpose.msrb.mxu2 %v1158_v48  ;;  %v1065_v47 = vld [vmem:[%s4509_s15 + $0x1648] sm:$0xff]  ;;  %v964_v48 = vld [vmem:[%s4509_s15 + $0x1320] sm:$0xff] }
 0x168   : > { %2300 = vmatpush.xpose.msrb.mxu1 %v1157_v49  ;;  %2340 = vmatpush.xpose.msrb.mxu3 %v1159_v50  ;;  %v966_v49 = vld [vmem:[%s4509_s15 + $0x1330] sm:$0xff]  ;;  %v965_v50 = vld [vmem:[%s4509_s15 + $0x1328] sm:$0xff] }
 0x16b   : > { %2281 = vmatpush.xpose.msrb.mxu0 %v1058_v51  ;;  %2321 = vmatpush.xpose.msrb.mxu2 %v1060_v52  ;;  %v967_v51 = vld [vmem:[%s4509_s15 + $0x1338] sm:$0xff]  ;;  %v866_v52 = vld [vmem:[%s4509_s15 + $0x1010] sm:$0xff] }
 0x16c   : > { %2301 = vmatpush.xpose.msrb.mxu1 %v1059_v53  ;;  %2341 = vmatpush.xpose.msrb.mxu3 %v1061_v54  ;;  %v868_v53 = vld [vmem:[%s4509_s15 + $0x1020] sm:$0xff]  ;;  %v867_v54 = vld [vmem:[%s4509_s15 + $0x1018] sm:$0xff] }
 0x16f   : > { %2282 = vmatpush.xpose.msrb.mxu0 %v960_v55  ;;  %2322 = vmatpush.xpose.msrb.mxu2 %v962_v56  ;;  %v869_v55 = vld [vmem:[%s4509_s15 + $0x1028] sm:$0xff]  ;;  %v768_v56 = vld [vmem:[%s4509_s15 + $0xd00] sm:$0xff] }
 0x170   : > { %2302 = vmatpush.xpose.msrb.mxu1 %v961_v57  ;;  %2342 = vmatpush.xpose.msrb.mxu3 %v963_v58  ;;  %v770_v57 = vld [vmem:[%s4509_s15 + $0xd10] sm:$0xff]  ;;  %v769_v58 = vld [vmem:[%s4509_s15 + $0xd08] sm:$0xff] }
 0x173   : > { %2283 = vmatpush.xpose.msrb.mxu0 %v862_v59  ;;  %2323 = vmatpush.xpose.msrb.mxu2 %v864_v60  ;;  %v771_v59 = vld [vmem:[%s4509_s15 + $0xd18] sm:$0xff]  ;;  %v670_v60 = vld [vmem:[%s4509_s15 + $0x9f0] sm:$0xff] }
 0x174   : > { %2303 = vmatpush.xpose.msrb.mxu1 %v863_v61  ;;  %2343 = vmatpush.xpose.msrb.mxu3 %v865_v62  ;;  %v672_v61 = vld [vmem:[%s4509_s15 + $0xa00] sm:$0xff]  ;;  %v671_v62 = vld [vmem:[%s4509_s15 + $0x9f8] sm:$0xff] }
 0x177   : > { %2284 = vmatpush.xpose.msrb.mxu0 %v764_v63  ;;  %2324 = vmatpush.xpose.msrb.mxu2 %v766_v0  ;;  %v673_v63 = vld [vmem:[%s4509_s15 + $0xa08] sm:$0xff]  ;;  %v572_v0 = vld [vmem:[%s4509_s15 + $0x6e0] sm:$0xff] }
 0x178   : > { %2304 = vmatpush.xpose.msrb.mxu1 %v765_v1  ;;  %2344 = vmatpush.xpose.msrb.mxu3 %v767_v2  ;;  %v574_v1 = vld [vmem:[%s4509_s15 + $0x6f0] sm:$0xff]  ;;  %v573_v2 = vld [vmem:[%s4509_s15 + $0x6e8] sm:$0xff] }
 0x17b   : > { %2285 = vmatpush.xpose.msrb.mxu0 %v666_v3  ;;  %2325 = vmatpush.xpose.msrb.mxu2 %v668_v4  ;;  %v575_v3 = vld [vmem:[%s4509_s15 + $0x6f8] sm:$0xff]  ;;  %v474_v4 = vld [vmem:[%s4509_s15 + $0x3d0] sm:$0xff] }
 0x17c   : > { %2305 = vmatpush.xpose.msrb.mxu1 %v667_v5  ;;  %2345 = vmatpush.xpose.msrb.mxu3 %v669_v6  ;;  %v476_v5 = vld [vmem:[%s4509_s15 + $0x3e0] sm:$0xff]  ;;  %v475_v6 = vld [vmem:[%s4509_s15 + $0x3d8] sm:$0xff] }
 0x17f   : > { %2286 = vmatpush.xpose.msrb.mxu0 %v568_v7  ;;  %2326 = vmatpush.xpose.msrb.mxu2 %v570_v8  ;;  %v477_v7 = vld [vmem:[%s4509_s15 + $0x3e8] sm:$0xff]  ;;  %v376_v8 = vld [vmem:[%s4509_s15 + $0xc0] sm:$0xff] }
 0x180   : > { %2306 = vmatpush.xpose.msrb.mxu1 %v569_v9  ;;  %2346 = vmatpush.xpose.msrb.mxu3 %v571_v10  ;;  %v378_v9 = vld [vmem:[%s4509_s15 + $0xd0] sm:$0xff]  ;;  %v1556_v10 = vld [vmem:[%s4509_s15 + $0x25a0] sm:$0xf] }
 0x183   : > { %2287 = vmatpush.xpose.msrb.mxu0 %v470_v11  ;;  %2327 = vmatpush.xpose.msrb.mxu2 %v472_v12  ;;  %v1558_v11 = vld [vmem:[%s4509_s15 + $0x25b0] sm:$0xf]  ;;  %v377_v12 = vld [vmem:[%s4509_s15 + $0xc8] sm:$0xff] }
 0x184   : > { %2307 = vmatpush.xpose.msrb.mxu1 %v471_v13  ;;  %2347 = vmatpush.xpose.msrb.mxu3 %v473_v14  ;;  %v379_v13 = vld [vmem:[%s4509_s15 + $0xd8] sm:$0xff] }
 0x185   : > { %v1684_v14 = vld.sshfl [vmem:[#allocation1] sm:$0xff pattern:$0x73625140] }
 0x187   : > { %2288 = vmatpush.xpose.msrb.mxu0 %v372_v15  ;;  %2328 = vmatpush.xpose.msrb.mxu2 %v374_v16  ;;  %v1686_v15 = vld.sshfl [vmem:[#allocation1 + $0x10] sm:$0xff pattern:$0x73625140]  ;;  %v1557_v16 = vld [vmem:[%s4509_s15 + $0x25a8] sm:$0xf] }
 0x188   : > { %2308 = vmatpush.xpose.msrb.mxu1 %v373_v19  ;;  %2348 = vmatpush.xpose.msrb.mxu3 %v375_v20  ;;  %v1687_v19 = vld.sshfl [vmem:[#allocation1 + $0x18] sm:$0xff pattern:$0x73625140] }
 0x189   : > { %v1458_v20 = vld [vmem:[%s4509_s15 + $0x2290] sm:$0xff] }
 0x18a   : > { %2289 = vmatmul.f32.vlgmr.msrb.gmra.mxu0 %v1678_v21  ;;  %2329 = vmatmul.f32.vlgmr.msrb.gmra.mxu2 %v1680_v22  ;;  %v1460_v21 = vld [vmem:[%s4509_s15 + $0x22a0] sm:$0xff]  ;;  %v1459_v22 = vld [vmem:[%s4509_s15 + $0x2298] sm:$0xff] }
 0x18b   : > { %2356 = vmatpush.xpose.msra.mxu0 %v1552_v17  ;;  %2396 = vmatpush.xpose.msra.mxu2 %v1554_v18  ;;  %v1559_v17 = vld [vmem:[%s4509_s15 + $0x25b8] sm:$0xf] }
 0x18c   : > { %2376 = vmatpush.xpose.msra.mxu1 %v1553_v23  ;;  %2416 = vmatpush.xpose.msra.mxu3 %v1555_v24  ;;  %v1685_v18 = vld.sshfl [vmem:[#allocation1 + $0x8] sm:$0xff pattern:$0x73625140] }
 0x18d   : > { %2309 = vmatmul.f32.vlgmr.msrb.gmra.mxu1 %v1679_v25  ;;  %2349 = vmatmul.f32.vlgmr.msrb.gmra.mxu3 %v1681_v26  ;;  %v1461_v23 = vld [vmem:[%s4509_s15 + $0x22a8] sm:$0xff]  ;;  %v1360_v24 = vld [vmem:[%s4509_s15 + $0x1f80] sm:$0xff]  ;;  %v1362_v25 = vld [vmem:[%s4509_s15 + $0x1f90] sm:$0xff] }
 0x18e   : > { %v1361_v26 = vld [vmem:[%s4509_s15 + $0x1f88] sm:$0xff] }
 0x18f   : > { %2357 = vmatpush.xpose.msra.mxu0 %v1454_v27  ;;  %2397 = vmatpush.xpose.msra.mxu2 %v1456_v28  ;;  %v1363_v27 = vld [vmem:[%s4509_s15 + $0x1f98] sm:$0xff]  ;;  %v1262_v28 = vld [vmem:[%s4509_s15 + $0x1c70] sm:$0xff] }
 0x190   : > { %2377 = vmatpush.xpose.msra.mxu1 %v1455_v29  ;;  %2417 = vmatpush.xpose.msra.mxu3 %v1457_v30  ;;  %v1264_v29 = vld [vmem:[%s4509_s15 + $0x1c80] sm:$0xff] }
 0x191   : > { %v334_v30 = vld [vmem:[%s4502_s24 + $0x38] sm:$0xff] }
 0x192   : > { %1683 = vst [vmem:[#allocation1 + $0x20] ss:$4 sm:$0xff] %v334_v30  ;;  %v1070_v30 = vld [vmem:[%s4509_s15 + $0x1670] sm:$0xff] }
 0x193   : > { %2358 = vmatpush.xpose.msra.mxu0 %v1356_v31  ;;  %2398 = vmatpush.xpose.msra.mxu2 %v1358_v32  ;;  %v1263_v31 = vld [vmem:[%s4509_s15 + $0x1c78] sm:$0xff]  ;;  %v1265_v32 = vld [vmem:[%s4509_s15 + $0x1c88] sm:$0xff] }
 0x194   : > { %2378 = vmatpush.xpose.msra.mxu1 %v1357_v33  ;;  %2418 = vmatpush.xpose.msra.mxu3 %v1359_v34  ;;  %v1164_v33 = vld [vmem:[%s4509_s15 + $0x1960] sm:$0xff]  ;;  %v1166_v34 = vld [vmem:[%s4509_s15 + $0x1970] sm:$0xff] }
 0x197   : > { %2359 = vmatpush.xpose.msra.mxu0 %v1258_v35  ;;  %2399 = vmatpush.xpose.msra.mxu2 %v1260_v36  ;;  %v1165_v35 = vld [vmem:[%s4509_s15 + $0x1968] sm:$0xff]  ;;  %v1167_v36 = vld [vmem:[%s4509_s15 + $0x1978] sm:$0xff] }
 0x198   : > { %2379 = vmatpush.xpose.msra.mxu1 %v1259_v38  ;;  %2419 = vmatpush.xpose.msra.mxu3 %v1261_v39  ;;  %v1068_v38 = vld [vmem:[%s4509_s15 + $0x1660] sm:$0xff]  ;;  %v1067_v39 = vld [vmem:[%s4509_s15 + $0x1658] sm:$0xff] }
 0x19b   : > { %2360 = vmatpush.xpose.msra.mxu0 %v1160_v40  ;;  %2400 = vmatpush.xpose.msra.mxu2 %v1162_v41  ;;  %v1069_v40 = vld [vmem:[%s4509_s15 + $0x1668] sm:$0xff]  ;;  %v968_v41 = vld [vmem:[%s4509_s15 + $0x1340] sm:$0xff] }
 0x19c   : > { %2380 = vmatpush.xpose.msra.mxu1 %v1161_v42  ;;  %2420 = vmatpush.xpose.msra.mxu3 %v1163_v43  ;;  %v970_v42 = vld [vmem:[%s4509_s15 + $0x1350] sm:$0xff]  ;;  %v969_v43 = vld [vmem:[%s4509_s15 + $0x1348] sm:$0xff] }
 0x19f   : > { %2361 = vmatpush.xpose.msra.mxu0 %v1062_v44  ;;  %2401 = vmatpush.xpose.msra.mxu2 %v1064_v45  ;;  %v971_v44 = vld [vmem:[%s4509_s15 + $0x1358] sm:$0xff]  ;;  %v870_v45 = vld [vmem:[%s4509_s15 + $0x1030] sm:$0xff] }
 0x1a0   : > { %2381 = vmatpush.xpose.msra.mxu1 %v1063_v46  ;;  %2421 = vmatpush.xpose.msra.mxu3 %v1065_v47  ;;  %v872_v46 = vld [vmem:[%s4509_s15 + $0x1040] sm:$0xff]  ;;  %v871_v47 = vld [vmem:[%s4509_s15 + $0x1038] sm:$0xff] }
 0x1a3   : > { %2362 = vmatpush.xpose.msra.mxu0 %v964_v48  ;;  %2402 = vmatpush.xpose.msra.mxu2 %v966_v49  ;;  %v873_v48 = vld [vmem:[%s4509_s15 + $0x1048] sm:$0xff]  ;;  %v772_v49 = vld [vmem:[%s4509_s15 + $0xd20] sm:$0xff] }
 0x1a4   : > { %2382 = vmatpush.xpose.msra.mxu1 %v965_v50  ;;  %2422 = vmatpush.xpose.msra.mxu3 %v967_v51  ;;  %v774_v50 = vld [vmem:[%s4509_s15 + $0xd30] sm:$0xff]  ;;  %v773_v51 = vld [vmem:[%s4509_s15 + $0xd28] sm:$0xff] }
 0x1a7   : > { %2363 = vmatpush.xpose.msra.mxu0 %v866_v52  ;;  %2403 = vmatpush.xpose.msra.mxu2 %v868_v53  ;;  %v775_v52 = vld [vmem:[%s4509_s15 + $0xd38] sm:$0xff]  ;;  %v674_v53 = vld [vmem:[%s4509_s15 + $0xa10] sm:$0xff] }
 0x1a8   : > { %2383 = vmatpush.xpose.msra.mxu1 %v867_v54  ;;  %2423 = vmatpush.xpose.msra.mxu3 %v869_v55  ;;  %v676_v54 = vld [vmem:[%s4509_s15 + $0xa20] sm:$0xff]  ;;  %v675_v55 = vld [vmem:[%s4509_s15 + $0xa18] sm:$0xff] }
 0x1ab   : > { %2364 = vmatpush.xpose.msra.mxu0 %v768_v56  ;;  %2404 = vmatpush.xpose.msra.mxu2 %v770_v57  ;;  %v677_v56 = vld [vmem:[%s4509_s15 + $0xa28] sm:$0xff]  ;;  %v576_v57 = vld [vmem:[%s4509_s15 + $0x700] sm:$0xff] }
 0x1ac   : > { %2384 = vmatpush.xpose.msra.mxu1 %v769_v58  ;;  %2424 = vmatpush.xpose.msra.mxu3 %v771_v59  ;;  %v578_v58 = vld [vmem:[%s4509_s15 + $0x710] sm:$0xff]  ;;  %v577_v59 = vld [vmem:[%s4509_s15 + $0x708] sm:$0xff] }
 0x1af   : > { %2365 = vmatpush.xpose.msra.mxu0 %v670_v60  ;;  %2405 = vmatpush.xpose.msra.mxu2 %v672_v61  ;;  %v579_v60 = vld [vmem:[%s4509_s15 + $0x718] sm:$0xff]  ;;  %v478_v61 = vld [vmem:[%s4509_s15 + $0x3f0] sm:$0xff] }
 0x1b0   : > { %2385 = vmatpush.xpose.msra.mxu1 %v671_v62  ;;  %2425 = vmatpush.xpose.msra.mxu3 %v673_v63  ;;  %v480_v62 = vld [vmem:[%s4509_s15 + $0x400] sm:$0xff]  ;;  %v479_v63 = vld [vmem:[%s4509_s15 + $0x3f8] sm:$0xff] }
 0x1b3   : > { %2366 = vmatpush.xpose.msra.mxu0 %v572_v0  ;;  %2406 = vmatpush.xpose.msra.mxu2 %v574_v1  ;;  %v481_v0 = vld [vmem:[%s4509_s15 + $0x408] sm:$0xff]  ;;  %v380_v1 = vld [vmem:[%s4509_s15 + $0xe0] sm:$0xff] }
 0x1b4   : > { %2386 = vmatpush.xpose.msra.mxu1 %v573_v2  ;;  %2426 = vmatpush.xpose.msra.mxu3 %v575_v3  ;;  %v382_v2 = vld [vmem:[%s4509_s15 + $0xf0] sm:$0xff]  ;;  %v1560_v3 = vld [vmem:[%s4509_s15 + $0x25c0] sm:$0xf] }
 0x1b7   : > { %2367 = vmatpush.xpose.msra.mxu0 %v474_v4  ;;  %2407 = vmatpush.xpose.msra.mxu2 %v476_v5  ;;  %v1562_v4 = vld [vmem:[%s4509_s15 + $0x25d0] sm:$0xf]  ;;  %v381_v5 = vld [vmem:[%s4509_s15 + $0xe8] sm:$0xff] }
 0x1b8   : > { %2387 = vmatpush.xpose.msra.mxu1 %v475_v6  ;;  %2427 = vmatpush.xpose.msra.mxu3 %v477_v7  ;;  %v383_v6 = vld [vmem:[%s4509_s15 + $0xf8] sm:$0xff] }
 0x1b9   : > { %v1688_v7 = vld.sshfl [vmem:[#allocation1 + $0x20] sm:$0xff pattern:$0x73625140] }
 0x1bb   : > { %2368 = vmatpush.xpose.msra.mxu0 %v376_v8  ;;  %2408 = vmatpush.xpose.msra.mxu2 %v378_v9  ;;  %v1690_v8 = vld.sshfl [vmem:[#allocation1 + $0x30] sm:$0xff pattern:$0x73625140]  ;;  %v1561_v9 = vld [vmem:[%s4509_s15 + $0x25c8] sm:$0xf] }
 0x1bc   : > { %2388 = vmatpush.xpose.msra.mxu1 %v377_v12  ;;  %2428 = vmatpush.xpose.msra.mxu3 %v379_v13  ;;  %v1691_v12 = vld.sshfl [vmem:[#allocation1 + $0x38] sm:$0xff pattern:$0x73625140] }
 0x1bd   : > { %v1462_v13 = vld [vmem:[%s4509_s15 + $0x22b0] sm:$0xff] }
 0x1be   : > { %2369 = vmatmul.f32.vlgmr.msra.gmra.mxu0 %v1684_v14  ;;  %2409 = vmatmul.f32.vlgmr.msra.gmra.mxu2 %v1686_v15  ;;  %v1464_v14 = vld [vmem:[%s4509_s15 + $0x22c0] sm:$0xff]  ;;  %v1463_v15 = vld [vmem:[%s4509_s15 + $0x22b8] sm:$0xff] }
 0x1bf   : > { %2436 = vmatpush.xpose.msrb.mxu0 %v1556_v10  ;;  %2476 = vmatpush.xpose.msrb.mxu2 %v1558_v11  ;;  %v1563_v10 = vld [vmem:[%s4509_s15 + $0x25d8] sm:$0xf] }
 0x1c0   : > { %2456 = vmatpush.xpose.msrb.mxu1 %v1557_v16  ;;  %2496 = vmatpush.xpose.msrb.mxu3 %v1559_v17  ;;  %v1689_v11 = vld.sshfl [vmem:[#allocation1 + $0x28] sm:$0xff pattern:$0x73625140] }
 0x1c1   : > { %2389 = vmatmul.f32.vlgmr.msra.gmra.mxu1 %v1685_v18  ;;  %2429 = vmatmul.f32.vlgmr.msra.gmra.mxu3 %v1687_v19  ;;  %v1465_v16 = vld [vmem:[%s4509_s15 + $0x22c8] sm:$0xff]  ;;  %v1364_v17 = vld [vmem:[%s4509_s15 + $0x1fa0] sm:$0xff]  ;;  %v1366_v18 = vld [vmem:[%s4509_s15 + $0x1fb0] sm:$0xff] }
 0x1c2   : > { %v1365_v19 = vld [vmem:[%s4509_s15 + $0x1fa8] sm:$0xff] }
 0x1c3   : > { %2437 = vmatpush.xpose.msrb.mxu0 %v1458_v20  ;;  %2477 = vmatpush.xpose.msrb.mxu2 %v1460_v21  ;;  %v1367_v20 = vld [vmem:[%s4509_s15 + $0x1fb8] sm:$0xff]  ;;  %v1266_v21 = vld [vmem:[%s4509_s15 + $0x1c90] sm:$0xff] }
 0x1c4   : > { %2457 = vmatpush.xpose.msrb.mxu1 %v1459_v22  ;;  %2497 = vmatpush.xpose.msrb.mxu3 %v1461_v23  ;;  %v1268_v22 = vld [vmem:[%s4509_s15 + $0x1ca0] sm:$0xff]  ;;  %v335_v23 = vld [vmem:[%s4502_s24 + $0x40] sm:$0xff] }
 0x1c5   : > { %1692 = vst [vmem:[#allocation1] ss:$4 sm:$0xff] %v335_v23  ;;  %v1074_v23 = vld [vmem:[%s4509_s15 + $0x1690] sm:$0xff] }
 0x1c7   : > { %2438 = vmatpush.xpose.msrb.mxu0 %v1360_v24  ;;  %2478 = vmatpush.xpose.msrb.mxu2 %v1362_v25  ;;  %v1267_v24 = vld [vmem:[%s4509_s15 + $0x1c98] sm:$0xff]  ;;  %v1269_v25 = vld [vmem:[%s4509_s15 + $0x1ca8] sm:$0xff] }
 0x1c8   : > { %2458 = vmatpush.xpose.msrb.mxu1 %v1361_v26  ;;  %2498 = vmatpush.xpose.msrb.mxu3 %v1363_v27  ;;  %v1168_v26 = vld [vmem:[%s4509_s15 + $0x1980] sm:$0xff]  ;;  %v1170_v27 = vld [vmem:[%s4509_s15 + $0x1990] sm:$0xff] }
 0x1cb   : > { %2439 = vmatpush.xpose.msrb.mxu0 %v1262_v28  ;;  %2479 = vmatpush.xpose.msrb.mxu2 %v1264_v29  ;;  %v1169_v28 = vld [vmem:[%s4509_s15 + $0x1988] sm:$0xff]  ;;  %v1171_v29 = vld [vmem:[%s4509_s15 + $0x1998] sm:$0xff] }
 0x1cc   : > { %2459 = vmatpush.xpose.msrb.mxu1 %v1263_v31  ;;  %2499 = vmatpush.xpose.msrb.mxu3 %v1265_v32  ;;  %v1072_v31 = vld [vmem:[%s4509_s15 + $0x1680] sm:$0xff]  ;;  %v1071_v32 = vld [vmem:[%s4509_s15 + $0x1678] sm:$0xff] }
 0x1cf   : > { %2440 = vmatpush.xpose.msrb.mxu0 %v1164_v33  ;;  %2480 = vmatpush.xpose.msrb.mxu2 %v1166_v34  ;;  %v1073_v33 = vld [vmem:[%s4509_s15 + $0x1688] sm:$0xff]  ;;  %v972_v34 = vld [vmem:[%s4509_s15 + $0x1360] sm:$0xff] }
 0x1d0   : > { %2460 = vmatpush.xpose.msrb.mxu1 %v1165_v35  ;;  %2500 = vmatpush.xpose.msrb.mxu3 %v1167_v36  ;;  %v974_v35 = vld [vmem:[%s4509_s15 + $0x1370] sm:$0xff]  ;;  %v973_v36 = vld [vmem:[%s4509_s15 + $0x1368] sm:$0xff] }
 0x1d3   : > { %2441 = vmatpush.xpose.msrb.mxu0 %v1066_v37  ;;  %2481 = vmatpush.xpose.msrb.mxu2 %v1068_v38  ;;  %v975_v37 = vld [vmem:[%s4509_s15 + $0x1378] sm:$0xff]  ;;  %v874_v38 = vld [vmem:[%s4509_s15 + $0x1050] sm:$0xff] }
 0x1d4   : > { %2461 = vmatpush.xpose.msrb.mxu1 %v1067_v39  ;;  %2501 = vmatpush.xpose.msrb.mxu3 %v1069_v40  ;;  %v876_v39 = vld [vmem:[%s4509_s15 + $0x1060] sm:$0xff]  ;;  %v875_v40 = vld [vmem:[%s4509_s15 + $0x1058] sm:$0xff] }
 0x1d7   : > { %2442 = vmatpush.xpose.msrb.mxu0 %v968_v41  ;;  %2482 = vmatpush.xpose.msrb.mxu2 %v970_v42  ;;  %v877_v41 = vld [vmem:[%s4509_s15 + $0x1068] sm:$0xff]  ;;  %v776_v42 = vld [vmem:[%s4509_s15 + $0xd40] sm:$0xff] }
 0x1d8   : > { %2462 = vmatpush.xpose.msrb.mxu1 %v969_v43  ;;  %2502 = vmatpush.xpose.msrb.mxu3 %v971_v44  ;;  %v778_v43 = vld [vmem:[%s4509_s15 + $0xd50] sm:$0xff]  ;;  %v777_v44 = vld [vmem:[%s4509_s15 + $0xd48] sm:$0xff] }
 0x1db   : > { %2443 = vmatpush.xpose.msrb.mxu0 %v870_v45  ;;  %2483 = vmatpush.xpose.msrb.mxu2 %v872_v46  ;;  %v779_v45 = vld [vmem:[%s4509_s15 + $0xd58] sm:$0xff]  ;;  %v678_v46 = vld [vmem:[%s4509_s15 + $0xa30] sm:$0xff] }
 0x1dc   : > { %2463 = vmatpush.xpose.msrb.mxu1 %v871_v47  ;;  %2503 = vmatpush.xpose.msrb.mxu3 %v873_v48  ;;  %v680_v47 = vld [vmem:[%s4509_s15 + $0xa40] sm:$0xff]  ;;  %v679_v48 = vld [vmem:[%s4509_s15 + $0xa38] sm:$0xff] }
 0x1df   : > { %2444 = vmatpush.xpose.msrb.mxu0 %v772_v49  ;;  %2484 = vmatpush.xpose.msrb.mxu2 %v774_v50  ;;  %v681_v49 = vld [vmem:[%s4509_s15 + $0xa48] sm:$0xff]  ;;  %v580_v50 = vld [vmem:[%s4509_s15 + $0x720] sm:$0xff] }
 0x1e0   : > { %2464 = vmatpush.xpose.msrb.mxu1 %v773_v51  ;;  %2504 = vmatpush.xpose.msrb.mxu3 %v775_v52  ;;  %v582_v51 = vld [vmem:[%s4509_s15 + $0x730] sm:$0xff]  ;;  %v581_v52 = vld [vmem:[%s4509_s15 + $0x728] sm:$0xff] }
 0x1e3   : > { %2445 = vmatpush.xpose.msrb.mxu0 %v674_v53  ;;  %2485 = vmatpush.xpose.msrb.mxu2 %v676_v54  ;;  %v583_v53 = vld [vmem:[%s4509_s15 + $0x738] sm:$0xff]  ;;  %v482_v54 = vld [vmem:[%s4509_s15 + $0x410] sm:$0xff] }
 0x1e4   : > { %2465 = vmatpush.xpose.msrb.mxu1 %v675_v55  ;;  %2505 = vmatpush.xpose.msrb.mxu3 %v677_v56  ;;  %v484_v55 = vld [vmem:[%s4509_s15 + $0x420] sm:$0xff]  ;;  %v483_v56 = vld [vmem:[%s4509_s15 + $0x418] sm:$0xff] }
 0x1e7   : > { %2446 = vmatpush.xpose.msrb.mxu0 %v576_v57  ;;  %2486 = vmatpush.xpose.msrb.mxu2 %v578_v58  ;;  %v485_v57 = vld [vmem:[%s4509_s15 + $0x428] sm:$0xff]  ;;  %v384_v58 = vld [vmem:[%s4509_s15 + $0x100] sm:$0xff] }
 0x1e8   : > { %2466 = vmatpush.xpose.msrb.mxu1 %v577_v59  ;;  %2506 = vmatpush.xpose.msrb.mxu3 %v579_v60  ;;  %v386_v59 = vld [vmem:[%s4509_s15 + $0x110] sm:$0xff]  ;;  %v1564_v60 = vld [vmem:[%s4509_s15 + $0x25e0] sm:$0xf] }
 0x1eb   : > { %2447 = vmatpush.xpose.msrb.mxu0 %v478_v61  ;;  %2487 = vmatpush.xpose.msrb.mxu2 %v480_v62  ;;  %v1566_v61 = vld [vmem:[%s4509_s15 + $0x25f0] sm:$0xf]  ;;  %v385_v62 = vld [vmem:[%s4509_s15 + $0x108] sm:$0xff] }
 0x1ec   : > { %2467 = vmatpush.xpose.msrb.mxu1 %v479_v63  ;;  %2507 = vmatpush.xpose.msrb.mxu3 %v481_v0  ;;  %v387_v63 = vld [vmem:[%s4509_s15 + $0x118] sm:$0xff] }
 0x1ed   : > { %v1694_v0 = vld.sshfl [vmem:[#allocation1] sm:$0xff pattern:$0x73625140] }
 0x1ef   : > { %2448 = vmatpush.xpose.msrb.mxu0 %v380_v1  ;;  %2488 = vmatpush.xpose.msrb.mxu2 %v382_v2  ;;  %v1696_v1 = vld.sshfl [vmem:[#allocation1 + $0x10] sm:$0xff pattern:$0x73625140]  ;;  %v1565_v2 = vld [vmem:[%s4509_s15 + $0x25e8] sm:$0xf] }
 0x1f0   : > { %2468 = vmatpush.xpose.msrb.mxu1 %v381_v5  ;;  %2508 = vmatpush.xpose.msrb.mxu3 %v383_v6  ;;  %v1697_v5 = vld.sshfl [vmem:[#allocation1 + $0x18] sm:$0xff pattern:$0x73625140] }
 0x1f1   : > { %v1466_v6 = vld [vmem:[%s4509_s15 + $0x22d0] sm:$0xff] }
 0x1f2   : > { %2449 = vmatmul.f32.vlgmr.msrb.gmra.mxu0 %v1688_v7  ;;  %2489 = vmatmul.f32.vlgmr.msrb.gmra.mxu2 %v1690_v8  ;;  %v1468_v7 = vld [vmem:[%s4509_s15 + $0x22e0] sm:$0xff]  ;;  %v1467_v8 = vld [vmem:[%s4509_s15 + $0x22d8] sm:$0xff] }
 0x1f3   : > { %2516 = vmatpush.xpose.msra.mxu0 %v1560_v3  ;;  %2556 = vmatpush.xpose.msra.mxu2 %v1562_v4  ;;  %v1567_v3 = vld [vmem:[%s4509_s15 + $0x25f8] sm:$0xf] }
 0x1f4   : > { %2536 = vmatpush.xpose.msra.mxu1 %v1561_v9  ;;  %2576 = vmatpush.xpose.msra.mxu3 %v1563_v10  ;;  %v1695_v4 = vld.sshfl [vmem:[#allocation1 + $0x8] sm:$0xff pattern:$0x73625140] }
 0x1f5   : > { %2469 = vmatmul.f32.vlgmr.msrb.gmra.mxu1 %v1689_v11  ;;  %2509 = vmatmul.f32.vlgmr.msrb.gmra.mxu3 %v1691_v12  ;;  %v1469_v9 = vld [vmem:[%s4509_s15 + $0x22e8] sm:$0xff]  ;;  %v1368_v10 = vld [vmem:[%s4509_s15 + $0x1fc0] sm:$0xff]  ;;  %v1370_v11 = vld [vmem:[%s4509_s15 + $0x1fd0] sm:$0xff] }
 0x1f6   : > { %v1369_v12 = vld [vmem:[%s4509_s15 + $0x1fc8] sm:$0xff] }
 0x1f7   : > { %2517 = vmatpush.xpose.msra.mxu0 %v1462_v13  ;;  %2557 = vmatpush.xpose.msra.mxu2 %v1464_v14  ;;  %v1371_v13 = vld [vmem:[%s4509_s15 + $0x1fd8] sm:$0xff]  ;;  %v1270_v14 = vld [vmem:[%s4509_s15 + $0x1cb0] sm:$0xff] }
 0x1f8   : > { %2537 = vmatpush.xpose.msra.mxu1 %v1463_v15  ;;  %2577 = vmatpush.xpose.msra.mxu3 %v1465_v16  ;;  %v1272_v15 = vld [vmem:[%s4509_s15 + $0x1cc0] sm:$0xff] }
 0x1f9   : > { %v336_v16 = vld [vmem:[%s4502_s24 + $0x48] sm:$0xff] }
 0x1fa   : > { %1693 = vst [vmem:[#allocation1 + $0x20] ss:$4 sm:$0xff] %v336_v16  ;;  %v1078_v16 = vld [vmem:[%s4509_s15 + $0x16b0] sm:$0xff] }
 0x1fb   : > { %2518 = vmatpush.xpose.msra.mxu0 %v1364_v17  ;;  %2558 = vmatpush.xpose.msra.mxu2 %v1366_v18  ;;  %v1271_v17 = vld [vmem:[%s4509_s15 + $0x1cb8] sm:$0xff]  ;;  %v1273_v18 = vld [vmem:[%s4509_s15 + $0x1cc8] sm:$0xff] }
 0x1fc   : > { %2538 = vmatpush.xpose.msra.mxu1 %v1365_v19  ;;  %2578 = vmatpush.xpose.msra.mxu3 %v1367_v20  ;;  %v1172_v19 = vld [vmem:[%s4509_s15 + $0x19a0] sm:$0xff]  ;;  %v1174_v20 = vld [vmem:[%s4509_s15 + $0x19b0] sm:$0xff] }
 0x1ff   : > { %2519 = vmatpush.xpose.msra.mxu0 %v1266_v21  ;;  %2559 = vmatpush.xpose.msra.mxu2 %v1268_v22  ;;  %v1173_v21 = vld [vmem:[%s4509_s15 + $0x19a8] sm:$0xff]  ;;  %v1175_v22 = vld [vmem:[%s4509_s15 + $0x19b8] sm:$0xff] }
 0x200   : > { %2539 = vmatpush.xpose.msra.mxu1 %v1267_v24  ;;  %2579 = vmatpush.xpose.msra.mxu3 %v1269_v25  ;;  %v1076_v24 = vld [vmem:[%s4509_s15 + $0x16a0] sm:$0xff]  ;;  %v1075_v25 = vld [vmem:[%s4509_s15 + $0x1698] sm:$0xff] }
 0x203   : > { %2520 = vmatpush.xpose.msra.mxu0 %v1168_v26  ;;  %2560 = vmatpush.xpose.msra.mxu2 %v1170_v27  ;;  %v1077_v26 = vld [vmem:[%s4509_s15 + $0x16a8] sm:$0xff]  ;;  %v976_v27 = vld [vmem:[%s4509_s15 + $0x1380] sm:$0xff] }
 0x204   : > { %2540 = vmatpush.xpose.msra.mxu1 %v1169_v28  ;;  %2580 = vmatpush.xpose.msra.mxu3 %v1171_v29  ;;  %v978_v28 = vld [vmem:[%s4509_s15 + $0x1390] sm:$0xff]  ;;  %v977_v29 = vld [vmem:[%s4509_s15 + $0x1388] sm:$0xff] }
 0x207   : > { %2521 = vmatpush.xpose.msra.mxu0 %v1070_v30  ;;  %2561 = vmatpush.xpose.msra.mxu2 %v1072_v31  ;;  %v979_v30 = vld [vmem:[%s4509_s15 + $0x1398] sm:$0xff]  ;;  %v878_v31 = vld [vmem:[%s4509_s15 + $0x1070] sm:$0xff] }
 0x208   : > { %2541 = vmatpush.xpose.msra.mxu1 %v1071_v32  ;;  %2581 = vmatpush.xpose.msra.mxu3 %v1073_v33  ;;  %v880_v32 = vld [vmem:[%s4509_s15 + $0x1080] sm:$0xff]  ;;  %v879_v33 = vld [vmem:[%s4509_s15 + $0x1078] sm:$0xff] }
 0x20b   : > { %2522 = vmatpush.xpose.msra.mxu0 %v972_v34  ;;  %2562 = vmatpush.xpose.msra.mxu2 %v974_v35  ;;  %v881_v34 = vld [vmem:[%s4509_s15 + $0x1088] sm:$0xff]  ;;  %v780_v35 = vld [vmem:[%s4509_s15 + $0xd60] sm:$0xff] }
 0x20c   : > { %2542 = vmatpush.xpose.msra.mxu1 %v973_v36  ;;  %2582 = vmatpush.xpose.msra.mxu3 %v975_v37  ;;  %v782_v36 = vld [vmem:[%s4509_s15 + $0xd70] sm:$0xff]  ;;  %v781_v37 = vld [vmem:[%s4509_s15 + $0xd68] sm:$0xff] }
 0x20f   : > { %2523 = vmatpush.xpose.msra.mxu0 %v874_v38  ;;  %2563 = vmatpush.xpose.msra.mxu2 %v876_v39  ;;  %v783_v38 = vld [vmem:[%s4509_s15 + $0xd78] sm:$0xff]  ;;  %v682_v39 = vld [vmem:[%s4509_s15 + $0xa50] sm:$0xff] }
 0x210   : > { %2543 = vmatpush.xpose.msra.mxu1 %v875_v40  ;;  %2583 = vmatpush.xpose.msra.mxu3 %v877_v41  ;;  %v684_v40 = vld [vmem:[%s4509_s15 + $0xa60] sm:$0xff]  ;;  %v683_v41 = vld [vmem:[%s4509_s15 + $0xa58] sm:$0xff] }
 0x213   : > { %2524 = vmatpush.xpose.msra.mxu0 %v776_v42  ;;  %2564 = vmatpush.xpose.msra.mxu2 %v778_v43  ;;  %v685_v42 = vld [vmem:[%s4509_s15 + $0xa68] sm:$0xff]  ;;  %v584_v43 = vld [vmem:[%s4509_s15 + $0x740] sm:$0xff] }
 0x214   : > { %2544 = vmatpush.xpose.msra.mxu1 %v777_v44  ;;  %2584 = vmatpush.xpose.msra.mxu3 %v779_v45  ;;  %v586_v44 = vld [vmem:[%s4509_s15 + $0x750] sm:$0xff]  ;;  %v585_v45 = vld [vmem:[%s4509_s15 + $0x748] sm:$0xff] }
 0x217   : > { %2525 = vmatpush.xpose.msra.mxu0 %v678_v46  ;;  %2565 = vmatpush.xpose.msra.mxu2 %v680_v47  ;;  %v587_v46 = vld [vmem:[%s4509_s15 + $0x758] sm:$0xff]  ;;  %v486_v47 = vld [vmem:[%s4509_s15 + $0x430] sm:$0xff] }
 0x218   : > { %2545 = vmatpush.xpose.msra.mxu1 %v679_v48  ;;  %2585 = vmatpush.xpose.msra.mxu3 %v681_v49  ;;  %v488_v48 = vld [vmem:[%s4509_s15 + $0x440] sm:$0xff]  ;;  %v487_v49 = vld [vmem:[%s4509_s15 + $0x438] sm:$0xff] }
 0x21b   : > { %2526 = vmatpush.xpose.msra.mxu0 %v580_v50  ;;  %2566 = vmatpush.xpose.msra.mxu2 %v582_v51  ;;  %v489_v50 = vld [vmem:[%s4509_s15 + $0x448] sm:$0xff]  ;;  %v388_v51 = vld [vmem:[%s4509_s15 + $0x120] sm:$0xff] }
 0x21c   : > { %2546 = vmatpush.xpose.msra.mxu1 %v581_v52  ;;  %2586 = vmatpush.xpose.msra.mxu3 %v583_v53  ;;  %v390_v52 = vld [vmem:[%s4509_s15 + $0x130] sm:$0xff]  ;;  %v1568_v53 = vld [vmem:[%s4509_s15 + $0x2600] sm:$0xf] }
 0x21f   : > { %2527 = vmatpush.xpose.msra.mxu0 %v482_v54  ;;  %2567 = vmatpush.xpose.msra.mxu2 %v484_v55  ;;  %v1570_v54 = vld [vmem:[%s4509_s15 + $0x2610] sm:$0xf]  ;;  %v389_v55 = vld [vmem:[%s4509_s15 + $0x128] sm:$0xff] }
 0x220   : > { %2547 = vmatpush.xpose.msra.mxu1 %v483_v56  ;;  %2587 = vmatpush.xpose.msra.mxu3 %v485_v57  ;;  %v391_v56 = vld [vmem:[%s4509_s15 + $0x138] sm:$0xff] }
 0x221   : > { %v1698_v57 = vld.sshfl [vmem:[#allocation1 + $0x20] sm:$0xff pattern:$0x73625140] }
 0x223   : > { %2528 = vmatpush.xpose.msra.mxu0 %v384_v58  ;;  %2568 = vmatpush.xpose.msra.mxu2 %v386_v59  ;;  %v1700_v58 = vld.sshfl [vmem:[#allocation1 + $0x30] sm:$0xff pattern:$0x73625140]  ;;  %v1569_v59 = vld [vmem:[%s4509_s15 + $0x2608] sm:$0xf] }
 0x224   : > { %2548 = vmatpush.xpose.msra.mxu1 %v385_v62  ;;  %2588 = vmatpush.xpose.msra.mxu3 %v387_v63  ;;  %v1701_v62 = vld.sshfl [vmem:[#allocation1 + $0x38] sm:$0xff pattern:$0x73625140] }
 0x225   : > { %v1470_v63 = vld [vmem:[%s4509_s15 + $0x22f0] sm:$0xff] }
 0x226   : > { %2529 = vmatmul.f32.vlgmr.msra.gmra.mxu0 %v1694_v0  ;;  %2569 = vmatmul.f32.vlgmr.msra.gmra.mxu2 %v1696_v1  ;;  %v1472_v0 = vld [vmem:[%s4509_s15 + $0x2300] sm:$0xff]  ;;  %v1471_v1 = vld [vmem:[%s4509_s15 + $0x22f8] sm:$0xff] }
 0x227   : > { %2596 = vmatpush.xpose.msrb.mxu0 %v1564_v60  ;;  %2636 = vmatpush.xpose.msrb.mxu2 %v1566_v61  ;;  %v1571_v60 = vld [vmem:[%s4509_s15 + $0x2618] sm:$0xf] }
 0x228   : > { %2616 = vmatpush.xpose.msrb.mxu1 %v1565_v2  ;;  %2656 = vmatpush.xpose.msrb.mxu3 %v1567_v3  ;;  %v1699_v61 = vld.sshfl [vmem:[#allocation1 + $0x28] sm:$0xff pattern:$0x73625140] }
 0x229   : > { %2549 = vmatmul.f32.vlgmr.msra.gmra.mxu1 %v1695_v4  ;;  %2589 = vmatmul.f32.vlgmr.msra.gmra.mxu3 %v1697_v5  ;;  %v1473_v2 = vld [vmem:[%s4509_s15 + $0x2308] sm:$0xff]  ;;  %v1372_v3 = vld [vmem:[%s4509_s15 + $0x1fe0] sm:$0xff]  ;;  %v1374_v4 = vld [vmem:[%s4509_s15 + $0x1ff0] sm:$0xff] }
 0x22a   : > { %v1373_v5 = vld [vmem:[%s4509_s15 + $0x1fe8] sm:$0xff] }
 0x22b   : > { %2597 = vmatpush.xpose.msrb.mxu0 %v1466_v6  ;;  %2637 = vmatpush.xpose.msrb.mxu2 %v1468_v7  ;;  %v1375_v6 = vld [vmem:[%s4509_s15 + $0x1ff8] sm:$0xff]  ;;  %v1274_v7 = vld [vmem:[%s4509_s15 + $0x1cd0] sm:$0xff] }
 0x22c   : > { %2617 = vmatpush.xpose.msrb.mxu1 %v1467_v8  ;;  %2657 = vmatpush.xpose.msrb.mxu3 %v1469_v9  ;;  %v1276_v8 = vld [vmem:[%s4509_s15 + $0x1ce0] sm:$0xff] }
 0x22d   : > { %v337_v9 = vld [vmem:[%s4502_s24 + $0x50] sm:$0xff] }
 0x22e   : > { %1702 = vst [vmem:[#allocation1] ss:$4 sm:$0xff] %v337_v9  ;;  %v1082_v9 = vld [vmem:[%s4509_s15 + $0x16d0] sm:$0xff] }
 0x22f   : > { %2598 = vmatpush.xpose.msrb.mxu0 %v1368_v10  ;;  %2638 = vmatpush.xpose.msrb.mxu2 %v1370_v11  ;;  %v1275_v10 = vld [vmem:[%s4509_s15 + $0x1cd8] sm:$0xff]  ;;  %v1277_v11 = vld [vmem:[%s4509_s15 + $0x1ce8] sm:$0xff] }
 0x230   : > { %2618 = vmatpush.xpose.msrb.mxu1 %v1369_v12  ;;  %2658 = vmatpush.xpose.msrb.mxu3 %v1371_v13  ;;  %v1176_v12 = vld [vmem:[%s4509_s15 + $0x19c0] sm:$0xff]  ;;  %v1178_v13 = vld [vmem:[%s4509_s15 + $0x19d0] sm:$0xff] }
 0x233   : > { %2599 = vmatpush.xpose.msrb.mxu0 %v1270_v14  ;;  %2639 = vmatpush.xpose.msrb.mxu2 %v1272_v15  ;;  %v1177_v14 = vld [vmem:[%s4509_s15 + $0x19c8] sm:$0xff]  ;;  %v1179_v15 = vld [vmem:[%s4509_s15 + $0x19d8] sm:$0xff] }
 0x234   : > { %2619 = vmatpush.xpose.msrb.mxu1 %v1271_v17  ;;  %2659 = vmatpush.xpose.msrb.mxu3 %v1273_v18  ;;  %v1080_v17 = vld [vmem:[%s4509_s15 + $0x16c0] sm:$0xff]  ;;  %v1079_v18 = vld [vmem:[%s4509_s15 + $0x16b8] sm:$0xff] }
 0x237   : > { %2600 = vmatpush.xpose.msrb.mxu0 %v1172_v19  ;;  %2640 = vmatpush.xpose.msrb.mxu2 %v1174_v20  ;;  %v1081_v19 = vld [vmem:[%s4509_s15 + $0x16c8] sm:$0xff]  ;;  %v980_v20 = vld [vmem:[%s4509_s15 + $0x13a0] sm:$0xff] }
 0x238   : > { %2620 = vmatpush.xpose.msrb.mxu1 %v1173_v21  ;;  %2660 = vmatpush.xpose.msrb.mxu3 %v1175_v22  ;;  %v982_v21 = vld [vmem:[%s4509_s15 + $0x13b0] sm:$0xff]  ;;  %v981_v22 = vld [vmem:[%s4509_s15 + $0x13a8] sm:$0xff] }
 0x23b   : > { %2601 = vmatpush.xpose.msrb.mxu0 %v1074_v23  ;;  %2641 = vmatpush.xpose.msrb.mxu2 %v1076_v24  ;;  %v983_v23 = vld [vmem:[%s4509_s15 + $0x13b8] sm:$0xff]  ;;  %v882_v24 = vld [vmem:[%s4509_s15 + $0x1090] sm:$0xff] }
 0x23c   : > { %2621 = vmatpush.xpose.msrb.mxu1 %v1075_v25  ;;  %2661 = vmatpush.xpose.msrb.mxu3 %v1077_v26  ;;  %v884_v25 = vld [vmem:[%s4509_s15 + $0x10a0] sm:$0xff]  ;;  %v883_v26 = vld [vmem:[%s4509_s15 + $0x1098] sm:$0xff] }
 0x23f   : > { %2602 = vmatpush.xpose.msrb.mxu0 %v976_v27  ;;  %2642 = vmatpush.xpose.msrb.mxu2 %v978_v28  ;;  %v885_v27 = vld [vmem:[%s4509_s15 + $0x10a8] sm:$0xff]  ;;  %v784_v28 = vld [vmem:[%s4509_s15 + $0xd80] sm:$0xff] }
 0x240   : > { %2622 = vmatpush.xpose.msrb.mxu1 %v977_v29  ;;  %2662 = vmatpush.xpose.msrb.mxu3 %v979_v30  ;;  %v786_v29 = vld [vmem:[%s4509_s15 + $0xd90] sm:$0xff]  ;;  %v785_v30 = vld [vmem:[%s4509_s15 + $0xd88] sm:$0xff] }
 0x243   : > { %2603 = vmatpush.xpose.msrb.mxu0 %v878_v31  ;;  %2643 = vmatpush.xpose.msrb.mxu2 %v880_v32  ;;  %v787_v31 = vld [vmem:[%s4509_s15 + $0xd98] sm:$0xff]  ;;  %v686_v32 = vld [vmem:[%s4509_s15 + $0xa70] sm:$0xff] }
 0x244   : > { %2623 = vmatpush.xpose.msrb.mxu1 %v879_v33  ;;  %2663 = vmatpush.xpose.msrb.mxu3 %v881_v34  ;;  %v688_v33 = vld [vmem:[%s4509_s15 + $0xa80] sm:$0xff]  ;;  %v687_v34 = vld [vmem:[%s4509_s15 + $0xa78] sm:$0xff] }
 0x247   : > { %2604 = vmatpush.xpose.msrb.mxu0 %v780_v35  ;;  %2644 = vmatpush.xpose.msrb.mxu2 %v782_v36  ;;  %v689_v35 = vld [vmem:[%s4509_s15 + $0xa88] sm:$0xff]  ;;  %v588_v36 = vld [vmem:[%s4509_s15 + $0x760] sm:$0xff] }
 0x248   : > { %2624 = vmatpush.xpose.msrb.mxu1 %v781_v37  ;;  %2664 = vmatpush.xpose.msrb.mxu3 %v783_v38  ;;  %v590_v37 = vld [vmem:[%s4509_s15 + $0x770] sm:$0xff]  ;;  %v589_v38 = vld [vmem:[%s4509_s15 + $0x768] sm:$0xff] }
 0x24b   : > { %2605 = vmatpush.xpose.msrb.mxu0 %v682_v39  ;;  %2645 = vmatpush.xpose.msrb.mxu2 %v684_v40  ;;  %v591_v39 = vld [vmem:[%s4509_s15 + $0x778] sm:$0xff]  ;;  %v490_v40 = vld [vmem:[%s4509_s15 + $0x450] sm:$0xff] }
 0x24c   : > { %2625 = vmatpush.xpose.msrb.mxu1 %v683_v41  ;;  %2665 = vmatpush.xpose.msrb.mxu3 %v685_v42  ;;  %v492_v41 = vld [vmem:[%s4509_s15 + $0x460] sm:$0xff]  ;;  %v491_v42 = vld [vmem:[%s4509_s15 + $0x458] sm:$0xff] }
 0x24f   : > { %2606 = vmatpush.xpose.msrb.mxu0 %v584_v43  ;;  %2646 = vmatpush.xpose.msrb.mxu2 %v586_v44  ;;  %v493_v43 = vld [vmem:[%s4509_s15 + $0x468] sm:$0xff]  ;;  %v392_v44 = vld [vmem:[%s4509_s15 + $0x140] sm:$0xff] }
 0x250   : > { %2626 = vmatpush.xpose.msrb.mxu1 %v585_v45  ;;  %2666 = vmatpush.xpose.msrb.mxu3 %v587_v46  ;;  %v394_v45 = vld [vmem:[%s4509_s15 + $0x150] sm:$0xff]  ;;  %v1572_v46 = vld [vmem:[%s4509_s15 + $0x2620] sm:$0xf] }
 0x253   : > { %2607 = vmatpush.xpose.msrb.mxu0 %v486_v47  ;;  %2647 = vmatpush.xpose.msrb.mxu2 %v488_v48  ;;  %v1574_v47 = vld [vmem:[%s4509_s15 + $0x2630] sm:$0xf]  ;;  %v393_v48 = vld [vmem:[%s4509_s15 + $0x148] sm:$0xff] }
 0x254   : > { %2627 = vmatpush.xpose.msrb.mxu1 %v487_v49  ;;  %2667 = vmatpush.xpose.msrb.mxu3 %v489_v50  ;;  %v395_v49 = vld [vmem:[%s4509_s15 + $0x158] sm:$0xff] }
 0x255   : > { %v1704_v50 = vld.sshfl [vmem:[#allocation1] sm:$0xff pattern:$0x73625140] }
 0x257   : > { %2608 = vmatpush.xpose.msrb.mxu0 %v388_v51  ;;  %2648 = vmatpush.xpose.msrb.mxu2 %v390_v52  ;;  %v1706_v51 = vld.sshfl [vmem:[#allocation1 + $0x10] sm:$0xff pattern:$0x73625140]  ;;  %v1573_v52 = vld [vmem:[%s4509_s15 + $0x2628] sm:$0xf] }
 0x258   : > { %2628 = vmatpush.xpose.msrb.mxu1 %v389_v55  ;;  %2668 = vmatpush.xpose.msrb.mxu3 %v391_v56  ;;  %v1707_v55 = vld.sshfl [vmem:[#allocation1 + $0x18] sm:$0xff pattern:$0x73625140] }
 0x259   : > { %v1474_v56 = vld [vmem:[%s4509_s15 + $0x2310] sm:$0xff] }
 0x25a   : > { %2609 = vmatmul.f32.vlgmr.msrb.gmra.mxu0 %v1698_v57  ;;  %2649 = vmatmul.f32.vlgmr.msrb.gmra.mxu2 %v1700_v58  ;;  %v1476_v57 = vld [vmem:[%s4509_s15 + $0x2320] sm:$0xff]  ;;  %v1475_v58 = vld [vmem:[%s4509_s15 + $0x2318] sm:$0xff] }
 0x25b   : > { %2676 = vmatpush.xpose.msra.mxu0 %v1568_v53  ;;  %2716 = vmatpush.xpose.msra.mxu2 %v1570_v54  ;;  %v1575_v53 = vld [vmem:[%s4509_s15 + $0x2638] sm:$0xf] }
 0x25c   : > { %2696 = vmatpush.xpose.msra.mxu1 %v1569_v59  ;;  %2736 = vmatpush.xpose.msra.mxu3 %v1571_v60  ;;  %v1705_v54 = vld.sshfl [vmem:[#allocation1 + $0x8] sm:$0xff pattern:$0x73625140] }
 0x25d   : > { %2629 = vmatmul.f32.vlgmr.msrb.gmra.mxu1 %v1699_v61  ;;  %2669 = vmatmul.f32.vlgmr.msrb.gmra.mxu3 %v1701_v62  ;;  %v1477_v59 = vld [vmem:[%s4509_s15 + $0x2328] sm:$0xff]  ;;  %v1376_v60 = vld [vmem:[%s4509_s15 + $0x2000] sm:$0xff]  ;;  %v1378_v61 = vld [vmem:[%s4509_s15 + $0x2010] sm:$0xff] }
 0x25e   : > { %v1377_v62 = vld [vmem:[%s4509_s15 + $0x2008] sm:$0xff] }
 0x25f   : > { %2677 = vmatpush.xpose.msra.mxu0 %v1470_v63  ;;  %2717 = vmatpush.xpose.msra.mxu2 %v1472_v0  ;;  %v1379_v63 = vld [vmem:[%s4509_s15 + $0x2018] sm:$0xff]  ;;  %v1278_v0 = vld [vmem:[%s4509_s15 + $0x1cf0] sm:$0xff] }
 0x260   : > { %2697 = vmatpush.xpose.msra.mxu1 %v1471_v1  ;;  %2737 = vmatpush.xpose.msra.mxu3 %v1473_v2  ;;  %v1280_v1 = vld [vmem:[%s4509_s15 + $0x1d00] sm:$0xff] }
 0x261   : > { %v338_v2 = vld [vmem:[%s4502_s24 + $0x58] sm:$0xff] }
 0x262   : > { %1703 = vst [vmem:[#allocation1 + $0x20] ss:$4 sm:$0xff] %v338_v2  ;;  %v1086_v2 = vld [vmem:[%s4509_s15 + $0x16f0] sm:$0xff] }
 0x263   : > { %2678 = vmatpush.xpose.msra.mxu0 %v1372_v3  ;;  %2718 = vmatpush.xpose.msra.mxu2 %v1374_v4  ;;  %v1279_v3 = vld [vmem:[%s4509_s15 + $0x1cf8] sm:$0xff]  ;;  %v1281_v4 = vld [vmem:[%s4509_s15 + $0x1d08] sm:$0xff] }
 0x264   : > { %2698 = vmatpush.xpose.msra.mxu1 %v1373_v5  ;;  %2738 = vmatpush.xpose.msra.mxu3 %v1375_v6  ;;  %v1180_v5 = vld [vmem:[%s4509_s15 + $0x19e0] sm:$0xff]  ;;  %v1182_v6 = vld [vmem:[%s4509_s15 + $0x19f0] sm:$0xff] }
 0x267   : > { %2679 = vmatpush.xpose.msra.mxu0 %v1274_v7  ;;  %2719 = vmatpush.xpose.msra.mxu2 %v1276_v8  ;;  %v1181_v7 = vld [vmem:[%s4509_s15 + $0x19e8] sm:$0xff]  ;;  %v1183_v8 = vld [vmem:[%s4509_s15 + $0x19f8] sm:$0xff] }
 0x268   : > { %2699 = vmatpush.xpose.msra.mxu1 %v1275_v10  ;;  %2739 = vmatpush.xpose.msra.mxu3 %v1277_v11  ;;  %v1084_v10 = vld [vmem:[%s4509_s15 + $0x16e0] sm:$0xff]  ;;  %v1083_v11 = vld [vmem:[%s4509_s15 + $0x16d8] sm:$0xff] }
 0x26b   : > { %2680 = vmatpush.xpose.msra.mxu0 %v1176_v12  ;;  %2720 = vmatpush.xpose.msra.mxu2 %v1178_v13  ;;  %v1085_v12 = vld [vmem:[%s4509_s15 + $0x16e8] sm:$0xff]  ;;  %v984_v13 = vld [vmem:[%s4509_s15 + $0x13c0] sm:$0xff] }
 0x26c   : > { %2700 = vmatpush.xpose.msra.mxu1 %v1177_v14  ;;  %2740 = vmatpush.xpose.msra.mxu3 %v1179_v15  ;;  %v986_v14 = vld [vmem:[%s4509_s15 + $0x13d0] sm:$0xff]  ;;  %v985_v15 = vld [vmem:[%s4509_s15 + $0x13c8] sm:$0xff] }
 0x26f   : > { %2681 = vmatpush.xpose.msra.mxu0 %v1078_v16  ;;  %2721 = vmatpush.xpose.msra.mxu2 %v1080_v17  ;;  %v987_v16 = vld [vmem:[%s4509_s15 + $0x13d8] sm:$0xff]  ;;  %v886_v17 = vld [vmem:[%s4509_s15 + $0x10b0] sm:$0xff] }
 0x270   : > { %2701 = vmatpush.xpose.msra.mxu1 %v1079_v18  ;;  %2741 = vmatpush.xpose.msra.mxu3 %v1081_v19  ;;  %v888_v18 = vld [vmem:[%s4509_s15 + $0x10c0] sm:$0xff]  ;;  %v887_v19 = vld [vmem:[%s4509_s15 + $0x10b8] sm:$0xff] }
 0x273   : > { %2682 = vmatpush.xpose.msra.mxu0 %v980_v20  ;;  %2722 = vmatpush.xpose.msra.mxu2 %v982_v21  ;;  %v889_v20 = vld [vmem:[%s4509_s15 + $0x10c8] sm:$0xff]  ;;  %v788_v21 = vld [vmem:[%s4509_s15 + $0xda0] sm:$0xff] }
 0x274   : > { %2702 = vmatpush.xpose.msra.mxu1 %v981_v22  ;;  %2742 = vmatpush.xpose.msra.mxu3 %v983_v23  ;;  %v790_v22 = vld [vmem:[%s4509_s15 + $0xdb0] sm:$0xff]  ;;  %v789_v23 = vld [vmem:[%s4509_s15 + $0xda8] sm:$0xff] }
 0x277   : > { %2683 = vmatpush.xpose.msra.mxu0 %v882_v24  ;;  %2723 = vmatpush.xpose.msra.mxu2 %v884_v25  ;;  %v791_v24 = vld [vmem:[%s4509_s15 + $0xdb8] sm:$0xff]  ;;  %v690_v25 = vld [vmem:[%s4509_s15 + $0xa90] sm:$0xff] }
 0x278   : > { %2703 = vmatpush.xpose.msra.mxu1 %v883_v26  ;;  %2743 = vmatpush.xpose.msra.mxu3 %v885_v27  ;;  %v692_v26 = vld [vmem:[%s4509_s15 + $0xaa0] sm:$0xff]  ;;  %v691_v27 = vld [vmem:[%s4509_s15 + $0xa98] sm:$0xff] }
 0x27b   : > { %2684 = vmatpush.xpose.msra.mxu0 %v784_v28  ;;  %2724 = vmatpush.xpose.msra.mxu2 %v786_v29  ;;  %v693_v28 = vld [vmem:[%s4509_s15 + $0xaa8] sm:$0xff]  ;;  %v592_v29 = vld [vmem:[%s4509_s15 + $0x780] sm:$0xff] }
 0x27c   : > { %2704 = vmatpush.xpose.msra.mxu1 %v785_v30  ;;  %2744 = vmatpush.xpose.msra.mxu3 %v787_v31  ;;  %v594_v30 = vld [vmem:[%s4509_s15 + $0x790] sm:$0xff]  ;;  %v593_v31 = vld [vmem:[%s4509_s15 + $0x788] sm:$0xff] }
 0x27f   : > { %2685 = vmatpush.xpose.msra.mxu0 %v686_v32  ;;  %2725 = vmatpush.xpose.msra.mxu2 %v688_v33  ;;  %v595_v32 = vld [vmem:[%s4509_s15 + $0x798] sm:$0xff]  ;;  %v494_v33 = vld [vmem:[%s4509_s15 + $0x470] sm:$0xff] }
 0x280   : > { %2705 = vmatpush.xpose.msra.mxu1 %v687_v34  ;;  %2745 = vmatpush.xpose.msra.mxu3 %v689_v35  ;;  %v496_v34 = vld [vmem:[%s4509_s15 + $0x480] sm:$0xff]  ;;  %v495_v35 = vld [vmem:[%s4509_s15 + $0x478] sm:$0xff] }
 0x283   : > { %2686 = vmatpush.xpose.msra.mxu0 %v588_v36  ;;  %2726 = vmatpush.xpose.msra.mxu2 %v590_v37  ;;  %v497_v36 = vld [vmem:[%s4509_s15 + $0x488] sm:$0xff]  ;;  %v396_v37 = vld [vmem:[%s4509_s15 + $0x160] sm:$0xff] }
 0x284   : > { %2706 = vmatpush.xpose.msra.mxu1 %v589_v38  ;;  %2746 = vmatpush.xpose.msra.mxu3 %v591_v39  ;;  %v398_v38 = vld [vmem:[%s4509_s15 + $0x170] sm:$0xff]  ;;  %v1576_v39 = vld [vmem:[%s4509_s15 + $0x2640] sm:$0xf] }
 0x287   : > { %2687 = vmatpush.xpose.msra.mxu0 %v490_v40  ;;  %2727 = vmatpush.xpose.msra.mxu2 %v492_v41  ;;  %v1578_v40 = vld [vmem:[%s4509_s15 + $0x2650] sm:$0xf]  ;;  %v397_v41 = vld [vmem:[%s4509_s15 + $0x168] sm:$0xff] }
 0x288   : > { %2707 = vmatpush.xpose.msra.mxu1 %v491_v42  ;;  %2747 = vmatpush.xpose.msra.mxu3 %v493_v43  ;;  %v399_v42 = vld [vmem:[%s4509_s15 + $0x178] sm:$0xff] }
 0x289   : > { %v1708_v43 = vld.sshfl [vmem:[#allocation1 + $0x20] sm:$0xff pattern:$0x73625140] }
 0x28b   : > { %2688 = vmatpush.xpose.msra.mxu0 %v392_v44  ;;  %2728 = vmatpush.xpose.msra.mxu2 %v394_v45  ;;  %v1710_v44 = vld.sshfl [vmem:[#allocation1 + $0x30] sm:$0xff pattern:$0x73625140]  ;;  %v1577_v45 = vld [vmem:[%s4509_s15 + $0x2648] sm:$0xf] }
 0x28c   : > { %2708 = vmatpush.xpose.msra.mxu1 %v393_v48  ;;  %2748 = vmatpush.xpose.msra.mxu3 %v395_v49  ;;  %v1711_v48 = vld.sshfl [vmem:[#allocation1 + $0x38] sm:$0xff pattern:$0x73625140] }
 0x28d   : > { %v1478_v49 = vld [vmem:[%s4509_s15 + $0x2330] sm:$0xff] }
 0x28e   : > { %2689 = vmatmul.f32.vlgmr.msra.gmra.mxu0 %v1704_v50  ;;  %2729 = vmatmul.f32.vlgmr.msra.gmra.mxu2 %v1706_v51  ;;  %v1480_v50 = vld [vmem:[%s4509_s15 + $0x2340] sm:$0xff]  ;;  %v1479_v51 = vld [vmem:[%s4509_s15 + $0x2338] sm:$0xff] }
 0x28f   : > { %2756 = vmatpush.xpose.msrb.mxu0 %v1572_v46  ;;  %2796 = vmatpush.xpose.msrb.mxu2 %v1574_v47  ;;  %v1579_v46 = vld [vmem:[%s4509_s15 + $0x2658] sm:$0xf] }
 0x290   : > { %2776 = vmatpush.xpose.msrb.mxu1 %v1573_v52  ;;  %2816 = vmatpush.xpose.msrb.mxu3 %v1575_v53  ;;  %v1709_v47 = vld.sshfl [vmem:[#allocation1 + $0x28] sm:$0xff pattern:$0x73625140] }
 0x291   : > { %2709 = vmatmul.f32.vlgmr.msra.gmra.mxu1 %v1705_v54  ;;  %2749 = vmatmul.f32.vlgmr.msra.gmra.mxu3 %v1707_v55  ;;  %v1481_v52 = vld [vmem:[%s4509_s15 + $0x2348] sm:$0xff]  ;;  %v1380_v53 = vld [vmem:[%s4509_s15 + $0x2020] sm:$0xff]  ;;  %v1382_v54 = vld [vmem:[%s4509_s15 + $0x2030] sm:$0xff] }
 0x292   : > { %v1381_v55 = vld [vmem:[%s4509_s15 + $0x2028] sm:$0xff] }
 0x293   : > { %2757 = vmatpush.xpose.msrb.mxu0 %v1474_v56  ;;  %2797 = vmatpush.xpose.msrb.mxu2 %v1476_v57  ;;  %v1383_v56 = vld [vmem:[%s4509_s15 + $0x2038] sm:$0xff]  ;;  %v1282_v57 = vld [vmem:[%s4509_s15 + $0x1d10] sm:$0xff] }
 0x294   : > { %2777 = vmatpush.xpose.msrb.mxu1 %v1475_v58  ;;  %2817 = vmatpush.xpose.msrb.mxu3 %v1477_v59  ;;  %v1284_v58 = vld [vmem:[%s4509_s15 + $0x1d20] sm:$0xff]  ;;  %v339_v59 = vld [vmem:[%s4502_s24 + $0x60] sm:$0xff] }
 0x295   : > { %1712 = vst [vmem:[#allocation1] ss:$4 sm:$0xff] %v339_v59  ;;  %v1090_v59 = vld [vmem:[%s4509_s15 + $0x1710] sm:$0xff] }
 0x297   : > { %2758 = vmatpush.xpose.msrb.mxu0 %v1376_v60  ;;  %2798 = vmatpush.xpose.msrb.mxu2 %v1378_v61  ;;  %v1283_v60 = vld [vmem:[%s4509_s15 + $0x1d18] sm:$0xff]  ;;  %v1285_v61 = vld [vmem:[%s4509_s15 + $0x1d28] sm:$0xff] }
 0x298   : > { %2778 = vmatpush.xpose.msrb.mxu1 %v1377_v62  ;;  %2818 = vmatpush.xpose.msrb.mxu3 %v1379_v63  ;;  %v1184_v62 = vld [vmem:[%s4509_s15 + $0x1a00] sm:$0xff]  ;;  %v1186_v63 = vld [vmem:[%s4509_s15 + $0x1a10] sm:$0xff] }
 0x29b   : > { %2759 = vmatpush.xpose.msrb.mxu0 %v1278_v0  ;;  %2799 = vmatpush.xpose.msrb.mxu2 %v1280_v1  ;;  %v1185_v0 = vld [vmem:[%s4509_s15 + $0x1a08] sm:$0xff]  ;;  %v1187_v1 = vld [vmem:[%s4509_s15 + $0x1a18] sm:$0xff] }
 0x29c   : > { %2779 = vmatpush.xpose.msrb.mxu1 %v1279_v3  ;;  %2819 = vmatpush.xpose.msrb.mxu3 %v1281_v4  ;;  %v1088_v3 = vld [vmem:[%s4509_s15 + $0x1700] sm:$0xff]  ;;  %v1087_v4 = vld [vmem:[%s4509_s15 + $0x16f8] sm:$0xff] }
 0x29f   : > { %2760 = vmatpush.xpose.msrb.mxu0 %v1180_v5  ;;  %2800 = vmatpush.xpose.msrb.mxu2 %v1182_v6  ;;  %v1089_v5 = vld [vmem:[%s4509_s15 + $0x1708] sm:$0xff]  ;;  %v988_v6 = vld [vmem:[%s4509_s15 + $0x13e0] sm:$0xff] }
 0x2a0   : > { %2780 = vmatpush.xpose.msrb.mxu1 %v1181_v7  ;;  %2820 = vmatpush.xpose.msrb.mxu3 %v1183_v8  ;;  %v990_v7 = vld [vmem:[%s4509_s15 + $0x13f0] sm:$0xff]  ;;  %v989_v8 = vld [vmem:[%s4509_s15 + $0x13e8] sm:$0xff] }
 0x2a3   : > { %2761 = vmatpush.xpose.msrb.mxu0 %v1082_v9  ;;  %2801 = vmatpush.xpose.msrb.mxu2 %v1084_v10  ;;  %v991_v9 = vld [vmem:[%s4509_s15 + $0x13f8] sm:$0xff]  ;;  %v890_v10 = vld [vmem:[%s4509_s15 + $0x10d0] sm:$0xff] }
 0x2a4   : > { %2781 = vmatpush.xpose.msrb.mxu1 %v1083_v11  ;;  %2821 = vmatpush.xpose.msrb.mxu3 %v1085_v12  ;;  %v892_v11 = vld [vmem:[%s4509_s15 + $0x10e0] sm:$0xff]  ;;  %v891_v12 = vld [vmem:[%s4509_s15 + $0x10d8] sm:$0xff] }
 0x2a7   : > { %2762 = vmatpush.xpose.msrb.mxu0 %v984_v13  ;;  %2802 = vmatpush.xpose.msrb.mxu2 %v986_v14  ;;  %v893_v13 = vld [vmem:[%s4509_s15 + $0x10e8] sm:$0xff]  ;;  %v792_v14 = vld [vmem:[%s4509_s15 + $0xdc0] sm:$0xff] }
 0x2a8   : > { %2782 = vmatpush.xpose.msrb.mxu1 %v985_v15  ;;  %2822 = vmatpush.xpose.msrb.mxu3 %v987_v16  ;;  %v794_v15 = vld [vmem:[%s4509_s15 + $0xdd0] sm:$0xff]  ;;  %v793_v16 = vld [vmem:[%s4509_s15 + $0xdc8] sm:$0xff] }
 0x2ab   : > { %2763 = vmatpush.xpose.msrb.mxu0 %v886_v17  ;;  %2803 = vmatpush.xpose.msrb.mxu2 %v888_v18  ;;  %v795_v17 = vld [vmem:[%s4509_s15 + $0xdd8] sm:$0xff]  ;;  %v694_v18 = vld [vmem:[%s4509_s15 + $0xab0] sm:$0xff] }
 0x2ac   : > { %2783 = vmatpush.xpose.msrb.mxu1 %v887_v19  ;;  %2823 = vmatpush.xpose.msrb.mxu3 %v889_v20  ;;  %v696_v19 = vld [vmem:[%s4509_s15 + $0xac0] sm:$0xff]  ;;  %v695_v20 = vld [vmem:[%s4509_s15 + $0xab8] sm:$0xff] }
 0x2af   : > { %2764 = vmatpush.xpose.msrb.mxu0 %v788_v21  ;;  %2804 = vmatpush.xpose.msrb.mxu2 %v790_v22  ;;  %v697_v21 = vld [vmem:[%s4509_s15 + $0xac8] sm:$0xff]  ;;  %v596_v22 = vld [vmem:[%s4509_s15 + $0x7a0] sm:$0xff] }
 0x2b0   : > { %2784 = vmatpush.xpose.msrb.mxu1 %v789_v23  ;;  %2824 = vmatpush.xpose.msrb.mxu3 %v791_v24  ;;  %v598_v23 = vld [vmem:[%s4509_s15 + $0x7b0] sm:$0xff]  ;;  %v597_v24 = vld [vmem:[%s4509_s15 + $0x7a8] sm:$0xff] }
 0x2b3   : > { %2765 = vmatpush.xpose.msrb.mxu0 %v690_v25  ;;  %2805 = vmatpush.xpose.msrb.mxu2 %v692_v26  ;;  %v599_v25 = vld [vmem:[%s4509_s15 + $0x7b8] sm:$0xff]  ;;  %v498_v26 = vld [vmem:[%s4509_s15 + $0x490] sm:$0xff] }
 0x2b4   : > { %2785 = vmatpush.xpose.msrb.mxu1 %v691_v27  ;;  %2825 = vmatpush.xpose.msrb.mxu3 %v693_v28  ;;  %v500_v27 = vld [vmem:[%s4509_s15 + $0x4a0] sm:$0xff]  ;;  %v499_v28 = vld [vmem:[%s4509_s15 + $0x498] sm:$0xff] }
 0x2b7   : > { %2766 = vmatpush.xpose.msrb.mxu0 %v592_v29  ;;  %2806 = vmatpush.xpose.msrb.mxu2 %v594_v30  ;;  %v501_v29 = vld [vmem:[%s4509_s15 + $0x4a8] sm:$0xff]  ;;  %v400_v30 = vld [vmem:[%s4509_s15 + $0x180] sm:$0xff] }
 0x2b8   : > { %2786 = vmatpush.xpose.msrb.mxu1 %v593_v31  ;;  %2826 = vmatpush.xpose.msrb.mxu3 %v595_v32  ;;  %v402_v31 = vld [vmem:[%s4509_s15 + $0x190] sm:$0xff]  ;;  %v1580_v32 = vld [vmem:[%s4509_s15 + $0x2660] sm:$0xf] }
 0x2bb   : > { %2767 = vmatpush.xpose.msrb.mxu0 %v494_v33  ;;  %2807 = vmatpush.xpose.msrb.mxu2 %v496_v34  ;;  %v1582_v33 = vld [vmem:[%s4509_s15 + $0x2670] sm:$0xf]  ;;  %v401_v34 = vld [vmem:[%s4509_s15 + $0x188] sm:$0xff] }
 0x2bc   : > { %2787 = vmatpush.xpose.msrb.mxu1 %v495_v35  ;;  %2827 = vmatpush.xpose.msrb.mxu3 %v497_v36  ;;  %v403_v35 = vld [vmem:[%s4509_s15 + $0x198] sm:$0xff] }
 0x2bd   : > { %v1714_v36 = vld.sshfl [vmem:[#allocation1] sm:$0xff pattern:$0x73625140] }
 0x2bf   : > { %2768 = vmatpush.xpose.msrb.mxu0 %v396_v37  ;;  %2808 = vmatpush.xpose.msrb.mxu2 %v398_v38  ;;  %v1716_v37 = vld.sshfl [vmem:[#allocation1 + $0x10] sm:$0xff pattern:$0x73625140]  ;;  %v1581_v38 = vld [vmem:[%s4509_s15 + $0x2668] sm:$0xf] }
 0x2c0   : > { %2788 = vmatpush.xpose.msrb.mxu1 %v397_v41  ;;  %2828 = vmatpush.xpose.msrb.mxu3 %v399_v42  ;;  %v1717_v41 = vld.sshfl [vmem:[#allocation1 + $0x18] sm:$0xff pattern:$0x73625140] }
 0x2c1   : > { %v1482_v42 = vld [vmem:[%s4509_s15 + $0x2350] sm:$0xff] }
 0x2c2   : > { %2769 = vmatmul.f32.vlgmr.msrb.gmra.mxu0 %v1708_v43  ;;  %2809 = vmatmul.f32.vlgmr.msrb.gmra.mxu2 %v1710_v44  ;;  %v1484_v43 = vld [vmem:[%s4509_s15 + $0x2360] sm:$0xff]  ;;  %v1483_v44 = vld [vmem:[%s4509_s15 + $0x2358] sm:$0xff] }
 0x2c3   : > { %2836 = vmatpush.xpose.msra.mxu0 %v1576_v39  ;;  %2876 = vmatpush.xpose.msra.mxu2 %v1578_v40  ;;  %v1583_v39 = vld [vmem:[%s4509_s15 + $0x2678] sm:$0xf] }
 0x2c4   : > { %2856 = vmatpush.xpose.msra.mxu1 %v1577_v45  ;;  %2896 = vmatpush.xpose.msra.mxu3 %v1579_v46  ;;  %v1715_v40 = vld.sshfl [vmem:[#allocation1 + $0x8] sm:$0xff pattern:$0x73625140] }
 0x2c5   : > { %2789 = vmatmul.f32.vlgmr.msrb.gmra.mxu1 %v1709_v47  ;;  %2829 = vmatmul.f32.vlgmr.msrb.gmra.mxu3 %v1711_v48  ;;  %v1485_v45 = vld [vmem:[%s4509_s15 + $0x2368] sm:$0xff]  ;;  %v1384_v46 = vld [vmem:[%s4509_s15 + $0x2040] sm:$0xff]  ;;  %v1386_v47 = vld [vmem:[%s4509_s15 + $0x2050] sm:$0xff] }
 0x2c6   : > { %v1385_v48 = vld [vmem:[%s4509_s15 + $0x2048] sm:$0xff] }
 0x2c7   : > { %2837 = vmatpush.xpose.msra.mxu0 %v1478_v49  ;;  %2877 = vmatpush.xpose.msra.mxu2 %v1480_v50  ;;  %v1387_v49 = vld [vmem:[%s4509_s15 + $0x2058] sm:$0xff]  ;;  %v1286_v50 = vld [vmem:[%s4509_s15 + $0x1d30] sm:$0xff] }
 0x2c8   : > { %2857 = vmatpush.xpose.msra.mxu1 %v1479_v51  ;;  %2897 = vmatpush.xpose.msra.mxu3 %v1481_v52  ;;  %v1288_v51 = vld [vmem:[%s4509_s15 + $0x1d40] sm:$0xff] }
 0x2c9   : > { %v340_v52 = vld [vmem:[%s4502_s24 + $0x68] sm:$0xff] }
 0x2ca   : > { %1713 = vst [vmem:[#allocation1 + $0x20] ss:$4 sm:$0xff] %v340_v52  ;;  %v1094_v52 = vld [vmem:[%s4509_s15 + $0x1730] sm:$0xff] }
 0x2cb   : > { %2838 = vmatpush.xpose.msra.mxu0 %v1380_v53  ;;  %2878 = vmatpush.xpose.msra.mxu2 %v1382_v54  ;;  %v1287_v53 = vld [vmem:[%s4509_s15 + $0x1d38] sm:$0xff]  ;;  %v1289_v54 = vld [vmem:[%s4509_s15 + $0x1d48] sm:$0xff] }
 0x2cc   : > { %2858 = vmatpush.xpose.msra.mxu1 %v1381_v55  ;;  %2898 = vmatpush.xpose.msra.mxu3 %v1383_v56  ;;  %v1188_v55 = vld [vmem:[%s4509_s15 + $0x1a20] sm:$0xff]  ;;  %v1190_v56 = vld [vmem:[%s4509_s15 + $0x1a30] sm:$0xff] }
 0x2cf   : > { %2839 = vmatpush.xpose.msra.mxu0 %v1282_v57  ;;  %2879 = vmatpush.xpose.msra.mxu2 %v1284_v58  ;;  %v1189_v57 = vld [vmem:[%s4509_s15 + $0x1a28] sm:$0xff]  ;;  %v1191_v58 = vld [vmem:[%s4509_s15 + $0x1a38] sm:$0xff] }
 0x2d0   : > { %2859 = vmatpush.xpose.msra.mxu1 %v1283_v60  ;;  %2899 = vmatpush.xpose.msra.mxu3 %v1285_v61  ;;  %v1092_v60 = vld [vmem:[%s4509_s15 + $0x1720] sm:$0xff]  ;;  %v1091_v61 = vld [vmem:[%s4509_s15 + $0x1718] sm:$0xff] }
 0x2d3   : > { %2840 = vmatpush.xpose.msra.mxu0 %v1184_v62  ;;  %2880 = vmatpush.xpose.msra.mxu2 %v1186_v63  ;;  %v1093_v62 = vld [vmem:[%s4509_s15 + $0x1728] sm:$0xff]  ;;  %v992_v63 = vld [vmem:[%s4509_s15 + $0x1400] sm:$0xff] }
 0x2d4   : > { %2860 = vmatpush.xpose.msra.mxu1 %v1185_v0  ;;  %2900 = vmatpush.xpose.msra.mxu3 %v1187_v1  ;;  %v994_v0 = vld [vmem:[%s4509_s15 + $0x1410] sm:$0xff]  ;;  %v993_v1 = vld [vmem:[%s4509_s15 + $0x1408] sm:$0xff] }
 0x2d7   : > { %2841 = vmatpush.xpose.msra.mxu0 %v1086_v2  ;;  %2881 = vmatpush.xpose.msra.mxu2 %v1088_v3  ;;  %v995_v2 = vld [vmem:[%s4509_s15 + $0x1418] sm:$0xff]  ;;  %v894_v3 = vld [vmem:[%s4509_s15 + $0x10f0] sm:$0xff] }
 0x2d8   : > { %2861 = vmatpush.xpose.msra.mxu1 %v1087_v4  ;;  %2901 = vmatpush.xpose.msra.mxu3 %v1089_v5  ;;  %v896_v4 = vld [vmem:[%s4509_s15 + $0x1100] sm:$0xff]  ;;  %v895_v5 = vld [vmem:[%s4509_s15 + $0x10f8] sm:$0xff] }
 0x2db   : > { %2842 = vmatpush.xpose.msra.mxu0 %v988_v6  ;;  %2882 = vmatpush.xpose.msra.mxu2 %v990_v7  ;;  %v897_v6 = vld [vmem:[%s4509_s15 + $0x1108] sm:$0xff]  ;;  %v796_v7 = vld [vmem:[%s4509_s15 + $0xde0] sm:$0xff] }
 0x2dc   : > { %2862 = vmatpush.xpose.msra.mxu1 %v989_v8  ;;  %2902 = vmatpush.xpose.msra.mxu3 %v991_v9  ;;  %v798_v8 = vld [vmem:[%s4509_s15 + $0xdf0] sm:$0xff]  ;;  %v797_v9 = vld [vmem:[%s4509_s15 + $0xde8] sm:$0xff] }
 0x2df   : > { %2843 = vmatpush.xpose.msra.mxu0 %v890_v10  ;;  %2883 = vmatpush.xpose.msra.mxu2 %v892_v11  ;;  %v799_v10 = vld [vmem:[%s4509_s15 + $0xdf8] sm:$0xff]  ;;  %v698_v11 = vld [vmem:[%s4509_s15 + $0xad0] sm:$0xff] }
 0x2e0   : > { %2863 = vmatpush.xpose.msra.mxu1 %v891_v12  ;;  %2903 = vmatpush.xpose.msra.mxu3 %v893_v13  ;;  %v700_v12 = vld [vmem:[%s4509_s15 + $0xae0] sm:$0xff]  ;;  %v699_v13 = vld [vmem:[%s4509_s15 + $0xad8] sm:$0xff] }
 0x2e3   : > { %2844 = vmatpush.xpose.msra.mxu0 %v792_v14  ;;  %2884 = vmatpush.xpose.msra.mxu2 %v794_v15  ;;  %v701_v14 = vld [vmem:[%s4509_s15 + $0xae8] sm:$0xff]  ;;  %v600_v15 = vld [vmem:[%s4509_s15 + $0x7c0] sm:$0xff] }
 0x2e4   : > { %2864 = vmatpush.xpose.msra.mxu1 %v793_v16  ;;  %2904 = vmatpush.xpose.msra.mxu3 %v795_v17  ;;  %v602_v16 = vld [vmem:[%s4509_s15 + $0x7d0] sm:$0xff]  ;;  %v601_v17 = vld [vmem:[%s4509_s15 + $0x7c8] sm:$0xff] }
 0x2e7   : > { %2845 = vmatpush.xpose.msra.mxu0 %v694_v18  ;;  %2885 = vmatpush.xpose.msra.mxu2 %v696_v19  ;;  %v603_v18 = vld [vmem:[%s4509_s15 + $0x7d8] sm:$0xff]  ;;  %v502_v19 = vld [vmem:[%s4509_s15 + $0x4b0] sm:$0xff] }
 0x2e8   : > { %2865 = vmatpush.xpose.msra.mxu1 %v695_v20  ;;  %2905 = vmatpush.xpose.msra.mxu3 %v697_v21  ;;  %v504_v20 = vld [vmem:[%s4509_s15 + $0x4c0] sm:$0xff]  ;;  %v503_v21 = vld [vmem:[%s4509_s15 + $0x4b8] sm:$0xff] }
 0x2eb   : > { %2846 = vmatpush.xpose.msra.mxu0 %v596_v22  ;;  %2886 = vmatpush.xpose.msra.mxu2 %v598_v23  ;;  %v505_v22 = vld [vmem:[%s4509_s15 + $0x4c8] sm:$0xff]  ;;  %v404_v23 = vld [vmem:[%s4509_s15 + $0x1a0] sm:$0xff] }
 0x2ec   : > { %2866 = vmatpush.xpose.msra.mxu1 %v597_v24  ;;  %2906 = vmatpush.xpose.msra.mxu3 %v599_v25  ;;  %v406_v24 = vld [vmem:[%s4509_s15 + $0x1b0] sm:$0xff]  ;;  %v1584_v25 = vld [vmem:[%s4509_s15 + $0x2680] sm:$0xf] }
 0x2ef   : > { %2847 = vmatpush.xpose.msra.mxu0 %v498_v26  ;;  %2887 = vmatpush.xpose.msra.mxu2 %v500_v27  ;;  %v1586_v26 = vld [vmem:[%s4509_s15 + $0x2690] sm:$0xf]  ;;  %v405_v27 = vld [vmem:[%s4509_s15 + $0x1a8] sm:$0xff] }
 0x2f0   : > { %2867 = vmatpush.xpose.msra.mxu1 %v499_v28  ;;  %2907 = vmatpush.xpose.msra.mxu3 %v501_v29  ;;  %v407_v28 = vld [vmem:[%s4509_s15 + $0x1b8] sm:$0xff] }
 0x2f1   : > { %v1718_v29 = vld.sshfl [vmem:[#allocation1 + $0x20] sm:$0xff pattern:$0x73625140] }
 0x2f3   : > { %2848 = vmatpush.xpose.msra.mxu0 %v400_v30  ;;  %2888 = vmatpush.xpose.msra.mxu2 %v402_v31  ;;  %v1720_v30 = vld.sshfl [vmem:[#allocation1 + $0x30] sm:$0xff pattern:$0x73625140]  ;;  %v1585_v31 = vld [vmem:[%s4509_s15 + $0x2688] sm:$0xf] }
 0x2f4   : > { %2868 = vmatpush.xpose.msra.mxu1 %v401_v34  ;;  %2908 = vmatpush.xpose.msra.mxu3 %v403_v35  ;;  %v1721_v34 = vld.sshfl [vmem:[#allocation1 + $0x38] sm:$0xff pattern:$0x73625140] }
 0x2f5   : > { %v1486_v35 = vld [vmem:[%s4509_s15 + $0x2370] sm:$0xff] }
 0x2f6   : > { %2849 = vmatmul.f32.vlgmr.msra.gmra.mxu0 %v1714_v36  ;;  %2889 = vmatmul.f32.vlgmr.msra.gmra.mxu2 %v1716_v37  ;;  %v1488_v36 = vld [vmem:[%s4509_s15 + $0x2380] sm:$0xff]  ;;  %v1487_v37 = vld [vmem:[%s4509_s15 + $0x2378] sm:$0xff] }
 0x2f7   : > { %2916 = vmatpush.xpose.msrb.mxu0 %v1580_v32  ;;  %2956 = vmatpush.xpose.msrb.mxu2 %v1582_v33  ;;  %v1587_v32 = vld [vmem:[%s4509_s15 + $0x2698] sm:$0xf] }
 0x2f8   : > { %2936 = vmatpush.xpose.msrb.mxu1 %v1581_v38  ;;  %2976 = vmatpush.xpose.msrb.mxu3 %v1583_v39  ;;  %v1719_v33 = vld.sshfl [vmem:[#allocation1 + $0x28] sm:$0xff pattern:$0x73625140] }
 0x2f9   : > { %2869 = vmatmul.f32.vlgmr.msra.gmra.mxu1 %v1715_v40  ;;  %2909 = vmatmul.f32.vlgmr.msra.gmra.mxu3 %v1717_v41  ;;  %v1489_v38 = vld [vmem:[%s4509_s15 + $0x2388] sm:$0xff]  ;;  %v1388_v39 = vld [vmem:[%s4509_s15 + $0x2060] sm:$0xff]  ;;  %v1390_v40 = vld [vmem:[%s4509_s15 + $0x2070] sm:$0xff] }
 0x2fa   : > { %v1389_v41 = vld [vmem:[%s4509_s15 + $0x2068] sm:$0xff] }
 0x2fb   : > { %2917 = vmatpush.xpose.msrb.mxu0 %v1482_v42  ;;  %2957 = vmatpush.xpose.msrb.mxu2 %v1484_v43  ;;  %v1391_v42 = vld [vmem:[%s4509_s15 + $0x2078] sm:$0xff]  ;;  %v1290_v43 = vld [vmem:[%s4509_s15 + $0x1d50] sm:$0xff] }
 0x2fc   : > { %2937 = vmatpush.xpose.msrb.mxu1 %v1483_v44  ;;  %2977 = vmatpush.xpose.msrb.mxu3 %v1485_v45  ;;  %v1292_v44 = vld [vmem:[%s4509_s15 + $0x1d60] sm:$0xff] }
 0x2fd   : > { %v341_v45 = vld [vmem:[%s4502_s24 + $0x70] sm:$0xff] }
 0x2fe   : > { %1722 = vst [vmem:[#allocation1] ss:$4 sm:$0xff] %v341_v45  ;;  %v1098_v45 = vld [vmem:[%s4509_s15 + $0x1750] sm:$0xff] }
 0x2ff   : > { %2918 = vmatpush.xpose.msrb.mxu0 %v1384_v46  ;;  %2958 = vmatpush.xpose.msrb.mxu2 %v1386_v47  ;;  %v1291_v46 = vld [vmem:[%s4509_s15 + $0x1d58] sm:$0xff]  ;;  %v1293_v47 = vld [vmem:[%s4509_s15 + $0x1d68] sm:$0xff] }
 0x300   : > { %2938 = vmatpush.xpose.msrb.mxu1 %v1385_v48  ;;  %2978 = vmatpush.xpose.msrb.mxu3 %v1387_v49  ;;  %v1192_v48 = vld [vmem:[%s4509_s15 + $0x1a40] sm:$0xff]  ;;  %v1194_v49 = vld [vmem:[%s4509_s15 + $0x1a50] sm:$0xff] }
 0x303   : > { %2919 = vmatpush.xpose.msrb.mxu0 %v1286_v50  ;;  %2959 = vmatpush.xpose.msrb.mxu2 %v1288_v51  ;;  %v1193_v50 = vld [vmem:[%s4509_s15 + $0x1a48] sm:$0xff]  ;;  %v1195_v51 = vld [vmem:[%s4509_s15 + $0x1a58] sm:$0xff] }
 0x304   : > { %2939 = vmatpush.xpose.msrb.mxu1 %v1287_v53  ;;  %2979 = vmatpush.xpose.msrb.mxu3 %v1289_v54  ;;  %v1096_v53 = vld [vmem:[%s4509_s15 + $0x1740] sm:$0xff]  ;;  %v1095_v54 = vld [vmem:[%s4509_s15 + $0x1738] sm:$0xff] }
 0x307   : > { %2920 = vmatpush.xpose.msrb.mxu0 %v1188_v55  ;;  %2960 = vmatpush.xpose.msrb.mxu2 %v1190_v56  ;;  %v1097_v55 = vld [vmem:[%s4509_s15 + $0x1748] sm:$0xff]  ;;  %v996_v56 = vld [vmem:[%s4509_s15 + $0x1420] sm:$0xff] }
 0x308   : > { %2940 = vmatpush.xpose.msrb.mxu1 %v1189_v57  ;;  %2980 = vmatpush.xpose.msrb.mxu3 %v1191_v58  ;;  %v998_v57 = vld [vmem:[%s4509_s15 + $0x1430] sm:$0xff]  ;;  %v997_v58 = vld [vmem:[%s4509_s15 + $0x1428] sm:$0xff] }
 0x30b   : > { %2921 = vmatpush.xpose.msrb.mxu0 %v1090_v59  ;;  %2961 = vmatpush.xpose.msrb.mxu2 %v1092_v60  ;;  %v999_v59 = vld [vmem:[%s4509_s15 + $0x1438] sm:$0xff]  ;;  %v898_v60 = vld [vmem:[%s4509_s15 + $0x1110] sm:$0xff] }
 0x30c   : > { %2941 = vmatpush.xpose.msrb.mxu1 %v1091_v61  ;;  %2981 = vmatpush.xpose.msrb.mxu3 %v1093_v62  ;;  %v900_v61 = vld [vmem:[%s4509_s15 + $0x1120] sm:$0xff]  ;;  %v899_v62 = vld [vmem:[%s4509_s15 + $0x1118] sm:$0xff] }
 0x30f   : > { %2922 = vmatpush.xpose.msrb.mxu0 %v992_v63  ;;  %2962 = vmatpush.xpose.msrb.mxu2 %v994_v0  ;;  %v901_v63 = vld [vmem:[%s4509_s15 + $0x1128] sm:$0xff]  ;;  %v800_v0 = vld [vmem:[%s4509_s15 + $0xe00] sm:$0xff] }
 0x310   : > { %2942 = vmatpush.xpose.msrb.mxu1 %v993_v1  ;;  %2982 = vmatpush.xpose.msrb.mxu3 %v995_v2  ;;  %v802_v1 = vld [vmem:[%s4509_s15 + $0xe10] sm:$0xff]  ;;  %v801_v2 = vld [vmem:[%s4509_s15 + $0xe08] sm:$0xff] }
 0x313   : > { %2923 = vmatpush.xpose.msrb.mxu0 %v894_v3  ;;  %2963 = vmatpush.xpose.msrb.mxu2 %v896_v4  ;;  %v803_v3 = vld [vmem:[%s4509_s15 + $0xe18] sm:$0xff]  ;;  %v702_v4 = vld [vmem:[%s4509_s15 + $0xaf0] sm:$0xff] }
 0x314   : > { %2943 = vmatpush.xpose.msrb.mxu1 %v895_v5  ;;  %2983 = vmatpush.xpose.msrb.mxu3 %v897_v6  ;;  %v704_v5 = vld [vmem:[%s4509_s15 + $0xb00] sm:$0xff]  ;;  %v703_v6 = vld [vmem:[%s4509_s15 + $0xaf8] sm:$0xff] }
 0x317   : > { %2924 = vmatpush.xpose.msrb.mxu0 %v796_v7  ;;  %2964 = vmatpush.xpose.msrb.mxu2 %v798_v8  ;;  %v705_v7 = vld [vmem:[%s4509_s15 + $0xb08] sm:$0xff]  ;;  %v604_v8 = vld [vmem:[%s4509_s15 + $0x7e0] sm:$0xff] }
 0x318   : > { %2944 = vmatpush.xpose.msrb.mxu1 %v797_v9  ;;  %2984 = vmatpush.xpose.msrb.mxu3 %v799_v10  ;;  %v606_v9 = vld [vmem:[%s4509_s15 + $0x7f0] sm:$0xff]  ;;  %v605_v10 = vld [vmem:[%s4509_s15 + $0x7e8] sm:$0xff] }
 0x31b   : > { %2925 = vmatpush.xpose.msrb.mxu0 %v698_v11  ;;  %2965 = vmatpush.xpose.msrb.mxu2 %v700_v12  ;;  %v607_v11 = vld [vmem:[%s4509_s15 + $0x7f8] sm:$0xff]  ;;  %v506_v12 = vld [vmem:[%s4509_s15 + $0x4d0] sm:$0xff] }
 0x31c   : > { %2945 = vmatpush.xpose.msrb.mxu1 %v699_v13  ;;  %2985 = vmatpush.xpose.msrb.mxu3 %v701_v14  ;;  %v508_v13 = vld [vmem:[%s4509_s15 + $0x4e0] sm:$0xff]  ;;  %v507_v14 = vld [vmem:[%s4509_s15 + $0x4d8] sm:$0xff] }
 0x31f   : > { %2926 = vmatpush.xpose.msrb.mxu0 %v600_v15  ;;  %2966 = vmatpush.xpose.msrb.mxu2 %v602_v16  ;;  %v509_v15 = vld [vmem:[%s4509_s15 + $0x4e8] sm:$0xff]  ;;  %v408_v16 = vld [vmem:[%s4509_s15 + $0x1c0] sm:$0xff] }
 0x320   : > { %2946 = vmatpush.xpose.msrb.mxu1 %v601_v17  ;;  %2986 = vmatpush.xpose.msrb.mxu3 %v603_v18  ;;  %v410_v17 = vld [vmem:[%s4509_s15 + $0x1d0] sm:$0xff]  ;;  %v1588_v18 = vld [vmem:[%s4509_s15 + $0x26a0] sm:$0xf] }
 0x323   : > { %2927 = vmatpush.xpose.msrb.mxu0 %v502_v19  ;;  %2967 = vmatpush.xpose.msrb.mxu2 %v504_v20  ;;  %v1590_v19 = vld [vmem:[%s4509_s15 + $0x26b0] sm:$0xf]  ;;  %v409_v20 = vld [vmem:[%s4509_s15 + $0x1c8] sm:$0xff] }
 0x324   : > { %2947 = vmatpush.xpose.msrb.mxu1 %v503_v21  ;;  %2987 = vmatpush.xpose.msrb.mxu3 %v505_v22  ;;  %v411_v21 = vld [vmem:[%s4509_s15 + $0x1d8] sm:$0xff] }
 0x325   : > { %v1724_v22 = vld.sshfl [vmem:[#allocation1] sm:$0xff pattern:$0x73625140] }
 0x327   : > { %2928 = vmatpush.xpose.msrb.mxu0 %v404_v23  ;;  %2968 = vmatpush.xpose.msrb.mxu2 %v406_v24  ;;  %v1726_v23 = vld.sshfl [vmem:[#allocation1 + $0x10] sm:$0xff pattern:$0x73625140]  ;;  %v1589_v24 = vld [vmem:[%s4509_s15 + $0x26a8] sm:$0xf] }
 0x328   : > { %2948 = vmatpush.xpose.msrb.mxu1 %v405_v27  ;;  %2988 = vmatpush.xpose.msrb.mxu3 %v407_v28  ;;  %v1727_v27 = vld.sshfl [vmem:[#allocation1 + $0x18] sm:$0xff pattern:$0x73625140] }
 0x329   : > { %v1490_v28 = vld [vmem:[%s4509_s15 + $0x2390] sm:$0xff] }
 0x32a   : > { %2929 = vmatmul.f32.vlgmr.msrb.gmra.mxu0 %v1718_v29  ;;  %2969 = vmatmul.f32.vlgmr.msrb.gmra.mxu2 %v1720_v30  ;;  %v1492_v29 = vld [vmem:[%s4509_s15 + $0x23a0] sm:$0xff]  ;;  %v1491_v30 = vld [vmem:[%s4509_s15 + $0x2398] sm:$0xff] }
 0x32b   : > { %2996 = vmatpush.xpose.msra.mxu0 %v1584_v25  ;;  %3036 = vmatpush.xpose.msra.mxu2 %v1586_v26  ;;  %v1591_v25 = vld [vmem:[%s4509_s15 + $0x26b8] sm:$0xf] }
 0x32c   : > { %3016 = vmatpush.xpose.msra.mxu1 %v1585_v31  ;;  %3056 = vmatpush.xpose.msra.mxu3 %v1587_v32  ;;  %v1725_v26 = vld.sshfl [vmem:[#allocation1 + $0x8] sm:$0xff pattern:$0x73625140] }
 0x32d   : > { %2949 = vmatmul.f32.vlgmr.msrb.gmra.mxu1 %v1719_v33  ;;  %2989 = vmatmul.f32.vlgmr.msrb.gmra.mxu3 %v1721_v34  ;;  %v1493_v31 = vld [vmem:[%s4509_s15 + $0x23a8] sm:$0xff]  ;;  %v1392_v32 = vld [vmem:[%s4509_s15 + $0x2080] sm:$0xff]  ;;  %v1394_v33 = vld [vmem:[%s4509_s15 + $0x2090] sm:$0xff] }
 0x32e   : > { %v1393_v34 = vld [vmem:[%s4509_s15 + $0x2088] sm:$0xff] }
 0x32f   : > { %2997 = vmatpush.xpose.msra.mxu0 %v1486_v35  ;;  %3037 = vmatpush.xpose.msra.mxu2 %v1488_v36  ;;  %v1395_v35 = vld [vmem:[%s4509_s15 + $0x2098] sm:$0xff]  ;;  %v1294_v36 = vld [vmem:[%s4509_s15 + $0x1d70] sm:$0xff] }
 0x330   : > { %3017 = vmatpush.xpose.msra.mxu1 %v1487_v37  ;;  %3057 = vmatpush.xpose.msra.mxu3 %v1489_v38  ;;  %v1296_v37 = vld [vmem:[%s4509_s15 + $0x1d80] sm:$0xff] }
 0x331   : > { %v342_v38 = vld [vmem:[%s4502_s24 + $0x78] sm:$0xff] }
 0x332   : > { %1723 = vst [vmem:[#allocation1 + $0x20] ss:$4 sm:$0xff] %v342_v38  ;;  %v1102_v38 = vld [vmem:[%s4509_s15 + $0x1770] sm:$0xff] }
 0x333   : > { %2998 = vmatpush.xpose.msra.mxu0 %v1388_v39  ;;  %3038 = vmatpush.xpose.msra.mxu2 %v1390_v40  ;;  %v1295_v39 = vld [vmem:[%s4509_s15 + $0x1d78] sm:$0xff]  ;;  %v1297_v40 = vld [vmem:[%s4509_s15 + $0x1d88] sm:$0xff] }
 0x334   : > { %3018 = vmatpush.xpose.msra.mxu1 %v1389_v41  ;;  %3058 = vmatpush.xpose.msra.mxu3 %v1391_v42  ;;  %v1196_v41 = vld [vmem:[%s4509_s15 + $0x1a60] sm:$0xff]  ;;  %v1198_v42 = vld [vmem:[%s4509_s15 + $0x1a70] sm:$0xff] }
 0x337   : > { %2999 = vmatpush.xpose.msra.mxu0 %v1290_v43  ;;  %3039 = vmatpush.xpose.msra.mxu2 %v1292_v44  ;;  %v1197_v43 = vld [vmem:[%s4509_s15 + $0x1a68] sm:$0xff]  ;;  %v1199_v44 = vld [vmem:[%s4509_s15 + $0x1a78] sm:$0xff] }
 0x338   : > { %3019 = vmatpush.xpose.msra.mxu1 %v1291_v46  ;;  %3059 = vmatpush.xpose.msra.mxu3 %v1293_v47  ;;  %v1100_v46 = vld [vmem:[%s4509_s15 + $0x1760] sm:$0xff]  ;;  %v1099_v47 = vld [vmem:[%s4509_s15 + $0x1758] sm:$0xff] }
 0x33b   : > { %3000 = vmatpush.xpose.msra.mxu0 %v1192_v48  ;;  %3040 = vmatpush.xpose.msra.mxu2 %v1194_v49  ;;  %v1101_v48 = vld [vmem:[%s4509_s15 + $0x1768] sm:$0xff]  ;;  %v1000_v49 = vld [vmem:[%s4509_s15 + $0x1440] sm:$0xff] }
 0x33c   : > { %3020 = vmatpush.xpose.msra.mxu1 %v1193_v50  ;;  %3060 = vmatpush.xpose.msra.mxu3 %v1195_v51  ;;  %v1002_v50 = vld [vmem:[%s4509_s15 + $0x1450] sm:$0xff]  ;;  %v1001_v51 = vld [vmem:[%s4509_s15 + $0x1448] sm:$0xff] }
 0x33f   : > { %3001 = vmatpush.xpose.msra.mxu0 %v1094_v52  ;;  %3041 = vmatpush.xpose.msra.mxu2 %v1096_v53  ;;  %v1003_v52 = vld [vmem:[%s4509_s15 + $0x1458] sm:$0xff]  ;;  %v902_v53 = vld [vmem:[%s4509_s15 + $0x1130] sm:$0xff] }
 0x340   : > { %3021 = vmatpush.xpose.msra.mxu1 %v1095_v54  ;;  %3061 = vmatpush.xpose.msra.mxu3 %v1097_v55  ;;  %v904_v54 = vld [vmem:[%s4509_s15 + $0x1140] sm:$0xff]  ;;  %v903_v55 = vld [vmem:[%s4509_s15 + $0x1138] sm:$0xff] }
 0x343   : > { %3002 = vmatpush.xpose.msra.mxu0 %v996_v56  ;;  %3042 = vmatpush.xpose.msra.mxu2 %v998_v57  ;;  %v905_v56 = vld [vmem:[%s4509_s15 + $0x1148] sm:$0xff]  ;;  %v804_v57 = vld [vmem:[%s4509_s15 + $0xe20] sm:$0xff] }
 0x344   : > { %3022 = vmatpush.xpose.msra.mxu1 %v997_v58  ;;  %3062 = vmatpush.xpose.msra.mxu3 %v999_v59  ;;  %v806_v58 = vld [vmem:[%s4509_s15 + $0xe30] sm:$0xff]  ;;  %v805_v59 = vld [vmem:[%s4509_s15 + $0xe28] sm:$0xff] }
 0x347   : > { %3003 = vmatpush.xpose.msra.mxu0 %v898_v60  ;;  %3043 = vmatpush.xpose.msra.mxu2 %v900_v61  ;;  %v807_v60 = vld [vmem:[%s4509_s15 + $0xe38] sm:$0xff]  ;;  %v706_v61 = vld [vmem:[%s4509_s15 + $0xb10] sm:$0xff] }
 0x348   : > { %3023 = vmatpush.xpose.msra.mxu1 %v899_v62  ;;  %3063 = vmatpush.xpose.msra.mxu3 %v901_v63  ;;  %v708_v62 = vld [vmem:[%s4509_s15 + $0xb20] sm:$0xff]  ;;  %v707_v63 = vld [vmem:[%s4509_s15 + $0xb18] sm:$0xff] }
 0x34b   : > { %3004 = vmatpush.xpose.msra.mxu0 %v800_v0  ;;  %3044 = vmatpush.xpose.msra.mxu2 %v802_v1  ;;  %v709_v0 = vld [vmem:[%s4509_s15 + $0xb28] sm:$0xff]  ;;  %v608_v1 = vld [vmem:[%s4509_s15 + $0x800] sm:$0xff] }
 0x34c   : > { %3024 = vmatpush.xpose.msra.mxu1 %v801_v2  ;;  %3064 = vmatpush.xpose.msra.mxu3 %v803_v3  ;;  %v610_v2 = vld [vmem:[%s4509_s15 + $0x810] sm:$0xff]  ;;  %v609_v3 = vld [vmem:[%s4509_s15 + $0x808] sm:$0xff] }
 0x34f   : > { %3005 = vmatpush.xpose.msra.mxu0 %v702_v4  ;;  %3045 = vmatpush.xpose.msra.mxu2 %v704_v5  ;;  %v611_v4 = vld [vmem:[%s4509_s15 + $0x818] sm:$0xff]  ;;  %v510_v5 = vld [vmem:[%s4509_s15 + $0x4f0] sm:$0xff] }
 0x350   : > { %3025 = vmatpush.xpose.msra.mxu1 %v703_v6  ;;  %3065 = vmatpush.xpose.msra.mxu3 %v705_v7  ;;  %v512_v6 = vld [vmem:[%s4509_s15 + $0x500] sm:$0xff]  ;;  %v511_v7 = vld [vmem:[%s4509_s15 + $0x4f8] sm:$0xff] }
 0x353   : > { %3006 = vmatpush.xpose.msra.mxu0 %v604_v8  ;;  %3046 = vmatpush.xpose.msra.mxu2 %v606_v9  ;;  %v513_v8 = vld [vmem:[%s4509_s15 + $0x508] sm:$0xff]  ;;  %v412_v9 = vld [vmem:[%s4509_s15 + $0x1e0] sm:$0xff] }
 0x354   : > { %3026 = vmatpush.xpose.msra.mxu1 %v605_v10  ;;  %3066 = vmatpush.xpose.msra.mxu3 %v607_v11  ;;  %v414_v10 = vld [vmem:[%s4509_s15 + $0x1f0] sm:$0xff]  ;;  %v1592_v11 = vld [vmem:[%s4509_s15 + $0x26c0] sm:$0xf] }
 0x357   : > { %3007 = vmatpush.xpose.msra.mxu0 %v506_v12  ;;  %3047 = vmatpush.xpose.msra.mxu2 %v508_v13  ;;  %v1594_v12 = vld [vmem:[%s4509_s15 + $0x26d0] sm:$0xf]  ;;  %v413_v13 = vld [vmem:[%s4509_s15 + $0x1e8] sm:$0xff] }
 0x358   : > { %3027 = vmatpush.xpose.msra.mxu1 %v507_v14  ;;  %3067 = vmatpush.xpose.msra.mxu3 %v509_v15  ;;  %v415_v14 = vld [vmem:[%s4509_s15 + $0x1f8] sm:$0xff] }
 0x359   : > { %v1728_v15 = vld.sshfl [vmem:[#allocation1 + $0x20] sm:$0xff pattern:$0x73625140] }
 0x35b   : > { %3008 = vmatpush.xpose.msra.mxu0 %v408_v16  ;;  %3048 = vmatpush.xpose.msra.mxu2 %v410_v17  ;;  %v1730_v16 = vld.sshfl [vmem:[#allocation1 + $0x30] sm:$0xff pattern:$0x73625140]  ;;  %v1593_v17 = vld [vmem:[%s4509_s15 + $0x26c8] sm:$0xf] }
 0x35c   : > { %3028 = vmatpush.xpose.msra.mxu1 %v409_v20  ;;  %3068 = vmatpush.xpose.msra.mxu3 %v411_v21  ;;  %v1731_v20 = vld.sshfl [vmem:[#allocation1 + $0x38] sm:$0xff pattern:$0x73625140] }
 0x35d   : > { %v1494_v21 = vld [vmem:[%s4509_s15 + $0x23b0] sm:$0xff] }
 0x35e   : > { %3009 = vmatmul.f32.vlgmr.msra.gmra.mxu0 %v1724_v22  ;;  %3049 = vmatmul.f32.vlgmr.msra.gmra.mxu2 %v1726_v23  ;;  %v1496_v22 = vld [vmem:[%s4509_s15 + $0x23c0] sm:$0xff]  ;;  %v1495_v23 = vld [vmem:[%s4509_s15 + $0x23b8] sm:$0xff] }
 0x35f   : > { %3076 = vmatpush.xpose.msrb.mxu0 %v1588_v18  ;;  %3116 = vmatpush.xpose.msrb.mxu2 %v1590_v19  ;;  %v1595_v18 = vld [vmem:[%s4509_s15 + $0x26d8] sm:$0xf] }
 0x360   : > { %3096 = vmatpush.xpose.msrb.mxu1 %v1589_v24  ;;  %3136 = vmatpush.xpose.msrb.mxu3 %v1591_v25  ;;  %v1729_v19 = vld.sshfl [vmem:[#allocation1 + $0x28] sm:$0xff pattern:$0x73625140] }
 0x361   : > { %3029 = vmatmul.f32.vlgmr.msra.gmra.mxu1 %v1725_v26  ;;  %3069 = vmatmul.f32.vlgmr.msra.gmra.mxu3 %v1727_v27  ;;  %v1497_v24 = vld [vmem:[%s4509_s15 + $0x23c8] sm:$0xff]  ;;  %v1396_v25 = vld [vmem:[%s4509_s15 + $0x20a0] sm:$0xff]  ;;  %v1398_v26 = vld [vmem:[%s4509_s15 + $0x20b0] sm:$0xff] }
 0x362   : > { %v1397_v27 = vld [vmem:[%s4509_s15 + $0x20a8] sm:$0xff] }
 0x363   : > { %3077 = vmatpush.xpose.msrb.mxu0 %v1490_v28  ;;  %3117 = vmatpush.xpose.msrb.mxu2 %v1492_v29  ;;  %v1399_v28 = vld [vmem:[%s4509_s15 + $0x20b8] sm:$0xff]  ;;  %v1298_v29 = vld [vmem:[%s4509_s15 + $0x1d90] sm:$0xff] }
 0x364   : > { %3097 = vmatpush.xpose.msrb.mxu1 %v1491_v30  ;;  %3137 = vmatpush.xpose.msrb.mxu3 %v1493_v31  ;;  %v1300_v30 = vld [vmem:[%s4509_s15 + $0x1da0] sm:$0xff]  ;;  %v343_v31 = vld [vmem:[%s4502_s24 + $0x80] sm:$0xff] }
 0x365   : > { %1732 = vst [vmem:[#allocation1] ss:$4 sm:$0xff] %v343_v31  ;;  %v1106_v31 = vld [vmem:[%s4509_s15 + $0x1790] sm:$0xff] }
 0x367   : > { %3078 = vmatpush.xpose.msrb.mxu0 %v1392_v32  ;;  %3118 = vmatpush.xpose.msrb.mxu2 %v1394_v33  ;;  %v1299_v32 = vld [vmem:[%s4509_s15 + $0x1d98] sm:$0xff]  ;;  %v1301_v33 = vld [vmem:[%s4509_s15 + $0x1da8] sm:$0xff] }
 0x368   : > { %3098 = vmatpush.xpose.msrb.mxu1 %v1393_v34  ;;  %3138 = vmatpush.xpose.msrb.mxu3 %v1395_v35  ;;  %v1200_v34 = vld [vmem:[%s4509_s15 + $0x1a80] sm:$0xff]  ;;  %v1202_v35 = vld [vmem:[%s4509_s15 + $0x1a90] sm:$0xff] }
 0x36b   : > { %3079 = vmatpush.xpose.msrb.mxu0 %v1294_v36  ;;  %3119 = vmatpush.xpose.msrb.mxu2 %v1296_v37  ;;  %v1201_v36 = vld [vmem:[%s4509_s15 + $0x1a88] sm:$0xff]  ;;  %v1203_v37 = vld [vmem:[%s4509_s15 + $0x1a98] sm:$0xff] }
 0x36c   : > { %3099 = vmatpush.xpose.msrb.mxu1 %v1295_v39  ;;  %3139 = vmatpush.xpose.msrb.mxu3 %v1297_v40  ;;  %v1104_v39 = vld [vmem:[%s4509_s15 + $0x1780] sm:$0xff]  ;;  %v1103_v40 = vld [vmem:[%s4509_s15 + $0x1778] sm:$0xff] }
 0x36f   : > { %3080 = vmatpush.xpose.msrb.mxu0 %v1196_v41  ;;  %3120 = vmatpush.xpose.msrb.mxu2 %v1198_v42  ;;  %v1105_v41 = vld [vmem:[%s4509_s15 + $0x1788] sm:$0xff]  ;;  %v1004_v42 = vld [vmem:[%s4509_s15 + $0x1460] sm:$0xff] }
 0x370   : > { %3100 = vmatpush.xpose.msrb.mxu1 %v1197_v43  ;;  %3140 = vmatpush.xpose.msrb.mxu3 %v1199_v44  ;;  %v1006_v43 = vld [vmem:[%s4509_s15 + $0x1470] sm:$0xff]  ;;  %v1005_v44 = vld [vmem:[%s4509_s15 + $0x1468] sm:$0xff] }
 0x373   : > { %3081 = vmatpush.xpose.msrb.mxu0 %v1098_v45  ;;  %3121 = vmatpush.xpose.msrb.mxu2 %v1100_v46  ;;  %v1007_v45 = vld [vmem:[%s4509_s15 + $0x1478] sm:$0xff]  ;;  %v906_v46 = vld [vmem:[%s4509_s15 + $0x1150] sm:$0xff] }
 0x374   : > { %3101 = vmatpush.xpose.msrb.mxu1 %v1099_v47  ;;  %3141 = vmatpush.xpose.msrb.mxu3 %v1101_v48  ;;  %v908_v47 = vld [vmem:[%s4509_s15 + $0x1160] sm:$0xff]  ;;  %v907_v48 = vld [vmem:[%s4509_s15 + $0x1158] sm:$0xff] }
 0x377   : > { %3082 = vmatpush.xpose.msrb.mxu0 %v1000_v49  ;;  %3122 = vmatpush.xpose.msrb.mxu2 %v1002_v50  ;;  %v909_v49 = vld [vmem:[%s4509_s15 + $0x1168] sm:$0xff]  ;;  %v808_v50 = vld [vmem:[%s4509_s15 + $0xe40] sm:$0xff] }
 0x378   : > { %3102 = vmatpush.xpose.msrb.mxu1 %v1001_v51  ;;  %3142 = vmatpush.xpose.msrb.mxu3 %v1003_v52  ;;  %v810_v51 = vld [vmem:[%s4509_s15 + $0xe50] sm:$0xff]  ;;  %v809_v52 = vld [vmem:[%s4509_s15 + $0xe48] sm:$0xff] }
 0x37b   : > { %3083 = vmatpush.xpose.msrb.mxu0 %v902_v53  ;;  %3123 = vmatpush.xpose.msrb.mxu2 %v904_v54  ;;  %v811_v53 = vld [vmem:[%s4509_s15 + $0xe58] sm:$0xff]  ;;  %v710_v54 = vld [vmem:[%s4509_s15 + $0xb30] sm:$0xff] }
 0x37c   : > { %3103 = vmatpush.xpose.msrb.mxu1 %v903_v55  ;;  %3143 = vmatpush.xpose.msrb.mxu3 %v905_v56  ;;  %v712_v55 = vld [vmem:[%s4509_s15 + $0xb40] sm:$0xff]  ;;  %v711_v56 = vld [vmem:[%s4509_s15 + $0xb38] sm:$0xff] }
 0x37f   : > { %3084 = vmatpush.xpose.msrb.mxu0 %v804_v57  ;;  %3124 = vmatpush.xpose.msrb.mxu2 %v806_v58  ;;  %v713_v57 = vld [vmem:[%s4509_s15 + $0xb48] sm:$0xff]  ;;  %v612_v58 = vld [vmem:[%s4509_s15 + $0x820] sm:$0xff] }
 0x380   : > { %3104 = vmatpush.xpose.msrb.mxu1 %v805_v59  ;;  %3144 = vmatpush.xpose.msrb.mxu3 %v807_v60  ;;  %v614_v59 = vld [vmem:[%s4509_s15 + $0x830] sm:$0xff]  ;;  %v613_v60 = vld [vmem:[%s4509_s15 + $0x828] sm:$0xff] }
 0x383   : > { %3085 = vmatpush.xpose.msrb.mxu0 %v706_v61  ;;  %3125 = vmatpush.xpose.msrb.mxu2 %v708_v62  ;;  %v615_v61 = vld [vmem:[%s4509_s15 + $0x838] sm:$0xff]  ;;  %v514_v62 = vld [vmem:[%s4509_s15 + $0x510] sm:$0xff] }
 0x384   : > { %3105 = vmatpush.xpose.msrb.mxu1 %v707_v63  ;;  %3145 = vmatpush.xpose.msrb.mxu3 %v709_v0  ;;  %v516_v63 = vld [vmem:[%s4509_s15 + $0x520] sm:$0xff]  ;;  %v515_v0 = vld [vmem:[%s4509_s15 + $0x518] sm:$0xff] }
 0x387   : > { %3086 = vmatpush.xpose.msrb.mxu0 %v608_v1  ;;  %3126 = vmatpush.xpose.msrb.mxu2 %v610_v2  ;;  %v517_v1 = vld [vmem:[%s4509_s15 + $0x528] sm:$0xff]  ;;  %v416_v2 = vld [vmem:[%s4509_s15 + $0x200] sm:$0xff] }
 0x388   : > { %3106 = vmatpush.xpose.msrb.mxu1 %v609_v3  ;;  %3146 = vmatpush.xpose.msrb.mxu3 %v611_v4  ;;  %v418_v3 = vld [vmem:[%s4509_s15 + $0x210] sm:$0xff]  ;;  %v1596_v4 = vld [vmem:[%s4509_s15 + $0x26e0] sm:$0xf] }
 0x38b   : > { %3087 = vmatpush.xpose.msrb.mxu0 %v510_v5  ;;  %3127 = vmatpush.xpose.msrb.mxu2 %v512_v6  ;;  %v1598_v5 = vld [vmem:[%s4509_s15 + $0x26f0] sm:$0xf]  ;;  %v417_v6 = vld [vmem:[%s4509_s15 + $0x208] sm:$0xff] }
 0x38c   : > { %3107 = vmatpush.xpose.msrb.mxu1 %v511_v7  ;;  %3147 = vmatpush.xpose.msrb.mxu3 %v513_v8  ;;  %v419_v7 = vld [vmem:[%s4509_s15 + $0x218] sm:$0xff] }
 0x38d   : > { %v1734_v8 = vld.sshfl [vmem:[#allocation1] sm:$0xff pattern:$0x73625140] }
 0x38f   : > { %3088 = vmatpush.xpose.msrb.mxu0 %v412_v9  ;;  %3128 = vmatpush.xpose.msrb.mxu2 %v414_v10  ;;  %v1736_v9 = vld.sshfl [vmem:[#allocation1 + $0x10] sm:$0xff pattern:$0x73625140]  ;;  %v1597_v10 = vld [vmem:[%s4509_s15 + $0x26e8] sm:$0xf] }
 0x390   : > { %3108 = vmatpush.xpose.msrb.mxu1 %v413_v13  ;;  %3148 = vmatpush.xpose.msrb.mxu3 %v415_v14  ;;  %v1737_v13 = vld.sshfl [vmem:[#allocation1 + $0x18] sm:$0xff pattern:$0x73625140] }
 0x391   : > { %v1498_v14 = vld [vmem:[%s4509_s15 + $0x23d0] sm:$0xff] }
 0x392   : > { %3089 = vmatmul.f32.vlgmr.msrb.gmra.mxu0 %v1728_v15  ;;  %3129 = vmatmul.f32.vlgmr.msrb.gmra.mxu2 %v1730_v16  ;;  %v1500_v15 = vld [vmem:[%s4509_s15 + $0x23e0] sm:$0xff]  ;;  %v1499_v16 = vld [vmem:[%s4509_s15 + $0x23d8] sm:$0xff] }
 0x393   : > { %3156 = vmatpush.xpose.msra.mxu0 %v1592_v11  ;;  %3196 = vmatpush.xpose.msra.mxu2 %v1594_v12  ;;  %v1599_v11 = vld [vmem:[%s4509_s15 + $0x26f8] sm:$0xf] }
 0x394   : > { %3176 = vmatpush.xpose.msra.mxu1 %v1593_v17  ;;  %3216 = vmatpush.xpose.msra.mxu3 %v1595_v18  ;;  %v1735_v12 = vld.sshfl [vmem:[#allocation1 + $0x8] sm:$0xff pattern:$0x73625140] }
 0x395   : > { %3109 = vmatmul.f32.vlgmr.msrb.gmra.mxu1 %v1729_v19  ;;  %3149 = vmatmul.f32.vlgmr.msrb.gmra.mxu3 %v1731_v20  ;;  %v1501_v17 = vld [vmem:[%s4509_s15 + $0x23e8] sm:$0xff]  ;;  %v1400_v18 = vld [vmem:[%s4509_s15 + $0x20c0] sm:$0xff]  ;;  %v1402_v19 = vld [vmem:[%s4509_s15 + $0x20d0] sm:$0xff] }
 0x396   : > { %v1401_v20 = vld [vmem:[%s4509_s15 + $0x20c8] sm:$0xff] }
 0x397   : > { %3157 = vmatpush.xpose.msra.mxu0 %v1494_v21  ;;  %3197 = vmatpush.xpose.msra.mxu2 %v1496_v22  ;;  %v1403_v21 = vld [vmem:[%s4509_s15 + $0x20d8] sm:$0xff]  ;;  %v1302_v22 = vld [vmem:[%s4509_s15 + $0x1db0] sm:$0xff] }
 0x398   : > { %3177 = vmatpush.xpose.msra.mxu1 %v1495_v23  ;;  %3217 = vmatpush.xpose.msra.mxu3 %v1497_v24  ;;  %v1304_v23 = vld [vmem:[%s4509_s15 + $0x1dc0] sm:$0xff] }
 0x399   : > { %v344_v24 = vld [vmem:[%s4502_s24 + $0x88] sm:$0xff] }
 0x39a   : > { %1733 = vst [vmem:[#allocation1 + $0x20] ss:$4 sm:$0xff] %v344_v24  ;;  %v1110_v24 = vld [vmem:[%s4509_s15 + $0x17b0] sm:$0xff] }
 0x39b   : > { %3158 = vmatpush.xpose.msra.mxu0 %v1396_v25  ;;  %3198 = vmatpush.xpose.msra.mxu2 %v1398_v26  ;;  %v1303_v25 = vld [vmem:[%s4509_s15 + $0x1db8] sm:$0xff]  ;;  %v1305_v26 = vld [vmem:[%s4509_s15 + $0x1dc8] sm:$0xff] }
 0x39c   : > { %3178 = vmatpush.xpose.msra.mxu1 %v1397_v27  ;;  %3218 = vmatpush.xpose.msra.mxu3 %v1399_v28  ;;  %v1204_v27 = vld [vmem:[%s4509_s15 + $0x1aa0] sm:$0xff]  ;;  %v1206_v28 = vld [vmem:[%s4509_s15 + $0x1ab0] sm:$0xff] }
 0x39f   : > { %3159 = vmatpush.xpose.msra.mxu0 %v1298_v29  ;;  %3199 = vmatpush.xpose.msra.mxu2 %v1300_v30  ;;  %v1205_v29 = vld [vmem:[%s4509_s15 + $0x1aa8] sm:$0xff]  ;;  %v1207_v30 = vld [vmem:[%s4509_s15 + $0x1ab8] sm:$0xff] }
 0x3a0   : > { %3179 = vmatpush.xpose.msra.mxu1 %v1299_v32  ;;  %3219 = vmatpush.xpose.msra.mxu3 %v1301_v33  ;;  %v1108_v32 = vld [vmem:[%s4509_s15 + $0x17a0] sm:$0xff]  ;;  %v1107_v33 = vld [vmem:[%s4509_s15 + $0x1798] sm:$0xff] }
 0x3a3   : > { %3160 = vmatpush.xpose.msra.mxu0 %v1200_v34  ;;  %3200 = vmatpush.xpose.msra.mxu2 %v1202_v35  ;;  %v1109_v34 = vld [vmem:[%s4509_s15 + $0x17a8] sm:$0xff]  ;;  %v1008_v35 = vld [vmem:[%s4509_s15 + $0x1480] sm:$0xff] }
 0x3a4   : > { %3180 = vmatpush.xpose.msra.mxu1 %v1201_v36  ;;  %3220 = vmatpush.xpose.msra.mxu3 %v1203_v37  ;;  %v1010_v36 = vld [vmem:[%s4509_s15 + $0x1490] sm:$0xff]  ;;  %v1009_v37 = vld [vmem:[%s4509_s15 + $0x1488] sm:$0xff] }
 0x3a7   : > { %3161 = vmatpush.xpose.msra.mxu0 %v1102_v38  ;;  %3201 = vmatpush.xpose.msra.mxu2 %v1104_v39  ;;  %v1011_v38 = vld [vmem:[%s4509_s15 + $0x1498] sm:$0xff]  ;;  %v910_v39 = vld [vmem:[%s4509_s15 + $0x1170] sm:$0xff] }
 0x3a8   : > { %3181 = vmatpush.xpose.msra.mxu1 %v1103_v40  ;;  %3221 = vmatpush.xpose.msra.mxu3 %v1105_v41  ;;  %v912_v40 = vld [vmem:[%s4509_s15 + $0x1180] sm:$0xff]  ;;  %v911_v41 = vld [vmem:[%s4509_s15 + $0x1178] sm:$0xff] }
 0x3ab   : > { %3162 = vmatpush.xpose.msra.mxu0 %v1004_v42  ;;  %3202 = vmatpush.xpose.msra.mxu2 %v1006_v43  ;;  %v913_v42 = vld [vmem:[%s4509_s15 + $0x1188] sm:$0xff]  ;;  %v812_v43 = vld [vmem:[%s4509_s15 + $0xe60] sm:$0xff] }
 0x3ac   : > { %3182 = vmatpush.xpose.msra.mxu1 %v1005_v44  ;;  %3222 = vmatpush.xpose.msra.mxu3 %v1007_v45  ;;  %v814_v44 = vld [vmem:[%s4509_s15 + $0xe70] sm:$0xff]  ;;  %v813_v45 = vld [vmem:[%s4509_s15 + $0xe68] sm:$0xff] }
 0x3af   : > { %3163 = vmatpush.xpose.msra.mxu0 %v906_v46  ;;  %3203 = vmatpush.xpose.msra.mxu2 %v908_v47  ;;  %v815_v46 = vld [vmem:[%s4509_s15 + $0xe78] sm:$0xff]  ;;  %v714_v47 = vld [vmem:[%s4509_s15 + $0xb50] sm:$0xff] }
 0x3b0   : > { %3183 = vmatpush.xpose.msra.mxu1 %v907_v48  ;;  %3223 = vmatpush.xpose.msra.mxu3 %v909_v49  ;;  %v716_v48 = vld [vmem:[%s4509_s15 + $0xb60] sm:$0xff]  ;;  %v715_v49 = vld [vmem:[%s4509_s15 + $0xb58] sm:$0xff] }
 0x3b3   : > { %3164 = vmatpush.xpose.msra.mxu0 %v808_v50  ;;  %3204 = vmatpush.xpose.msra.mxu2 %v810_v51  ;;  %v717_v50 = vld [vmem:[%s4509_s15 + $0xb68] sm:$0xff]  ;;  %v616_v51 = vld [vmem:[%s4509_s15 + $0x840] sm:$0xff] }
 0x3b4   : > { %3184 = vmatpush.xpose.msra.mxu1 %v809_v52  ;;  %3224 = vmatpush.xpose.msra.mxu3 %v811_v53  ;;  %v618_v52 = vld [vmem:[%s4509_s15 + $0x850] sm:$0xff]  ;;  %v617_v53 = vld [vmem:[%s4509_s15 + $0x848] sm:$0xff] }
 0x3b7   : > { %3165 = vmatpush.xpose.msra.mxu0 %v710_v54  ;;  %3205 = vmatpush.xpose.msra.mxu2 %v712_v55  ;;  %v619_v54 = vld [vmem:[%s4509_s15 + $0x858] sm:$0xff]  ;;  %v518_v55 = vld [vmem:[%s4509_s15 + $0x530] sm:$0xff] }
 0x3b8   : > { %3185 = vmatpush.xpose.msra.mxu1 %v711_v56  ;;  %3225 = vmatpush.xpose.msra.mxu3 %v713_v57  ;;  %v520_v56 = vld [vmem:[%s4509_s15 + $0x540] sm:$0xff]  ;;  %v519_v57 = vld [vmem:[%s4509_s15 + $0x538] sm:$0xff] }
 0x3bb   : > { %3166 = vmatpush.xpose.msra.mxu0 %v612_v58  ;;  %3206 = vmatpush.xpose.msra.mxu2 %v614_v59  ;;  %v521_v58 = vld [vmem:[%s4509_s15 + $0x548] sm:$0xff]  ;;  %v420_v59 = vld [vmem:[%s4509_s15 + $0x220] sm:$0xff] }
 0x3bc   : > { %3186 = vmatpush.xpose.msra.mxu1 %v613_v60  ;;  %3226 = vmatpush.xpose.msra.mxu3 %v615_v61  ;;  %v422_v60 = vld [vmem:[%s4509_s15 + $0x230] sm:$0xff]  ;;  %v1600_v61 = vld [vmem:[%s4509_s15 + $0x2700] sm:$0xf] }
 0x3bf   : > { %3167 = vmatpush.xpose.msra.mxu0 %v514_v62  ;;  %3207 = vmatpush.xpose.msra.mxu2 %v516_v63  ;;  %v1602_v62 = vld [vmem:[%s4509_s15 + $0x2710] sm:$0xf]  ;;  %v421_v63 = vld [vmem:[%s4509_s15 + $0x228] sm:$0xff] }
 0x3c0   : > { %3187 = vmatpush.xpose.msra.mxu1 %v515_v0  ;;  %3227 = vmatpush.xpose.msra.mxu3 %v517_v1  ;;  %v423_v0 = vld [vmem:[%s4509_s15 + $0x238] sm:$0xff] }
 0x3c1   : > { %v1738_v1 = vld.sshfl [vmem:[#allocation1 + $0x20] sm:$0xff pattern:$0x73625140] }
 0x3c3   : > { %3168 = vmatpush.xpose.msra.mxu0 %v416_v2  ;;  %3208 = vmatpush.xpose.msra.mxu2 %v418_v3  ;;  %v1740_v2 = vld.sshfl [vmem:[#allocation1 + $0x30] sm:$0xff pattern:$0x73625140]  ;;  %v1601_v3 = vld [vmem:[%s4509_s15 + $0x2708] sm:$0xf] }
 0x3c4   : > { %3188 = vmatpush.xpose.msra.mxu1 %v417_v6  ;;  %3228 = vmatpush.xpose.msra.mxu3 %v419_v7  ;;  %v1741_v6 = vld.sshfl [vmem:[#allocation1 + $0x38] sm:$0xff pattern:$0x73625140] }
 0x3c5   : > { %v1502_v7 = vld [vmem:[%s4509_s15 + $0x23f0] sm:$0xff] }
 0x3c6   : > { %3169 = vmatmul.f32.vlgmr.msra.gmra.mxu0 %v1734_v8  ;;  %3209 = vmatmul.f32.vlgmr.msra.gmra.mxu2 %v1736_v9  ;;  %v1504_v8 = vld [vmem:[%s4509_s15 + $0x2400] sm:$0xff]  ;;  %v1503_v9 = vld [vmem:[%s4509_s15 + $0x23f8] sm:$0xff] }
 0x3c7   : > { %3236 = vmatpush.xpose.msrb.mxu0 %v1596_v4  ;;  %3276 = vmatpush.xpose.msrb.mxu2 %v1598_v5  ;;  %v1603_v4 = vld [vmem:[%s4509_s15 + $0x2718] sm:$0xf] }
 0x3c8   : > { %3256 = vmatpush.xpose.msrb.mxu1 %v1597_v10  ;;  %3296 = vmatpush.xpose.msrb.mxu3 %v1599_v11  ;;  %v1739_v5 = vld.sshfl [vmem:[#allocation1 + $0x28] sm:$0xff pattern:$0x73625140] }
 0x3c9   : > { %3189 = vmatmul.f32.vlgmr.msra.gmra.mxu1 %v1735_v12  ;;  %3229 = vmatmul.f32.vlgmr.msra.gmra.mxu3 %v1737_v13  ;;  %v1505_v10 = vld [vmem:[%s4509_s15 + $0x2408] sm:$0xff]  ;;  %v1404_v11 = vld [vmem:[%s4509_s15 + $0x20e0] sm:$0xff]  ;;  %v1406_v12 = vld [vmem:[%s4509_s15 + $0x20f0] sm:$0xff] }
 0x3ca   : > { %v1405_v13 = vld [vmem:[%s4509_s15 + $0x20e8] sm:$0xff] }
 0x3cb   : > { %3237 = vmatpush.xpose.msrb.mxu0 %v1498_v14  ;;  %3277 = vmatpush.xpose.msrb.mxu2 %v1500_v15  ;;  %v1407_v14 = vld [vmem:[%s4509_s15 + $0x20f8] sm:$0xff]  ;;  %v1306_v15 = vld [vmem:[%s4509_s15 + $0x1dd0] sm:$0xff] }
 0x3cc   : > { %3257 = vmatpush.xpose.msrb.mxu1 %v1499_v16  ;;  %3297 = vmatpush.xpose.msrb.mxu3 %v1501_v17  ;;  %v1308_v16 = vld [vmem:[%s4509_s15 + $0x1de0] sm:$0xff] }
 0x3cd   : > { %v345_v17 = vld [vmem:[%s4502_s24 + $0x90] sm:$0xff] }
 0x3ce   : > { %1742 = vst [vmem:[#allocation1] ss:$4 sm:$0xff] %v345_v17  ;;  %v1114_v17 = vld [vmem:[%s4509_s15 + $0x17d0] sm:$0xff] }
 0x3cf   : > { %3238 = vmatpush.xpose.msrb.mxu0 %v1400_v18  ;;  %3278 = vmatpush.xpose.msrb.mxu2 %v1402_v19  ;;  %v1307_v18 = vld [vmem:[%s4509_s15 + $0x1dd8] sm:$0xff]  ;;  %v1309_v19 = vld [vmem:[%s4509_s15 + $0x1de8] sm:$0xff] }
 0x3d0   : > { %3258 = vmatpush.xpose.msrb.mxu1 %v1401_v20  ;;  %3298 = vmatpush.xpose.msrb.mxu3 %v1403_v21  ;;  %v1208_v20 = vld [vmem:[%s4509_s15 + $0x1ac0] sm:$0xff]  ;;  %v1210_v21 = vld [vmem:[%s4509_s15 + $0x1ad0] sm:$0xff] }
 0x3d3   : > { %3239 = vmatpush.xpose.msrb.mxu0 %v1302_v22  ;;  %3279 = vmatpush.xpose.msrb.mxu2 %v1304_v23  ;;  %v1209_v22 = vld [vmem:[%s4509_s15 + $0x1ac8] sm:$0xff]  ;;  %v1211_v23 = vld [vmem:[%s4509_s15 + $0x1ad8] sm:$0xff] }
 0x3d4   : > { %3259 = vmatpush.xpose.msrb.mxu1 %v1303_v25  ;;  %3299 = vmatpush.xpose.msrb.mxu3 %v1305_v26  ;;  %v1112_v25 = vld [vmem:[%s4509_s15 + $0x17c0] sm:$0xff]  ;;  %v1111_v26 = vld [vmem:[%s4509_s15 + $0x17b8] sm:$0xff] }
 0x3d7   : > { %3240 = vmatpush.xpose.msrb.mxu0 %v1204_v27  ;;  %3280 = vmatpush.xpose.msrb.mxu2 %v1206_v28  ;;  %v1113_v27 = vld [vmem:[%s4509_s15 + $0x17c8] sm:$0xff]  ;;  %v1012_v28 = vld [vmem:[%s4509_s15 + $0x14a0] sm:$0xff] }
 0x3d8   : > { %3260 = vmatpush.xpose.msrb.mxu1 %v1205_v29  ;;  %3300 = vmatpush.xpose.msrb.mxu3 %v1207_v30  ;;  %v1014_v29 = vld [vmem:[%s4509_s15 + $0x14b0] sm:$0xff]  ;;  %v1013_v30 = vld [vmem:[%s4509_s15 + $0x14a8] sm:$0xff] }
 0x3db   : > { %3241 = vmatpush.xpose.msrb.mxu0 %v1106_v31  ;;  %3281 = vmatpush.xpose.msrb.mxu2 %v1108_v32  ;;  %v1015_v31 = vld [vmem:[%s4509_s15 + $0x14b8] sm:$0xff]  ;;  %v914_v32 = vld [vmem:[%s4509_s15 + $0x1190] sm:$0xff] }
 0x3dc   : > { %3261 = vmatpush.xpose.msrb.mxu1 %v1107_v33  ;;  %3301 = vmatpush.xpose.msrb.mxu3 %v1109_v34  ;;  %v916_v33 = vld [vmem:[%s4509_s15 + $0x11a0] sm:$0xff]  ;;  %v915_v34 = vld [vmem:[%s4509_s15 + $0x1198] sm:$0xff] }
 0x3df   : > { %3242 = vmatpush.xpose.msrb.mxu0 %v1008_v35  ;;  %3282 = vmatpush.xpose.msrb.mxu2 %v1010_v36  ;;  %v917_v35 = vld [vmem:[%s4509_s15 + $0x11a8] sm:$0xff]  ;;  %v816_v36 = vld [vmem:[%s4509_s15 + $0xe80] sm:$0xff] }
 0x3e0   : > { %3262 = vmatpush.xpose.msrb.mxu1 %v1009_v37  ;;  %3302 = vmatpush.xpose.msrb.mxu3 %v1011_v38  ;;  %v818_v37 = vld [vmem:[%s4509_s15 + $0xe90] sm:$0xff]  ;;  %v817_v38 = vld [vmem:[%s4509_s15 + $0xe88] sm:$0xff] }
 0x3e3   : > { %3243 = vmatpush.xpose.msrb.mxu0 %v910_v39  ;;  %3283 = vmatpush.xpose.msrb.mxu2 %v912_v40  ;;  %v819_v39 = vld [vmem:[%s4509_s15 + $0xe98] sm:$0xff]  ;;  %v718_v40 = vld [vmem:[%s4509_s15 + $0xb70] sm:$0xff] }
 0x3e4   : > { %3263 = vmatpush.xpose.msrb.mxu1 %v911_v41  ;;  %3303 = vmatpush.xpose.msrb.mxu3 %v913_v42  ;;  %v720_v41 = vld [vmem:[%s4509_s15 + $0xb80] sm:$0xff]  ;;  %v719_v42 = vld [vmem:[%s4509_s15 + $0xb78] sm:$0xff] }
 0x3e7   : > { %3244 = vmatpush.xpose.msrb.mxu0 %v812_v43  ;;  %3284 = vmatpush.xpose.msrb.mxu2 %v814_v44  ;;  %v721_v43 = vld [vmem:[%s4509_s15 + $0xb88] sm:$0xff]  ;;  %v620_v44 = vld [vmem:[%s4509_s15 + $0x860] sm:$0xff] }
 0x3e8   : > { %3264 = vmatpush.xpose.msrb.mxu1 %v813_v45  ;;  %3304 = vmatpush.xpose.msrb.mxu3 %v815_v46  ;;  %v622_v45 = vld [vmem:[%s4509_s15 + $0x870] sm:$0xff]  ;;  %v621_v46 = vld [vmem:[%s4509_s15 + $0x868] sm:$0xff] }
 0x3eb   : > { %3245 = vmatpush.xpose.msrb.mxu0 %v714_v47  ;;  %3285 = vmatpush.xpose.msrb.mxu2 %v716_v48  ;;  %v623_v47 = vld [vmem:[%s4509_s15 + $0x878] sm:$0xff]  ;;  %v522_v48 = vld [vmem:[%s4509_s15 + $0x550] sm:$0xff] }
 0x3ec   : > { %3265 = vmatpush.xpose.msrb.mxu1 %v715_v49  ;;  %3305 = vmatpush.xpose.msrb.mxu3 %v717_v50  ;;  %v524_v49 = vld [vmem:[%s4509_s15 + $0x560] sm:$0xff]  ;;  %v523_v50 = vld [vmem:[%s4509_s15 + $0x558] sm:$0xff] }
 0x3ef   : > { %3246 = vmatpush.xpose.msrb.mxu0 %v616_v51  ;;  %3286 = vmatpush.xpose.msrb.mxu2 %v618_v52  ;;  %v525_v51 = vld [vmem:[%s4509_s15 + $0x568] sm:$0xff]  ;;  %v424_v52 = vld [vmem:[%s4509_s15 + $0x240] sm:$0xff] }
 0x3f0   : > { %3266 = vmatpush.xpose.msrb.mxu1 %v617_v53  ;;  %3306 = vmatpush.xpose.msrb.mxu3 %v619_v54  ;;  %v426_v53 = vld [vmem:[%s4509_s15 + $0x250] sm:$0xff]  ;;  %v1604_v54 = vld [vmem:[%s4509_s15 + $0x2720] sm:$0xf] }
 0x3f3   : > { %3247 = vmatpush.xpose.msrb.mxu0 %v518_v55  ;;  %3287 = vmatpush.xpose.msrb.mxu2 %v520_v56  ;;  %v1606_v55 = vld [vmem:[%s4509_s15 + $0x2730] sm:$0xf]  ;;  %v425_v56 = vld [vmem:[%s4509_s15 + $0x248] sm:$0xff] }
 0x3f4   : > { %3267 = vmatpush.xpose.msrb.mxu1 %v519_v57  ;;  %3307 = vmatpush.xpose.msrb.mxu3 %v521_v58  ;;  %v427_v57 = vld [vmem:[%s4509_s15 + $0x258] sm:$0xff] }
 0x3f5   : > { %v1744_v58 = vld.sshfl [vmem:[#allocation1] sm:$0xff pattern:$0x73625140] }
 0x3f7   : > { %3248 = vmatpush.xpose.msrb.mxu0 %v420_v59  ;;  %3288 = vmatpush.xpose.msrb.mxu2 %v422_v60  ;;  %v1746_v59 = vld.sshfl [vmem:[#allocation1 + $0x10] sm:$0xff pattern:$0x73625140]  ;;  %v1605_v60 = vld [vmem:[%s4509_s15 + $0x2728] sm:$0xf] }
 0x3f8   : > { %3268 = vmatpush.xpose.msrb.mxu1 %v421_v63  ;;  %3308 = vmatpush.xpose.msrb.mxu3 %v423_v0  ;;  %v1747_v63 = vld.sshfl [vmem:[#allocation1 + $0x18] sm:$0xff pattern:$0x73625140] }
 0x3f9   : > { %v1506_v0 = vld [vmem:[%s4509_s15 + $0x2410] sm:$0xff] }
 0x3fa   : > { %3249 = vmatmul.f32.vlgmr.msrb.gmra.mxu0 %v1738_v1  ;;  %3289 = vmatmul.f32.vlgmr.msrb.gmra.mxu2 %v1740_v2  ;;  %v1508_v1 = vld [vmem:[%s4509_s15 + $0x2420] sm:$0xff]  ;;  %v1507_v2 = vld [vmem:[%s4509_s15 + $0x2418] sm:$0xff] }
 0x3fb   : > { %3316 = vmatpush.xpose.msra.mxu0 %v1600_v61  ;;  %3356 = vmatpush.xpose.msra.mxu2 %v1602_v62  ;;  %v1607_v61 = vld [vmem:[%s4509_s15 + $0x2738] sm:$0xf] }
 0x3fc   : > { %3336 = vmatpush.xpose.msra.mxu1 %v1601_v3  ;;  %3376 = vmatpush.xpose.msra.mxu3 %v1603_v4  ;;  %v1745_v62 = vld.sshfl [vmem:[#allocation1 + $0x8] sm:$0xff pattern:$0x73625140] }
 0x3fd   : > { %3269 = vmatmul.f32.vlgmr.msrb.gmra.mxu1 %v1739_v5  ;;  %3309 = vmatmul.f32.vlgmr.msrb.gmra.mxu3 %v1741_v6  ;;  %v1509_v3 = vld [vmem:[%s4509_s15 + $0x2428] sm:$0xff]  ;;  %v1408_v4 = vld [vmem:[%s4509_s15 + $0x2100] sm:$0xff]  ;;  %v1410_v5 = vld [vmem:[%s4509_s15 + $0x2110] sm:$0xff] }
 0x3fe   : > { %v1409_v6 = vld [vmem:[%s4509_s15 + $0x2108] sm:$0xff] }
 0x3ff   : > { %3317 = vmatpush.xpose.msra.mxu0 %v1502_v7  ;;  %3357 = vmatpush.xpose.msra.mxu2 %v1504_v8  ;;  %v1411_v7 = vld [vmem:[%s4509_s15 + $0x2118] sm:$0xff]  ;;  %v1310_v8 = vld [vmem:[%s4509_s15 + $0x1df0] sm:$0xff] }
 0x400   : > { %3337 = vmatpush.xpose.msra.mxu1 %v1503_v9  ;;  %3377 = vmatpush.xpose.msra.mxu3 %v1505_v10  ;;  %v1312_v9 = vld [vmem:[%s4509_s15 + $0x1e00] sm:$0xff] }
 0x401   : > { %v346_v10 = vld [vmem:[%s4502_s24 + $0x98] sm:$0xff] }
 0x402   : > { %1743 = vst [vmem:[#allocation1 + $0x20] ss:$4 sm:$0xff] %v346_v10  ;;  %v1118_v10 = vld [vmem:[%s4509_s15 + $0x17f0] sm:$0xff] }
 0x403   : > { %3318 = vmatpush.xpose.msra.mxu0 %v1404_v11  ;;  %3358 = vmatpush.xpose.msra.mxu2 %v1406_v12  ;;  %v1311_v11 = vld [vmem:[%s4509_s15 + $0x1df8] sm:$0xff]  ;;  %v1313_v12 = vld [vmem:[%s4509_s15 + $0x1e08] sm:$0xff] }
 0x404   : > { %3338 = vmatpush.xpose.msra.mxu1 %v1405_v13  ;;  %3378 = vmatpush.xpose.msra.mxu3 %v1407_v14  ;;  %v1212_v13 = vld [vmem:[%s4509_s15 + $0x1ae0] sm:$0xff]  ;;  %v1214_v14 = vld [vmem:[%s4509_s15 + $0x1af0] sm:$0xff] }
 0x407   : > { %3319 = vmatpush.xpose.msra.mxu0 %v1306_v15  ;;  %3359 = vmatpush.xpose.msra.mxu2 %v1308_v16  ;;  %v1213_v15 = vld [vmem:[%s4509_s15 + $0x1ae8] sm:$0xff]  ;;  %v1215_v16 = vld [vmem:[%s4509_s15 + $0x1af8] sm:$0xff] }
 0x408   : > { %3339 = vmatpush.xpose.msra.mxu1 %v1307_v18  ;;  %3379 = vmatpush.xpose.msra.mxu3 %v1309_v19  ;;  %v1116_v18 = vld [vmem:[%s4509_s15 + $0x17e0] sm:$0xff]  ;;  %v1115_v19 = vld [vmem:[%s4509_s15 + $0x17d8] sm:$0xff] }
 0x40b   : > { %3320 = vmatpush.xpose.msra.mxu0 %v1208_v20  ;;  %3360 = vmatpush.xpose.msra.mxu2 %v1210_v21  ;;  %v1117_v20 = vld [vmem:[%s4509_s15 + $0x17e8] sm:$0xff]  ;;  %v1016_v21 = vld [vmem:[%s4509_s15 + $0x14c0] sm:$0xff] }
 0x40c   : > { %3340 = vmatpush.xpose.msra.mxu1 %v1209_v22  ;;  %3380 = vmatpush.xpose.msra.mxu3 %v1211_v23  ;;  %v1018_v22 = vld [vmem:[%s4509_s15 + $0x14d0] sm:$0xff]  ;;  %v1017_v23 = vld [vmem:[%s4509_s15 + $0x14c8] sm:$0xff] }
 0x40f   : > { %3321 = vmatpush.xpose.msra.mxu0 %v1110_v24  ;;  %3361 = vmatpush.xpose.msra.mxu2 %v1112_v25  ;;  %v1019_v24 = vld [vmem:[%s4509_s15 + $0x14d8] sm:$0xff]  ;;  %v918_v25 = vld [vmem:[%s4509_s15 + $0x11b0] sm:$0xff] }
 0x410   : > { %3341 = vmatpush.xpose.msra.mxu1 %v1111_v26  ;;  %3381 = vmatpush.xpose.msra.mxu3 %v1113_v27  ;;  %v920_v26 = vld [vmem:[%s4509_s15 + $0x11c0] sm:$0xff]  ;;  %v919_v27 = vld [vmem:[%s4509_s15 + $0x11b8] sm:$0xff] }
 0x413   : > { %3322 = vmatpush.xpose.msra.mxu0 %v1012_v28  ;;  %3362 = vmatpush.xpose.msra.mxu2 %v1014_v29  ;;  %v921_v28 = vld [vmem:[%s4509_s15 + $0x11c8] sm:$0xff]  ;;  %v820_v29 = vld [vmem:[%s4509_s15 + $0xea0] sm:$0xff] }
 0x414   : > { %3342 = vmatpush.xpose.msra.mxu1 %v1013_v30  ;;  %3382 = vmatpush.xpose.msra.mxu3 %v1015_v31  ;;  %v822_v30 = vld [vmem:[%s4509_s15 + $0xeb0] sm:$0xff]  ;;  %v821_v31 = vld [vmem:[%s4509_s15 + $0xea8] sm:$0xff] }
 0x417   : > { %3323 = vmatpush.xpose.msra.mxu0 %v914_v32  ;;  %3363 = vmatpush.xpose.msra.mxu2 %v916_v33  ;;  %v823_v32 = vld [vmem:[%s4509_s15 + $0xeb8] sm:$0xff]  ;;  %v722_v33 = vld [vmem:[%s4509_s15 + $0xb90] sm:$0xff] }
 0x418   : > { %3343 = vmatpush.xpose.msra.mxu1 %v915_v34  ;;  %3383 = vmatpush.xpose.msra.mxu3 %v917_v35  ;;  %v724_v34 = vld [vmem:[%s4509_s15 + $0xba0] sm:$0xff]  ;;  %v723_v35 = vld [vmem:[%s4509_s15 + $0xb98] sm:$0xff] }
 0x41b   : > { %3324 = vmatpush.xpose.msra.mxu0 %v816_v36  ;;  %3364 = vmatpush.xpose.msra.mxu2 %v818_v37  ;;  %v725_v36 = vld [vmem:[%s4509_s15 + $0xba8] sm:$0xff]  ;;  %v624_v37 = vld [vmem:[%s4509_s15 + $0x880] sm:$0xff] }
 0x41c   : > { %3344 = vmatpush.xpose.msra.mxu1 %v817_v38  ;;  %3384 = vmatpush.xpose.msra.mxu3 %v819_v39  ;;  %v626_v38 = vld [vmem:[%s4509_s15 + $0x890] sm:$0xff]  ;;  %v625_v39 = vld [vmem:[%s4509_s15 + $0x888] sm:$0xff] }
 0x41f   : > { %3325 = vmatpush.xpose.msra.mxu0 %v718_v40  ;;  %3365 = vmatpush.xpose.msra.mxu2 %v720_v41  ;;  %v627_v40 = vld [vmem:[%s4509_s15 + $0x898] sm:$0xff]  ;;  %v526_v41 = vld [vmem:[%s4509_s15 + $0x570] sm:$0xff] }
 0x420   : > { %3345 = vmatpush.xpose.msra.mxu1 %v719_v42  ;;  %3385 = vmatpush.xpose.msra.mxu3 %v721_v43  ;;  %v528_v42 = vld [vmem:[%s4509_s15 + $0x580] sm:$0xff]  ;;  %v527_v43 = vld [vmem:[%s4509_s15 + $0x578] sm:$0xff] }
 0x423   : > { %3326 = vmatpush.xpose.msra.mxu0 %v620_v44  ;;  %3366 = vmatpush.xpose.msra.mxu2 %v622_v45  ;;  %v529_v44 = vld [vmem:[%s4509_s15 + $0x588] sm:$0xff]  ;;  %v428_v45 = vld [vmem:[%s4509_s15 + $0x260] sm:$0xff] }
 0x424   : > { %3346 = vmatpush.xpose.msra.mxu1 %v621_v46  ;;  %3386 = vmatpush.xpose.msra.mxu3 %v623_v47  ;;  %v430_v46 = vld [vmem:[%s4509_s15 + $0x270] sm:$0xff]  ;;  %v1608_v47 = vld [vmem:[%s4509_s15 + $0x2740] sm:$0xf] }
 0x427   : > { %3327 = vmatpush.xpose.msra.mxu0 %v522_v48  ;;  %3367 = vmatpush.xpose.msra.mxu2 %v524_v49  ;;  %v1610_v48 = vld [vmem:[%s4509_s15 + $0x2750] sm:$0xf]  ;;  %v429_v49 = vld [vmem:[%s4509_s15 + $0x268] sm:$0xff] }
 0x428   : > { %3347 = vmatpush.xpose.msra.mxu1 %v523_v50  ;;  %3387 = vmatpush.xpose.msra.mxu3 %v525_v51  ;;  %v431_v50 = vld [vmem:[%s4509_s15 + $0x278] sm:$0xff] }
 0x429   : > { %v1748_v51 = vld.sshfl [vmem:[#allocation1 + $0x20] sm:$0xff pattern:$0x73625140] }
 0x42b   : > { %3328 = vmatpush.xpose.msra.mxu0 %v424_v52  ;;  %3368 = vmatpush.xpose.msra.mxu2 %v426_v53  ;;  %v1750_v52 = vld.sshfl [vmem:[#allocation1 + $0x30] sm:$0xff pattern:$0x73625140]  ;;  %v1609_v53 = vld [vmem:[%s4509_s15 + $0x2748] sm:$0xf] }
 0x42c   : > { %3348 = vmatpush.xpose.msra.mxu1 %v425_v56  ;;  %3388 = vmatpush.xpose.msra.mxu3 %v427_v57  ;;  %v1751_v56 = vld.sshfl [vmem:[#allocation1 + $0x38] sm:$0xff pattern:$0x73625140] }
 0x42d   : > { %v1510_v57 = vld [vmem:[%s4509_s15 + $0x2430] sm:$0xff] }
 0x42e   : > { %3329 = vmatmul.f32.vlgmr.msra.gmra.mxu0 %v1744_v58  ;;  %3369 = vmatmul.f32.vlgmr.msra.gmra.mxu2 %v1746_v59  ;;  %v1512_v58 = vld [vmem:[%s4509_s15 + $0x2440] sm:$0xff]  ;;  %v1511_v59 = vld [vmem:[%s4509_s15 + $0x2438] sm:$0xff] }
 0x42f   : > { %3396 = vmatpush.xpose.msrb.mxu0 %v1604_v54  ;;  %3436 = vmatpush.xpose.msrb.mxu2 %v1606_v55  ;;  %v1611_v54 = vld [vmem:[%s4509_s15 + $0x2758] sm:$0xf] }
 0x430   : > { %3416 = vmatpush.xpose.msrb.mxu1 %v1605_v60  ;;  %3456 = vmatpush.xpose.msrb.mxu3 %v1607_v61  ;;  %v1749_v55 = vld.sshfl [vmem:[#allocation1 + $0x28] sm:$0xff pattern:$0x73625140] }
 0x431   : > { %3349 = vmatmul.f32.vlgmr.msra.gmra.mxu1 %v1745_v62  ;;  %3389 = vmatmul.f32.vlgmr.msra.gmra.mxu3 %v1747_v63  ;;  %v1513_v60 = vld [vmem:[%s4509_s15 + $0x2448] sm:$0xff]  ;;  %v1412_v61 = vld [vmem:[%s4509_s15 + $0x2120] sm:$0xff]  ;;  %v1414_v62 = vld [vmem:[%s4509_s15 + $0x2130] sm:$0xff] }
 0x432   : > { %v1413_v63 = vld [vmem:[%s4509_s15 + $0x2128] sm:$0xff] }
 0x433   : > { %3397 = vmatpush.xpose.msrb.mxu0 %v1506_v0  ;;  %3437 = vmatpush.xpose.msrb.mxu2 %v1508_v1  ;;  %v1415_v0 = vld [vmem:[%s4509_s15 + $0x2138] sm:$0xff]  ;;  %v1314_v1 = vld [vmem:[%s4509_s15 + $0x1e10] sm:$0xff] }
 0x434   : > { %3417 = vmatpush.xpose.msrb.mxu1 %v1507_v2  ;;  %3457 = vmatpush.xpose.msrb.mxu3 %v1509_v3  ;;  %v1316_v2 = vld [vmem:[%s4509_s15 + $0x1e20] sm:$0xff]  ;;  %v347_v3 = vld [vmem:[%s4502_s24 + $0xa0] sm:$0xff] }
 0x435   : > { %1752 = vst [vmem:[#allocation1] ss:$4 sm:$0xff] %v347_v3  ;;  %v1122_v3 = vld [vmem:[%s4509_s15 + $0x1810] sm:$0xff] }
 0x437   : > { %3398 = vmatpush.xpose.msrb.mxu0 %v1408_v4  ;;  %3438 = vmatpush.xpose.msrb.mxu2 %v1410_v5  ;;  %v1315_v4 = vld [vmem:[%s4509_s15 + $0x1e18] sm:$0xff]  ;;  %v1317_v5 = vld [vmem:[%s4509_s15 + $0x1e28] sm:$0xff] }
 0x438   : > { %3418 = vmatpush.xpose.msrb.mxu1 %v1409_v6  ;;  %3458 = vmatpush.xpose.msrb.mxu3 %v1411_v7  ;;  %v1216_v6 = vld [vmem:[%s4509_s15 + $0x1b00] sm:$0xff]  ;;  %v1218_v7 = vld [vmem:[%s4509_s15 + $0x1b10] sm:$0xff] }
 0x43b   : > { %3399 = vmatpush.xpose.msrb.mxu0 %v1310_v8  ;;  %3439 = vmatpush.xpose.msrb.mxu2 %v1312_v9  ;;  %v1217_v8 = vld [vmem:[%s4509_s15 + $0x1b08] sm:$0xff]  ;;  %v1219_v9 = vld [vmem:[%s4509_s15 + $0x1b18] sm:$0xff] }
 0x43c   : > { %3419 = vmatpush.xpose.msrb.mxu1 %v1311_v11  ;;  %3459 = vmatpush.xpose.msrb.mxu3 %v1313_v12  ;;  %v1120_v11 = vld [vmem:[%s4509_s15 + $0x1800] sm:$0xff]  ;;  %v1119_v12 = vld [vmem:[%s4509_s15 + $0x17f8] sm:$0xff] }
 0x43f   : > { %3400 = vmatpush.xpose.msrb.mxu0 %v1212_v13  ;;  %3440 = vmatpush.xpose.msrb.mxu2 %v1214_v14  ;;  %v1121_v13 = vld [vmem:[%s4509_s15 + $0x1808] sm:$0xff]  ;;  %v1020_v14 = vld [vmem:[%s4509_s15 + $0x14e0] sm:$0xff] }
 0x440   : > { %3420 = vmatpush.xpose.msrb.mxu1 %v1213_v15  ;;  %3460 = vmatpush.xpose.msrb.mxu3 %v1215_v16  ;;  %v1022_v15 = vld [vmem:[%s4509_s15 + $0x14f0] sm:$0xff]  ;;  %v1021_v16 = vld [vmem:[%s4509_s15 + $0x14e8] sm:$0xff] }
 0x443   : > { %3401 = vmatpush.xpose.msrb.mxu0 %v1114_v17  ;;  %3441 = vmatpush.xpose.msrb.mxu2 %v1116_v18  ;;  %v1023_v17 = vld [vmem:[%s4509_s15 + $0x14f8] sm:$0xff]  ;;  %v922_v18 = vld [vmem:[%s4509_s15 + $0x11d0] sm:$0xff] }
 0x444   : > { %3421 = vmatpush.xpose.msrb.mxu1 %v1115_v19  ;;  %3461 = vmatpush.xpose.msrb.mxu3 %v1117_v20  ;;  %v924_v19 = vld [vmem:[%s4509_s15 + $0x11e0] sm:$0xff]  ;;  %v923_v20 = vld [vmem:[%s4509_s15 + $0x11d8] sm:$0xff] }
 0x447   : > { %3402 = vmatpush.xpose.msrb.mxu0 %v1016_v21  ;;  %3442 = vmatpush.xpose.msrb.mxu2 %v1018_v22  ;;  %v925_v21 = vld [vmem:[%s4509_s15 + $0x11e8] sm:$0xff]  ;;  %v824_v22 = vld [vmem:[%s4509_s15 + $0xec0] sm:$0xff] }
 0x448   : > { %3422 = vmatpush.xpose.msrb.mxu1 %v1017_v23  ;;  %3462 = vmatpush.xpose.msrb.mxu3 %v1019_v24  ;;  %v826_v23 = vld [vmem:[%s4509_s15 + $0xed0] sm:$0xff]  ;;  %v825_v24 = vld [vmem:[%s4509_s15 + $0xec8] sm:$0xff] }
 0x44b   : > { %3403 = vmatpush.xpose.msrb.mxu0 %v918_v25  ;;  %3443 = vmatpush.xpose.msrb.mxu2 %v920_v26  ;;  %v827_v25 = vld [vmem:[%s4509_s15 + $0xed8] sm:$0xff]  ;;  %v726_v26 = vld [vmem:[%s4509_s15 + $0xbb0] sm:$0xff] }
 0x44c   : > { %3423 = vmatpush.xpose.msrb.mxu1 %v919_v27  ;;  %3463 = vmatpush.xpose.msrb.mxu3 %v921_v28  ;;  %v728_v27 = vld [vmem:[%s4509_s15 + $0xbc0] sm:$0xff]  ;;  %v727_v28 = vld [vmem:[%s4509_s15 + $0xbb8] sm:$0xff] }
 0x44f   : > { %3404 = vmatpush.xpose.msrb.mxu0 %v820_v29  ;;  %3444 = vmatpush.xpose.msrb.mxu2 %v822_v30  ;;  %v729_v29 = vld [vmem:[%s4509_s15 + $0xbc8] sm:$0xff]  ;;  %v628_v30 = vld [vmem:[%s4509_s15 + $0x8a0] sm:$0xff] }
 0x450   : > { %3424 = vmatpush.xpose.msrb.mxu1 %v821_v31  ;;  %3464 = vmatpush.xpose.msrb.mxu3 %v823_v32  ;;  %v630_v31 = vld [vmem:[%s4509_s15 + $0x8b0] sm:$0xff]  ;;  %v629_v32 = vld [vmem:[%s4509_s15 + $0x8a8] sm:$0xff] }
 0x453   : > { %3405 = vmatpush.xpose.msrb.mxu0 %v722_v33  ;;  %3445 = vmatpush.xpose.msrb.mxu2 %v724_v34  ;;  %v631_v33 = vld [vmem:[%s4509_s15 + $0x8b8] sm:$0xff]  ;;  %v530_v34 = vld [vmem:[%s4509_s15 + $0x590] sm:$0xff] }
 0x454   : > { %3425 = vmatpush.xpose.msrb.mxu1 %v723_v35  ;;  %3465 = vmatpush.xpose.msrb.mxu3 %v725_v36  ;;  %v532_v35 = vld [vmem:[%s4509_s15 + $0x5a0] sm:$0xff]  ;;  %v531_v36 = vld [vmem:[%s4509_s15 + $0x598] sm:$0xff] }
 0x457   : > { %3406 = vmatpush.xpose.msrb.mxu0 %v624_v37  ;;  %3446 = vmatpush.xpose.msrb.mxu2 %v626_v38  ;;  %v533_v37 = vld [vmem:[%s4509_s15 + $0x5a8] sm:$0xff]  ;;  %v432_v38 = vld [vmem:[%s4509_s15 + $0x280] sm:$0xff] }
 0x458   : > { %3426 = vmatpush.xpose.msrb.mxu1 %v625_v39  ;;  %3466 = vmatpush.xpose.msrb.mxu3 %v627_v40  ;;  %v434_v39 = vld [vmem:[%s4509_s15 + $0x290] sm:$0xff]  ;;  %v1612_v40 = vld [vmem:[%s4509_s15 + $0x2760] sm:$0xf] }
 0x45b   : > { %3407 = vmatpush.xpose.msrb.mxu0 %v526_v41  ;;  %3447 = vmatpush.xpose.msrb.mxu2 %v528_v42  ;;  %v1614_v41 = vld [vmem:[%s4509_s15 + $0x2770] sm:$0xf]  ;;  %v433_v42 = vld [vmem:[%s4509_s15 + $0x288] sm:$0xff] }
 0x45c   : > { %3427 = vmatpush.xpose.msrb.mxu1 %v527_v43  ;;  %3467 = vmatpush.xpose.msrb.mxu3 %v529_v44  ;;  %v435_v43 = vld [vmem:[%s4509_s15 + $0x298] sm:$0xff] }
 0x45d   : > { %v1754_v44 = vld.sshfl [vmem:[#allocation1] sm:$0xff pattern:$0x73625140] }
 0x45f   : > { %3408 = vmatpush.xpose.msrb.mxu0 %v428_v45  ;;  %3448 = vmatpush.xpose.msrb.mxu2 %v430_v46  ;;  %v1756_v45 = vld.sshfl [vmem:[#allocation1 + $0x10] sm:$0xff pattern:$0x73625140]  ;;  %v1613_v46 = vld [vmem:[%s4509_s15 + $0x2768] sm:$0xf] }
 0x460   : > { %3428 = vmatpush.xpose.msrb.mxu1 %v429_v49  ;;  %3468 = vmatpush.xpose.msrb.mxu3 %v431_v50  ;;  %v1757_v49 = vld.sshfl [vmem:[#allocation1 + $0x18] sm:$0xff pattern:$0x73625140] }
 0x461   : > { %v1514_v50 = vld [vmem:[%s4509_s15 + $0x2450] sm:$0xff] }
 0x462   : > { %3409 = vmatmul.f32.vlgmr.msrb.gmra.mxu0 %v1748_v51  ;;  %3449 = vmatmul.f32.vlgmr.msrb.gmra.mxu2 %v1750_v52  ;;  %v1516_v51 = vld [vmem:[%s4509_s15 + $0x2460] sm:$0xff]  ;;  %v1515_v52 = vld [vmem:[%s4509_s15 + $0x2458] sm:$0xff] }
 0x463   : > { %3476 = vmatpush.xpose.msra.mxu0 %v1608_v47  ;;  %3516 = vmatpush.xpose.msra.mxu2 %v1610_v48  ;;  %v1615_v47 = vld [vmem:[%s4509_s15 + $0x2778] sm:$0xf] }
 0x464   : > { %3496 = vmatpush.xpose.msra.mxu1 %v1609_v53  ;;  %3536 = vmatpush.xpose.msra.mxu3 %v1611_v54  ;;  %v1755_v48 = vld.sshfl [vmem:[#allocation1 + $0x8] sm:$0xff pattern:$0x73625140] }
 0x465   : > { %3429 = vmatmul.f32.vlgmr.msrb.gmra.mxu1 %v1749_v55  ;;  %3469 = vmatmul.f32.vlgmr.msrb.gmra.mxu3 %v1751_v56  ;;  %v1517_v53 = vld [vmem:[%s4509_s15 + $0x2468] sm:$0xff]  ;;  %v1416_v54 = vld [vmem:[%s4509_s15 + $0x2140] sm:$0xff]  ;;  %v1418_v55 = vld [vmem:[%s4509_s15 + $0x2150] sm:$0xff] }
 0x466   : > { %v1417_v56 = vld [vmem:[%s4509_s15 + $0x2148] sm:$0xff] }
 0x467   : > { %3477 = vmatpush.xpose.msra.mxu0 %v1510_v57  ;;  %3517 = vmatpush.xpose.msra.mxu2 %v1512_v58  ;;  %v1419_v57 = vld [vmem:[%s4509_s15 + $0x2158] sm:$0xff]  ;;  %v1318_v58 = vld [vmem:[%s4509_s15 + $0x1e30] sm:$0xff] }
 0x468   : > { %3497 = vmatpush.xpose.msra.mxu1 %v1511_v59  ;;  %3537 = vmatpush.xpose.msra.mxu3 %v1513_v60  ;;  %v1320_v59 = vld [vmem:[%s4509_s15 + $0x1e40] sm:$0xff] }
 0x469   : > { %v348_v60 = vld [vmem:[%s4502_s24 + $0xa8] sm:$0xff] }
 0x46a   : > { %1753 = vst [vmem:[#allocation1 + $0x20] ss:$4 sm:$0xff] %v348_v60  ;;  %v1422_v60 = vld [vmem:[%s4509_s15 + $0x2170] sm:$0xff] }
 0x46b   : > { %3478 = vmatpush.xpose.msra.mxu0 %v1412_v61  ;;  %3518 = vmatpush.xpose.msra.mxu2 %v1414_v62  ;;  %v1319_v61 = vld [vmem:[%s4509_s15 + $0x1e38] sm:$0xff]  ;;  %v1321_v62 = vld [vmem:[%s4509_s15 + $0x1e48] sm:$0xff] }
 0x46c   : > { %3498 = vmatpush.xpose.msra.mxu1 %v1413_v63  ;;  %3538 = vmatpush.xpose.msra.mxu3 %v1415_v0  ;;  %v1220_v63 = vld [vmem:[%s4509_s15 + $0x1b20] sm:$0xff]  ;;  %v1222_v0 = vld [vmem:[%s4509_s15 + $0x1b30] sm:$0xff] }
 0x46f   : > { %3479 = vmatpush.xpose.msra.mxu0 %v1314_v1  ;;  %3519 = vmatpush.xpose.msra.mxu2 %v1316_v2  ;;  %v1221_v1 = vld [vmem:[%s4509_s15 + $0x1b28] sm:$0xff]  ;;  %v1223_v2 = vld [vmem:[%s4509_s15 + $0x1b38] sm:$0xff] }
 0x470   : > { %3499 = vmatpush.xpose.msra.mxu1 %v1315_v4  ;;  %3539 = vmatpush.xpose.msra.mxu3 %v1317_v5  ;;  %v1124_v4 = vld [vmem:[%s4509_s15 + $0x1820] sm:$0xff]  ;;  %v1123_v5 = vld [vmem:[%s4509_s15 + $0x1818] sm:$0xff] }
 0x473   : > { %3480 = vmatpush.xpose.msra.mxu0 %v1216_v6  ;;  %3520 = vmatpush.xpose.msra.mxu2 %v1218_v7  ;;  %v1125_v6 = vld [vmem:[%s4509_s15 + $0x1828] sm:$0xff]  ;;  %v1024_v7 = vld [vmem:[%s4509_s15 + $0x1500] sm:$0xff] }
 0x474   : > { %3500 = vmatpush.xpose.msra.mxu1 %v1217_v8  ;;  %3540 = vmatpush.xpose.msra.mxu3 %v1219_v9  ;;  %v1026_v8 = vld [vmem:[%s4509_s15 + $0x1510] sm:$0xff]  ;;  %v1025_v9 = vld [vmem:[%s4509_s15 + $0x1508] sm:$0xff] }
 0x477   : > { %3481 = vmatpush.xpose.msra.mxu0 %v1118_v10  ;;  %3521 = vmatpush.xpose.msra.mxu2 %v1120_v11  ;;  %v1027_v10 = vld [vmem:[%s4509_s15 + $0x1518] sm:$0xff]  ;;  %v926_v11 = vld [vmem:[%s4509_s15 + $0x11f0] sm:$0xff] }
 0x478   : > { %3501 = vmatpush.xpose.msra.mxu1 %v1119_v12  ;;  %3541 = vmatpush.xpose.msra.mxu3 %v1121_v13  ;;  %v928_v12 = vld [vmem:[%s4509_s15 + $0x1200] sm:$0xff]  ;;  %v927_v13 = vld [vmem:[%s4509_s15 + $0x11f8] sm:$0xff] }
 0x47b   : > { %3482 = vmatpush.xpose.msra.mxu0 %v1020_v14  ;;  %3522 = vmatpush.xpose.msra.mxu2 %v1022_v15  ;;  %v929_v14 = vld [vmem:[%s4509_s15 + $0x1208] sm:$0xff]  ;;  %v828_v15 = vld [vmem:[%s4509_s15 + $0xee0] sm:$0xff] }
 0x47c   : > { %3502 = vmatpush.xpose.msra.mxu1 %v1021_v16  ;;  %3542 = vmatpush.xpose.msra.mxu3 %v1023_v17  ;;  %v830_v16 = vld [vmem:[%s4509_s15 + $0xef0] sm:$0xff]  ;;  %v829_v17 = vld [vmem:[%s4509_s15 + $0xee8] sm:$0xff] }
 0x47f   : > { %3483 = vmatpush.xpose.msra.mxu0 %v922_v18  ;;  %3523 = vmatpush.xpose.msra.mxu2 %v924_v19  ;;  %v831_v18 = vld [vmem:[%s4509_s15 + $0xef8] sm:$0xff]  ;;  %v730_v19 = vld [vmem:[%s4509_s15 + $0xbd0] sm:$0xff] }
 0x480   : > { %3503 = vmatpush.xpose.msra.mxu1 %v923_v20  ;;  %3543 = vmatpush.xpose.msra.mxu3 %v925_v21  ;;  %v732_v20 = vld [vmem:[%s4509_s15 + $0xbe0] sm:$0xff]  ;;  %v1910_v21 = vpop.f32.mrf.mxu1 }
 0x483   : > { %3484 = vmatpush.xpose.msra.mxu0 %v824_v22  ;;  %3524 = vmatpush.xpose.msra.mxu2 %v826_v23  ;;  %v731_v22 = vld [vmem:[%s4509_s15 + $0xbd8] sm:$0xff]  ;;  %v733_v23 = vld [vmem:[%s4509_s15 + $0xbe8] sm:$0xff] }
 0x484   : > { %3504 = vmatpush.xpose.msra.mxu1 %v825_v24  ;;  %3544 = vmatpush.xpose.msra.mxu3 %v827_v25  ;;  %v1890_v24 = vpop.f32.mrf.mxu0 }
 0x485   : > { %v1911_v25 = vadd.f32 %v1910_v21, %v1890_v24 }
 0x487   : > { %3485 = vmatpush.xpose.msra.mxu0 %v726_v26  ;;  %3525 = vmatpush.xpose.msra.mxu2 %v728_v27  ;;  %v632_v26 = vld [vmem:[%s4509_s15 + $0x8c0] sm:$0xff]  ;;  %v634_v27 = vld [vmem:[%s4509_s15 + $0x8d0] sm:$0xff] }
 0x488   : > { %3505 = vmatpush.xpose.msra.mxu1 %v727_v28  ;;  %3545 = vmatpush.xpose.msra.mxu3 %v729_v29  ;;  %v1930_v28 = vpop.f32.mrf.mxu2  ;;  %v633_v29 = vld [vmem:[%s4509_s15 + $0x8c8] sm:$0xff] }
 0x48b   : > { %3486 = vmatpush.xpose.msra.mxu0 %v628_v30  ;;  %3526 = vmatpush.xpose.msra.mxu2 %v630_v31  ;;  %v635_v30 = vld [vmem:[%s4509_s15 + $0x8d8] sm:$0xff]  ;;  %v1931_v31 = vadd.f32 %v1930_v28, %v1911_v25 }
 0x48c   : > { %3506 = vmatpush.xpose.msra.mxu1 %v629_v32  ;;  %3546 = vmatpush.xpose.msra.mxu3 %v631_v33  ;;  %v534_v32 = vld [vmem:[%s4509_s15 + $0x5b0] sm:$0xff]  ;;  %v536_v33 = vld [vmem:[%s4509_s15 + $0x5c0] sm:$0xff] }
 0x48f   : > { %3487 = vmatpush.xpose.msra.mxu0 %v530_v34  ;;  %3527 = vmatpush.xpose.msra.mxu2 %v532_v35  ;;  %v1950_v34 = vpop.f32.mrf.mxu3  ;;  %v535_v35 = vld [vmem:[%s4509_s15 + $0x5b8] sm:$0xff] }
 0x490   : > { %3507 = vmatpush.xpose.msra.mxu1 %v531_v36  ;;  %3547 = vmatpush.xpose.msra.mxu3 %v533_v37  ;;  %v537_v36 = vld [vmem:[%s4509_s15 + $0x5c8] sm:$0xff]  ;;  %v1951_v37 = vadd.f32 %v1950_v34, %v1931_v31 }
 0x493   : > { %3488 = vmatpush.xpose.msra.mxu0 %v432_v38  ;;  %3528 = vmatpush.xpose.msra.mxu2 %v434_v39  ;;  %v436_v38 = vld [vmem:[%s4509_s15 + $0x2a0] sm:$0xff]  ;;  %v438_v39 = vld [vmem:[%s4509_s15 + $0x2b0] sm:$0xff] }
 0x494   : > { %3508 = vmatpush.xpose.msra.mxu1 %v433_v42  ;;  %3548 = vmatpush.xpose.msra.mxu3 %v435_v43  ;;  %v1618_v42 = vld [vmem:[%s4509_s15 + $0x2790] sm:$0xf]  ;;  %v437_v43 = vld [vmem:[%s4509_s15 + $0x2a8] sm:$0xff] }
 0x496   : > { %3489 = vmatmul.f32.vlgmr.msra.gmra.mxu0 %v1754_v44  ;;  %3529 = vmatmul.f32.vlgmr.msra.gmra.mxu2 %v1756_v45  ;;  %v439_v44 = vld [vmem:[%s4509_s15 + $0x2b8] sm:$0xff] }
 0x497   : > { %3556 = vmatpush.xpose.msrb.mxu0 %v1612_v40  ;;  %3596 = vmatpush.xpose.msrb.mxu2 %v1614_v41  ;;  %v1970_v40 = vpop.f32.mrf.mxu0  ;;  %v1616_v41 = vld [vmem:[%s4509_s15 + $0x2780] sm:$0xf] }
 0x498   : > { %3576 = vmatpush.xpose.msrb.mxu1 %v1613_v46  ;;  %3616 = vmatpush.xpose.msrb.mxu3 %v1615_v47  ;;  %v1758_v45 = vld.sshfl [vmem:[#allocation1 + $0x20] sm:$0xff pattern:$0x73625140]  ;;  %v1760_v46 = vld.sshfl [vmem:[#allocation1 + $0x30] sm:$0xff pattern:$0x73625140]  ;;  %v1971_v47 = vadd.f32 %v1970_v40, %v1951_v37 }
 0x499   : > { %3509 = vmatmul.f32.vlgmr.msra.gmra.mxu1 %v1755_v48  ;;  %3549 = vmatmul.f32.vlgmr.msra.gmra.mxu3 %v1757_v49  ;;  %v1617_v48 = vld [vmem:[%s4509_s15 + $0x2788] sm:$0xf]  ;;  %v1619_v49 = vld [vmem:[%s4509_s15 + $0x2798] sm:$0xf]  ;;  %v834_v37 = vld [vmem:[%s4509_s15 + $0xf10] sm:$0xff] }
 0x49a   : > { %v835_v40 = vld [vmem:[%s4509_s15 + $0xf18] sm:$0xff] }
 0x49b   : > { %3557 = vmatpush.xpose.msrb.mxu0 %v1514_v50  ;;  %3597 = vmatpush.xpose.msrb.mxu2 %v1516_v51  ;;  %v1990_v50 = vpop.f32.mrf.mxu1  ;;  %v1759_v51 = vld.sshfl [vmem:[#allocation1 + $0x28] sm:$0xff pattern:$0x73625140] }
 0x49c   : > { %3577 = vmatpush.xpose.msrb.mxu1 %v1515_v52  ;;  %3617 = vmatpush.xpose.msrb.mxu3 %v1517_v53  ;;  %v1761_v52 = vld.sshfl [vmem:[#allocation1 + $0x38] sm:$0xff pattern:$0x73625140] }
 0x49d   : > { %v1518_v53 = vld [vmem:[%s4509_s15 + $0x2470] sm:$0xff] }
 0x49f   : > { %3558 = vmatpush.xpose.msrb.mxu0 %v1416_v54  ;;  %3598 = vmatpush.xpose.msrb.mxu2 %v1418_v55  ;;  %v1520_v54 = vld [vmem:[%s4509_s15 + $0x2480] sm:$0xff]  ;;  %v1991_v55 = vadd.f32 %v1990_v50, %v1971_v47  ;;  %v737_v47 = vld [vmem:[%s4509_s15 + $0xc08] sm:$0xff]  ;;  %v638_v50 = vld [vmem:[%s4509_s15 + $0x8f0] sm:$0xff] }
 0x4a0   : > { %3578 = vmatpush.xpose.msrb.mxu1 %v1417_v56  ;;  %3618 = vmatpush.xpose.msrb.mxu3 %v1419_v57  ;;  %v1519_v56 = vld [vmem:[%s4509_s15 + $0x2478] sm:$0xff]  ;;  %v1521_v57 = vld [vmem:[%s4509_s15 + $0x2488] sm:$0xff] }
 0x4a3   : > { %3559 = vmatpush.xpose.msrb.mxu0 %v1318_v58  ;;  %3599 = vmatpush.xpose.msrb.mxu2 %v1320_v59  ;;  %v2010_v58 = vpop.f32.mrf.mxu2  ;;  %v1420_v59 = vld [vmem:[%s4509_s15 + $0x2160] sm:$0xff] }
 0x4a4   : > { %3579 = vmatpush.xpose.msrb.mxu1 %v1319_v61  ;;  %3619 = vmatpush.xpose.msrb.mxu3 %v1321_v62  ;;  %v2011_v61 = vadd.f32 %v2010_v58, %v1991_v55  ;;  %v1421_v62 = vld [vmem:[%s4509_s15 + $0x2168] sm:$0xff] }
 0x4a7   : > { %3560 = vmatpush.xpose.msrb.mxu0 %v1220_v63  ;;  %3600 = vmatpush.xpose.msrb.mxu2 %v1222_v0  ;;  %v1423_v63 = vld [vmem:[%s4509_s15 + $0x2178] sm:$0xff]  ;;  %v2030_v0 = vpop.f32.mrf.mxu3 }
 0x4a8   : > { %3580 = vmatpush.xpose.msrb.mxu1 %v1221_v1  ;;  %3620 = vmatpush.xpose.msrb.mxu3 %v1223_v2  ;;  %v1322_v1 = vld [vmem:[%s4509_s15 + $0x1e50] sm:$0xff]  ;;  %v1324_v2 = vld [vmem:[%s4509_s15 + $0x1e60] sm:$0xff] }
 0x4ab   : > { %3561 = vmatpush.xpose.msrb.mxu0 %v1122_v3  ;;  %3601 = vmatpush.xpose.msrb.mxu2 %v1124_v4  ;;  %v2050_v3 = vpop.f32.mrf.mxu0  ;;  %v349_v4 = vld [vmem:[%s4502_s24 + $0xb0] sm:$0xff] }
 0x4ac   : > { %3581 = vmatpush.xpose.msrb.mxu1 %v1123_v5  ;;  %3621 = vmatpush.xpose.msrb.mxu3 %v1125_v6  ;;  %v2031_v5 = vadd.f32 %v2030_v0, %v2011_v61  ;;  %v1323_v6 = vld [vmem:[%s4509_s15 + $0x1e58] sm:$0xff]  ;;  %1762 = vst [vmem:[#allocation1] ss:$4 sm:$0xff] %v349_v4  ;;  %v441_v4 = vld [vmem:[%s4509_s15 + $0x2c8] sm:$0xff] }
 0x4af   : > { %3562 = vmatpush.xpose.msrb.mxu0 %v1024_v7  ;;  %3602 = vmatpush.xpose.msrb.mxu2 %v1026_v8  ;;  %v1325_v7 = vld [vmem:[%s4509_s15 + $0x1e68] sm:$0xff]  ;;  %v2051_v8 = vadd.f32 %v2050_v3, %v2031_v5  ;;  %v2110_v21 = vpop.f32.mrf.mxu3  ;;  %v443_v5 = vld [vmem:[%s4509_s15 + $0x2d8] sm:$0xff] }
 0x4b0   : > { %3582 = vmatpush.xpose.msrb.mxu1 %v1025_v9  ;;  %3622 = vmatpush.xpose.msrb.mxu3 %v1027_v10  ;;  %v1224_v9 = vld [vmem:[%s4509_s15 + $0x1b40] sm:$0xff]  ;;  %v1226_v10 = vld [vmem:[%s4509_s15 + $0x1b50] sm:$0xff] }
 0x4b3   : > { %3563 = vmatpush.xpose.msrb.mxu0 %v926_v11  ;;  %3603 = vmatpush.xpose.msrb.mxu2 %v928_v12  ;;  %v2070_v11 = vpop.f32.mrf.mxu1  ;;  %v1225_v12 = vld [vmem:[%s4509_s15 + $0x1b48] sm:$0xff]  ;;  %v2130_v24 = vpop.f32.mrf.mxu0 }
 0x4b4   : > { %3583 = vmatpush.xpose.msrb.mxu1 %v927_v13  ;;  %3623 = vmatpush.xpose.msrb.mxu3 %v929_v14  ;;  %v1227_v13 = vld [vmem:[%s4509_s15 + $0x1b58] sm:$0xff]  ;;  %v2090_v14 = vpop.f32.mrf.mxu2 }
 0x4b7   : > { %3564 = vmatpush.xpose.msrb.mxu0 %v828_v15  ;;  %3604 = vmatpush.xpose.msrb.mxu2 %v830_v16  ;;  %v2071_v15 = vadd.f32 %v2070_v11, %v2051_v8  ;;  %v1126_v16 = vld [vmem:[%s4509_s15 + $0x1830] sm:$0xff] }
 0x4b8   : > { %3584 = vmatpush.xpose.msrb.mxu1 %v829_v17  ;;  %3624 = vmatpush.xpose.msrb.mxu3 %v831_v18  ;;  %v1128_v17 = vld [vmem:[%s4509_s15 + $0x1840] sm:$0xff] }
 0x4b9   : > { %v2091_v18 = vadd.f32 %v2090_v14, %v2071_v15  ;;  %v1522_v14 = vld [vmem:[%s4509_s15 + $0x2490] sm:$0xff]  ;;  %v1524_v15 = vld [vmem:[%s4509_s15 + $0x24a0] sm:$0xff] }
 0x4bb   : > { %3565 = vmatpush.xpose.msrb.mxu0 %v730_v19  ;;  %3605 = vmatpush.xpose.msrb.mxu2 %v732_v20  ;;  %v1127_v19 = vld [vmem:[%s4509_s15 + $0x1838] sm:$0xff]  ;;  %v1129_v20 = vld [vmem:[%s4509_s15 + $0x1848] sm:$0xff]  ;;  %v2111_v25 = vadd.f32 %v2110_v21, %v2091_v18  ;;  %v2150_v31 = vpop.f32.mrf.mxu1  ;;  %v1424_v21 = vld [vmem:[%s4509_s15 + $0x2180] sm:$0xff] }
 0x4bc   : > { %3585 = vmatpush.xpose.msrb.mxu1 %v731_v22  ;;  %3625 = vmatpush.xpose.msrb.mxu3 %v733_v23  ;;  %v1028_v22 = vld [vmem:[%s4509_s15 + $0x1520] sm:$0xff]  ;;  %v1030_v23 = vld [vmem:[%s4509_s15 + $0x1530] sm:$0xff]  ;;  %v2170_v34 = vpop.f32.mrf.mxu2  ;;  %v1523_v18 = vld [vmem:[%s4509_s15 + $0x2498] sm:$0xff] }
 0x4bd   : > { %v2131_v28 = vadd.f32 %v2130_v24, %v2111_v25  ;;  %v1425_v24 = vld [vmem:[%s4509_s15 + $0x2188] sm:$0xff]  ;;  %v1427_v25 = vld [vmem:[%s4509_s15 + $0x2198] sm:$0xff] }
 0x4bf   : > { %3566 = vmatpush.xpose.msrb.mxu0 %v632_v26  ;;  %3606 = vmatpush.xpose.msrb.mxu2 %v634_v27  ;;  %v1029_v26 = vld [vmem:[%s4509_s15 + $0x1528] sm:$0xff]  ;;  %v1031_v27 = vld [vmem:[%s4509_s15 + $0x1538] sm:$0xff] }
 0x4c0   : > { %3586 = vmatpush.xpose.msrb.mxu1 %v633_v29  ;;  %3626 = vmatpush.xpose.msrb.mxu3 %v635_v30  ;;  %v930_v29 = vld [vmem:[%s4509_s15 + $0x1210] sm:$0xff]  ;;  %v932_v30 = vld [vmem:[%s4509_s15 + $0x1220] sm:$0xff] }
 0x4c3   : > { %3567 = vmatpush.xpose.msrb.mxu0 %v534_v32  ;;  %3607 = vmatpush.xpose.msrb.mxu2 %v536_v33  ;;  %v931_v32 = vld [vmem:[%s4509_s15 + $0x1218] sm:$0xff]  ;;  %v933_v33 = vld [vmem:[%s4509_s15 + $0x1228] sm:$0xff] }
 0x4c4   : > { %3587 = vmatpush.xpose.msrb.mxu1 %v535_v35  ;;  %3627 = vmatpush.xpose.msrb.mxu3 %v537_v36  ;;  %v2151_v35 = vadd.f32 %v2150_v31, %v2131_v28  ;;  %v832_v36 = vld [vmem:[%s4509_s15 + $0xf00] sm:$0xff]  ;;  %v1326_v28 = vld [vmem:[%s4509_s15 + $0x1e70] sm:$0xff] }
 0x4c7   : > { %3568 = vmatpush.xpose.msrb.mxu0 %v436_v38  ;;  %3608 = vmatpush.xpose.msrb.mxu2 %v438_v39  ;;  %v2171_v38 = vadd.f32 %v2170_v34, %v2151_v35  ;;  %v833_v39 = vld [vmem:[%s4509_s15 + $0xf08] sm:$0xff]  ;;  %v1228_v35 = vld [vmem:[%s4509_s15 + $0x1b60] sm:$0xff] }
 0x4c8   : > { %3588 = vmatpush.xpose.msrb.mxu1 %v437_v43  ;;  %3628 = vmatpush.xpose.msrb.mxu3 %v439_v44  ;;  %v736_v43 = vld [vmem:[%s4509_s15 + $0xc00] sm:$0xff]  ;;  %v2210_v44 = vpop.f32.mrf.mxu0 }
 0x4ca   : > { %3569 = vmatmul.f32.vlgmr.msrb.gmra.mxu0 %v1758_v45  ;;  %3609 = vmatmul.f32.vlgmr.msrb.gmra.mxu2 %v1760_v46  ;;  %v735_v46 = vld [vmem:[%s4509_s15 + $0xbf8] sm:$0xff] }
 0x4cb   : > { %3636 = vmatpush.xpose.msra.mxu0 %v1616_v41  ;;  %3676 = vmatpush.xpose.msra.mxu2 %v1618_v42  ;;  %v2190_v41 = vpop.f32.mrf.mxu3  ;;  %v734_v42 = vld [vmem:[%s4509_s15 + $0xbf0] sm:$0xff] }
 0x4cc   : > { %3656 = vmatpush.xpose.msra.mxu1 %v1617_v48  ;;  %3696 = vmatpush.xpose.msra.mxu3 %v1619_v49  ;;  %v2191_v45 = vadd.f32 %v2190_v41, %v2171_v38  ;;  %v636_v49 = vld [vmem:[%s4509_s15 + $0x8e0] sm:$0xff] }
 0x4cd   : > { %3589 = vmatmul.f32.vlgmr.msrb.gmra.mxu1 %v1759_v51  ;;  %3629 = vmatmul.f32.vlgmr.msrb.gmra.mxu3 %v1761_v52  ;;  %v2230_v51 = vpop.f32.mrf.mxu1  ;;  %v637_v52 = vld [vmem:[%s4509_s15 + $0x8e8] sm:$0xff] }
 0x4ce   : > { %v2211_v48 = vadd.f32 %v2210_v44, %v2191_v45  ;;  %v1131_v45 = vld [vmem:[%s4509_s15 + $0x1858] sm:$0xff] }
 0x4cf   : > { %3637 = vmatpush.xpose.msra.mxu0 %v1518_v53  ;;  %3677 = vmatpush.xpose.msra.mxu2 %v1520_v54  ;;  %v639_v53 = vld [vmem:[%s4509_s15 + $0x8f8] sm:$0xff]  ;;  %v2250_v54 = vpop.f32.mrf.mxu2 }
 0x4d0   : > { %3657 = vmatpush.xpose.msra.mxu1 %v1519_v56  ;;  %3697 = vmatpush.xpose.msra.mxu3 %v1521_v57  ;;  %v2231_v55 = vadd.f32 %v2230_v51, %v2211_v48  ;;  %v538_v56 = vld [vmem:[%s4509_s15 + $0x5d0] sm:$0xff]  ;;  %v540_v57 = vld [vmem:[%s4509_s15 + $0x5e0] sm:$0xff]  ;;  %v2290_v0 = vpop.f32.mrf.mxu0 }
 0x4d2   : > { %v2251_v58 = vadd.f32 %v2250_v54, %v2231_v55  ;;  %v934_v55 = vld [vmem:[%s4509_s15 + $0x1230] sm:$0xff] }
 0x4d3   : > { %3638 = vmatpush.xpose.msra.mxu0 %v1420_v59  ;;  %3678 = vmatpush.xpose.msra.mxu2 %v1422_v60  ;;  %v539_v59 = vld [vmem:[%s4509_s15 + $0x5d8] sm:$0xff]  ;;  %v541_v60 = vld [vmem:[%s4509_s15 + $0x5e8] sm:$0xff]  ;;  %v2270_v61 = vpop.f32.mrf.mxu3 }
 0x4d4   : > { %3658 = vmatpush.xpose.msra.mxu1 %v1421_v62  ;;  %3698 = vmatpush.xpose.msra.mxu3 %v1423_v63  ;;  %v440_v62 = vld [vmem:[%s4509_s15 + $0x2c0] sm:$0xff]  ;;  %v442_v63 = vld [vmem:[%s4509_s15 + $0x2d0] sm:$0xff]  ;;  %v2271_v3 = vadd.f32 %v2270_v61, %v2251_v58 }
 0x4d5   : > { %v2310_v11 = vpop.f32.mrf.mxu1 }
 0x4d6   : > { %v2291_v8 = vadd.f32 %v2290_v0, %v2271_v3 }
 0x4d7   : > { %3639 = vmatpush.xpose.msra.mxu0 %v1322_v1  ;;  %3679 = vmatpush.xpose.msra.mxu2 %v1324_v2  ;;  %v1620_v1 = vld [vmem:[%s4509_s15 + $0x27a0] sm:$0xf]  ;;  %v1622_v2 = vld [vmem:[%s4509_s15 + $0x27b0] sm:$0xf] }
 0x4d8   : > { %3659 = vmatpush.xpose.msra.mxu1 %v1323_v6  ;;  %3699 = vmatpush.xpose.msra.mxu3 %v1325_v7  ;;  %v1764_v6 = vld.sshfl [vmem:[#allocation1] sm:$0xff pattern:$0x73625140]  ;;  %v1766_v7 = vld.sshfl [vmem:[#allocation1 + $0x10] sm:$0xff pattern:$0x73625140] }
 0x4db   : > { %3640 = vmatpush.xpose.msra.mxu0 %v1224_v9  ;;  %3680 = vmatpush.xpose.msra.mxu2 %v1226_v10  ;;  %v1621_v9 = vld [vmem:[%s4509_s15 + $0x27a8] sm:$0xf]  ;;  %v1623_v10 = vld [vmem:[%s4509_s15 + $0x27b8] sm:$0xf] }
 0x4dc   : > { %3660 = vmatpush.xpose.msra.mxu1 %v1225_v12  ;;  %3700 = vmatpush.xpose.msra.mxu3 %v1227_v13  ;;  %v1765_v12 = vld.sshfl [vmem:[#allocation1 + $0x8] sm:$0xff pattern:$0x73625140]  ;;  %v1767_v13 = vld.sshfl [vmem:[#allocation1 + $0x18] sm:$0xff pattern:$0x73625140] }
 0x4dd   : > { %v2390_v34 = vpop.f32.mrf.mxu1 }
 0x4df   : > { %3641 = vmatpush.xpose.msra.mxu0 %v1126_v16  ;;  %3681 = vmatpush.xpose.msra.mxu2 %v1128_v17  ;;  %v2330_v16 = vpop.f32.mrf.mxu2  ;;  %v2311_v17 = vadd.f32 %v2310_v11, %v2291_v8  ;;  %v739_v8 = vld [vmem:[%s4509_s15 + $0xc18] sm:$0xff]  ;;  %v640_v11 = vld [vmem:[%s4509_s15 + $0x900] sm:$0xff] }
 0x4e0   : > { %3661 = vmatpush.xpose.msra.mxu1 %v1127_v19  ;;  %3701 = vmatpush.xpose.msra.mxu3 %v1129_v20  ;;  %v1525_v19 = vld [vmem:[%s4509_s15 + $0x24a8] sm:$0xff] }
 0x4e1   : > { %v2331_v20 = vadd.f32 %v2330_v16, %v2311_v17  ;;  %v643_v16 = vld [vmem:[%s4509_s15 + $0x918] sm:$0xff] }
 0x4e3   : > { %3642 = vmatpush.xpose.msra.mxu0 %v1028_v22  ;;  %3682 = vmatpush.xpose.msra.mxu2 %v1030_v23  ;;  %v1426_v22 = vld [vmem:[%s4509_s15 + $0x2190] sm:$0xff]  ;;  %v2350_v23 = vpop.f32.mrf.mxu3 }
 0x4e4   : > { %3662 = vmatpush.xpose.msra.mxu1 %v1029_v26  ;;  %3702 = vmatpush.xpose.msra.mxu3 %v1031_v27  ;;  %v2370_v26 = vpop.f32.mrf.mxu0  ;;  %v2351_v27 = vadd.f32 %v2350_v23, %v2331_v20 }
 0x4e5   : > { %v2470_v54 = vpop.f32.mrf.mxu1 }
 0x4e6   : > { %v2371_v31 = vadd.f32 %v2370_v26, %v2351_v27  ;;  %v446_v26 = vld [vmem:[%s4509_s15 + $0x2f0] sm:$0xff]  ;;  %v1624_v27 = vld [vmem:[%s4509_s15 + $0x27c0] sm:$0xf] }
 0x4e7   : > { %3643 = vmatpush.xpose.msra.mxu0 %v930_v29  ;;  %3683 = vmatpush.xpose.msra.mxu2 %v932_v30  ;;  %v1328_v29 = vld [vmem:[%s4509_s15 + $0x1e80] sm:$0xff] }
 0x4e8   : > { %3663 = vmatpush.xpose.msra.mxu1 %v931_v32  ;;  %3703 = vmatpush.xpose.msra.mxu3 %v933_v33  ;;  %v350_v30 = vld [vmem:[%s4502_s24 + $0xb8] sm:$0xff]  ;;  %v1327_v32 = vld [vmem:[%s4509_s15 + $0x1e78] sm:$0xff]  ;;  %v2391_v38 = vadd.f32 %v2390_v34, %v2371_v31 }
 0x4e9   : > { %v1329_v33 = vld [vmem:[%s4509_s15 + $0x1e88] sm:$0xff]  ;;  %1763 = vst [vmem:[#allocation1 + $0x20] ss:$4 sm:$0xff] %v350_v30  ;;  %v447_v30 = vld [vmem:[%s4509_s15 + $0x2f8] sm:$0xff] }
 0x4ea   : > { %v1625_v34 = vld [vmem:[%s4509_s15 + $0x27c8] sm:$0xf] }
 0x4eb   : > { %3644 = vmatpush.xpose.msra.mxu0 %v832_v36  ;;  %3684 = vmatpush.xpose.msra.mxu2 %v834_v37  ;;  %v1230_v36 = vld [vmem:[%s4509_s15 + $0x1b70] sm:$0xff]  ;;  %v2410_v37 = vpop.f32.mrf.mxu2  ;;  %v2430_v44 = vpop.f32.mrf.mxu3 }
 0x4ec   : > { %3664 = vmatpush.xpose.msra.mxu1 %v833_v39  ;;  %3704 = vmatpush.xpose.msra.mxu3 %v835_v40  ;;  %v1229_v39 = vld [vmem:[%s4509_s15 + $0x1b68] sm:$0xff]  ;;  %v1231_v40 = vld [vmem:[%s4509_s15 + $0x1b78] sm:$0xff]  ;;  %v2411_v41 = vadd.f32 %v2410_v37, %v2391_v38 }
 0x4ee   : > { %v2431_v48 = vadd.f32 %v2430_v44, %v2411_v41  ;;  %v1527_v41 = vld [vmem:[%s4509_s15 + $0x24b8] sm:$0xff] }
 0x4ef   : > { %3645 = vmatpush.xpose.msra.mxu0 %v734_v42  ;;  %3685 = vmatpush.xpose.msra.mxu2 %v736_v43  ;;  %v1130_v42 = vld [vmem:[%s4509_s15 + $0x1850] sm:$0xff]  ;;  %v1132_v43 = vld [vmem:[%s4509_s15 + $0x1860] sm:$0xff] }
 0x4f0   : > { %3665 = vmatpush.xpose.msra.mxu1 %v735_v46  ;;  %3705 = vmatpush.xpose.msra.mxu3 %v737_v47  ;;  %v1133_v46 = vld [vmem:[%s4509_s15 + $0x1868] sm:$0xff]  ;;  %v2450_v47 = vpop.f32.mrf.mxu0 }
 0x4f1   : > { %v2451_v51 = vadd.f32 %v2450_v47, %v2431_v48  ;;  %v1771_v37 = vld.sshfl [vmem:[#allocation1 + $0x38] sm:$0xff pattern:$0x73625140] }
 0x4f2   : > { %v1330_v48 = vld [vmem:[%s4509_s15 + $0x1e90] sm:$0xff] }
 0x4f3   : > { %3646 = vmatpush.xpose.msra.mxu0 %v636_v49  ;;  %3686 = vmatpush.xpose.msra.mxu2 %v638_v50  ;;  %v1032_v49 = vld [vmem:[%s4509_s15 + $0x1540] sm:$0xff]  ;;  %v1034_v50 = vld [vmem:[%s4509_s15 + $0x1550] sm:$0xff]  ;;  %v2471_v58 = vadd.f32 %v2470_v54, %v2451_v51  ;;  %v2510_v0 = vpop.f32.mrf.mxu3  ;;  %v1331_v51 = vld [vmem:[%s4509_s15 + $0x1e98] sm:$0xff] }
 0x4f4   : > { %3666 = vmatpush.xpose.msra.mxu1 %v637_v52  ;;  %3706 = vmatpush.xpose.msra.mxu3 %v639_v53  ;;  %v1033_v52 = vld [vmem:[%s4509_s15 + $0x1548] sm:$0xff]  ;;  %v1035_v53 = vld [vmem:[%s4509_s15 + $0x1558] sm:$0xff]  ;;  %v1232_v54 = vld [vmem:[%s4509_s15 + $0x1b80] sm:$0xff] }
 0x4f7   : > { %3647 = vmatpush.xpose.msra.mxu0 %v538_v56  ;;  %3687 = vmatpush.xpose.msra.mxu2 %v540_v57  ;;  %v936_v56 = vld [vmem:[%s4509_s15 + $0x1240] sm:$0xff]  ;;  %v2490_v57 = vpop.f32.mrf.mxu2 }
 0x4f8   : > { %3667 = vmatpush.xpose.msra.mxu1 %v539_v59  ;;  %3707 = vmatpush.xpose.msra.mxu3 %v541_v60  ;;  %v935_v59 = vld [vmem:[%s4509_s15 + $0x1238] sm:$0xff]  ;;  %v937_v60 = vld [vmem:[%s4509_s15 + $0x1248] sm:$0xff]  ;;  %v2491_v61 = vadd.f32 %v2490_v57, %v2471_v58  ;;  %v2530_v3 = vpop.f32.mrf.mxu0  ;;  %v1134_v58 = vld [vmem:[%s4509_s15 + $0x1870] sm:$0xff] }
 0x4fb   : > { %3648 = vmatpush.xpose.msra.mxu0 %v440_v62  ;;  %3688 = vmatpush.xpose.msra.mxu2 %v442_v63  ;;  %v836_v62 = vld [vmem:[%s4509_s15 + $0xf20] sm:$0xff]  ;;  %v838_v63 = vld [vmem:[%s4509_s15 + $0xf30] sm:$0xff]  ;;  %v2590_v20 = vpop.f32.mrf.mxu3 }
 0x4fc   : > { %3668 = vmatpush.xpose.msra.mxu1 %v441_v4  ;;  %3708 = vmatpush.xpose.msra.mxu3 %v443_v5  ;;  %v2511_v4 = vadd.f32 %v2510_v0, %v2491_v61  ;;  %v738_v5 = vld [vmem:[%s4509_s15 + $0xc10] sm:$0xff]  ;;  %v1135_v61 = vld [vmem:[%s4509_s15 + $0x1878] sm:$0xff] }
 0x4fe   : > { %3649 = vmatmul.f32.vlgmr.msra.gmra.mxu0 %v1764_v6  ;;  %3689 = vmatmul.f32.vlgmr.msra.gmra.mxu2 %v1766_v7  ;;  %v740_v6 = vld [vmem:[%s4509_s15 + $0xc20] sm:$0xff]  ;;  %v2531_v7 = vadd.f32 %v2530_v3, %v2511_v4  ;;  %v938_v4 = vld [vmem:[%s4509_s15 + $0x1250] sm:$0xff] }
 0x4ff   : > { %3716 = vmatpush.xpose.msrb.mxu0 %v1620_v1  ;;  %3756 = vmatpush.xpose.msrb.mxu2 %v1622_v2  ;;  %v837_v1 = vld [vmem:[%s4509_s15 + $0xf28] sm:$0xff]  ;;  %v839_v2 = vld [vmem:[%s4509_s15 + $0xf38] sm:$0xff] }
 0x500   : > { %3736 = vmatpush.xpose.msrb.mxu1 %v1621_v9  ;;  %3776 = vmatpush.xpose.msrb.mxu3 %v1623_v10  ;;  %v741_v9 = vld [vmem:[%s4509_s15 + $0xc28] sm:$0xff]  ;;  %v2550_v10 = vpop.f32.mrf.mxu1  ;;  %v2610_v23 = vpop.f32.mrf.mxu0 }
 0x501   : > { %3669 = vmatmul.f32.vlgmr.msra.gmra.mxu1 %v1765_v12  ;;  %3709 = vmatmul.f32.vlgmr.msra.gmra.mxu3 %v1767_v13  ;;  %v642_v12 = vld [vmem:[%s4509_s15 + $0x910] sm:$0xff]  ;;  %v2570_v13 = vpop.f32.mrf.mxu2 }
 0x503   : > { %3717 = vmatpush.xpose.msrb.mxu0 %v1522_v14  ;;  %3757 = vmatpush.xpose.msrb.mxu2 %v1524_v15  ;;  %v2551_v14 = vadd.f32 %v2550_v10, %v2531_v7  ;;  %v641_v15 = vld [vmem:[%s4509_s15 + $0x908] sm:$0xff] }
 0x504   : > { %3737 = vmatpush.xpose.msrb.mxu1 %v1523_v18  ;;  %3777 = vmatpush.xpose.msrb.mxu3 %v1525_v19  ;;  %v542_v18 = vld [vmem:[%s4509_s15 + $0x5f0] sm:$0xff]  ;;  %v544_v19 = vld [vmem:[%s4509_s15 + $0x600] sm:$0xff] }
 0x505   : > { %v2571_v17 = vadd.f32 %v2570_v13, %v2551_v14  ;;  %v742_v13 = vld [vmem:[%s4509_s15 + $0xc30] sm:$0xff] }
 0x507   : > { %3718 = vmatpush.xpose.msrb.mxu0 %v1424_v21  ;;  %3758 = vmatpush.xpose.msrb.mxu2 %v1426_v22  ;;  %v543_v21 = vld [vmem:[%s4509_s15 + $0x5f8] sm:$0xff]  ;;  %v545_v22 = vld [vmem:[%s4509_s15 + $0x608] sm:$0xff] }
 0x508   : > { %3738 = vmatpush.xpose.msrb.mxu1 %v1425_v24  ;;  %3778 = vmatpush.xpose.msrb.mxu3 %v1427_v25  ;;  %v2591_v24 = vadd.f32 %v2590_v20, %v2571_v17  ;;  %v444_v25 = vld [vmem:[%s4509_s15 + $0x2e0] sm:$0xff]  ;;  %v2630_v31 = vpop.f32.mrf.mxu1  ;;  %v2690_v44 = vpop.f32.mrf.mxu0  ;;  %v645_v20 = vld [vmem:[%s4509_s15 + $0x928] sm:$0xff] }
 0x50b   : > { %3719 = vmatpush.xpose.msrb.mxu0 %v1326_v28  ;;  %3759 = vmatpush.xpose.msrb.mxu2 %v1328_v29  ;;  %v2611_v28 = vadd.f32 %v2610_v23, %v2591_v24  ;;  %v445_v29 = vld [vmem:[%s4509_s15 + $0x2e8] sm:$0xff] }
 0x50c   : > { %3739 = vmatpush.xpose.msrb.mxu1 %v1327_v32  ;;  %3779 = vmatpush.xpose.msrb.mxu3 %v1329_v33  ;;  %v1768_v32 = vld.sshfl [vmem:[#allocation1 + $0x20] sm:$0xff pattern:$0x73625140]  ;;  %v1770_v33 = vld.sshfl [vmem:[#allocation1 + $0x30] sm:$0xff pattern:$0x73625140] }
 0x50d   : > { %v2631_v38 = vadd.f32 %v2630_v31, %v2611_v28 }
 0x50f   : > { %3720 = vmatpush.xpose.msrb.mxu0 %v1228_v35  ;;  %3760 = vmatpush.xpose.msrb.mxu2 %v1230_v36  ;;  %v2650_v35 = vpop.f32.mrf.mxu2  ;;  %v1769_v36 = vld.sshfl [vmem:[#allocation1 + $0x28] sm:$0xff pattern:$0x73625140] }
 0x510   : > { %3740 = vmatpush.xpose.msrb.mxu1 %v1229_v39  ;;  %3780 = vmatpush.xpose.msrb.mxu3 %v1231_v40  ;;  %v1526_v39 = vld [vmem:[%s4509_s15 + $0x24b0] sm:$0xff]  ;;  %v2651_v40 = vadd.f32 %v2650_v35, %v2631_v38 }
 0x513   : > { %3721 = vmatpush.xpose.msrb.mxu0 %v1130_v42  ;;  %3761 = vmatpush.xpose.msrb.mxu2 %v1132_v43  ;;  %v2670_v42 = vpop.f32.mrf.mxu3  ;;  %v1428_v43 = vld [vmem:[%s4509_s15 + $0x21a0] sm:$0xff] }
 0x514   : > { %3741 = vmatpush.xpose.msrb.mxu1 %v1131_v45  ;;  %3781 = vmatpush.xpose.msrb.mxu3 %v1133_v46  ;;  %v2671_v45 = vadd.f32 %v2670_v42, %v2651_v40  ;;  %v1429_v46 = vld [vmem:[%s4509_s15 + $0x21a8] sm:$0xff] }
 0x516   : > { %v2691_v47 = vadd.f32 %v2690_v44, %v2671_v45 }
 0x517   : > { %3722 = vmatpush.xpose.msrb.mxu0 %v1032_v49  ;;  %3762 = vmatpush.xpose.msrb.mxu2 %v1034_v50  ;;  %v2710_v49 = vpop.f32.mrf.mxu1  ;;  %v351_v50 = vld [vmem:[%s4502_s24 + $0xc0] sm:$0xf] }
 0x518   : > { %3742 = vmatpush.xpose.msrb.mxu1 %v1033_v52  ;;  %3782 = vmatpush.xpose.msrb.mxu3 %v1035_v53  ;;  %1772 = vst [vmem:[#allocation1] ss:$4 sm:$0xff] %v351_v50  ;;  %v2730_v52 = vpop.f32.mrf.mxu2  ;;  %v2711_v53 = vadd.f32 %v2710_v49, %v2691_v47 }
 0x51b   : > { %3723 = vmatpush.xpose.msrb.mxu0 %v934_v55  ;;  %3763 = vmatpush.xpose.msrb.mxu2 %v936_v56  ;;  %v2731_v55 = vadd.f32 %v2730_v52, %v2711_v53  ;;  %v1233_v56 = vld [vmem:[%s4509_s15 + $0x1b88] sm:$0xff]  ;;  %v2750_v57 = vpop.f32.mrf.mxu3 }
 0x51c   : > { %3743 = vmatpush.xpose.msrb.mxu1 %v935_v59  ;;  %3783 = vmatpush.xpose.msrb.mxu3 %v937_v60  ;;  %v2770_v59 = vpop.f32.mrf.mxu0 }
 0x51d   : > { %v2751_v60 = vadd.f32 %v2750_v57, %v2731_v55 }
 0x51f   : > { %3724 = vmatpush.xpose.msrb.mxu0 %v836_v62  ;;  %3764 = vmatpush.xpose.msrb.mxu2 %v838_v63  ;;  %v2771_v62 = vadd.f32 %v2770_v59, %v2751_v60  ;;  %v1036_v63 = vld [vmem:[%s4509_s15 + $0x1560] sm:$0xff]  ;;  %v2790_v0 = vpop.f32.mrf.mxu1 }
 0x520   : > { %3744 = vmatpush.xpose.msrb.mxu1 %v837_v1  ;;  %3784 = vmatpush.xpose.msrb.mxu3 %v839_v2  ;;  %v1037_v1 = vld [vmem:[%s4509_s15 + $0x1568] sm:$0xff]  ;;  %v2810_v2 = vpop.f32.mrf.mxu2 }
 0x521   : > { %v2791_v3 = vadd.f32 %v2790_v0, %v2771_v62  ;;  %v1773_v31 = vld.sshfl [vmem:[#allocation1] sm:$0xff pattern:$0x73625140] }
 0x523   : > { %3725 = vmatpush.xpose.msrb.mxu0 %v738_v5  ;;  %3765 = vmatpush.xpose.msrb.mxu2 %v740_v6  ;;  %v2811_v5 = vadd.f32 %v2810_v2, %v2791_v3  ;;  %v939_v6 = vld [vmem:[%s4509_s15 + $0x1258] sm:$0xff]  ;;  %v2830_v7 = vpop.f32.mrf.mxu3 }
 0x524   : > { %3745 = vmatpush.xpose.msrb.mxu1 %v739_v8  ;;  %3785 = vmatpush.xpose.msrb.mxu3 %v741_v9  ;;  %v840_v8 = vld [vmem:[%s4509_s15 + $0xf40] sm:$0xff]  ;;  %v2850_v9 = vpop.f32.mrf.mxu0 }
 0x525   : > { %v2831_v10 = vadd.f32 %v2830_v7, %v2811_v5 }
 0x527   : > { %3726 = vmatpush.xpose.msrb.mxu0 %v640_v11  ;;  %3766 = vmatpush.xpose.msrb.mxu2 %v642_v12  ;;  %v841_v11 = vld [vmem:[%s4509_s15 + $0xf48] sm:$0xff]  ;;  %v2851_v12 = vadd.f32 %v2850_v9, %v2831_v10  ;;  %v2870_v14 = vpop.f32.mrf.mxu1 }
 0x528   : > { %3746 = vmatpush.xpose.msrb.mxu1 %v641_v15  ;;  %3786 = vmatpush.xpose.msrb.mxu3 %v643_v16  ;;  %v743_v15 = vld [vmem:[%s4509_s15 + $0xc38] sm:$0xff]  ;;  %v2890_v16 = vpop.f32.mrf.mxu2 }
 0x529   : > { %v2871_v17 = vadd.f32 %v2870_v14, %v2851_v12 }
 0x52b   : > { %3727 = vmatpush.xpose.msrb.mxu0 %v542_v18  ;;  %3767 = vmatpush.xpose.msrb.mxu2 %v544_v19  ;;  %v644_v18 = vld [vmem:[%s4509_s15 + $0x920] sm:$0xff]  ;;  %v2891_v19 = vadd.f32 %v2890_v16, %v2871_v17 }
 0x52c   : > { %3747 = vmatpush.xpose.msrb.mxu1 %v543_v21  ;;  %3787 = vmatpush.xpose.msrb.mxu3 %v545_v22  ;;  %v2910_v21 = vpop.f32.mrf.mxu3  ;;  %v546_v22 = vld [vmem:[%s4509_s15 + $0x610] sm:$0xff]  ;;  %v2930_v23 = vpop.f32.mrf.mxu0 }
 0x52d   : > { %v2911_v24 = vadd.f32 %v2910_v21, %v2891_v19 }
 0x52f   : > { %3728 = vmatpush.xpose.msrb.mxu0 %v444_v25  ;;  %3768 = vmatpush.xpose.msrb.mxu2 %v446_v26  ;;  %v547_v25 = vld [vmem:[%s4509_s15 + $0x618] sm:$0xff]  ;;  %v2931_v26 = vadd.f32 %v2930_v23, %v2911_v24  ;;  %v2950_v28 = vpop.f32.mrf.mxu1 }
 0x530   : > { %3748 = vmatpush.xpose.msrb.mxu1 %v445_v29  ;;  %3788 = vmatpush.xpose.msrb.mxu3 %v447_v30  ;;  %v449_v29 = vld [vmem:[%s4509_s15 + $0x308] sm:$0xff]  ;;  %v2970_v30 = vpop.f32.mrf.mxu2 }
 0x532   : > { %3729 = vmatmul.f32.vlgmr.msrb.gmra.mxu0 %v1768_v32  ;;  %3769 = vmatmul.f32.vlgmr.msrb.gmra.mxu2 %v1770_v33  ;;  %v2951_v32 = vadd.f32 %v2950_v28, %v2931_v26  ;;  %v1774_v33 = vld.sshfl [vmem:[#allocation1 + $0x8] sm:$0xff pattern:$0x73625140] }
 0x533   : > { %3796 = vmatpush.xpose.msra.mxu0 %v1624_v27  ;;  %3749 = vmatmul.f32.vlgmr.msrb.gmra.mxu1 %v1769_v36  ;;  %v448_v27 = vld [vmem:[%s4509_s15 + $0x300] sm:$0xff] }
 0x534   : > { %3816 = vmatpush.xpose.msra.mxu1 %v1625_v34  ;;  %3789 = vmatmul.f32.vlgmr.msrb.gmra.mxu3 %v1771_v37  ;;  %v2971_v34 = vadd.f32 %v2970_v30, %v2951_v32  ;;  %v2990_v35 = vpop.f32.mrf.mxu3  ;;  %v3010_v36 = vpop.f32.mrf.mxu0 }
 0x536   : > { %v2991_v37 = vadd.f32 %v2990_v35, %v2971_v34 }
 0x537   : > { %3797 = vmatpush.xpose.msra.mxu0 %v1526_v39  ;;  %v3030_v39 = vpop.f32.mrf.mxu1 }
 0x538   : > { %3817 = vmatpush.xpose.msra.mxu1 %v1527_v41  ;;  %v3011_v38 = vadd.f32 %v3010_v36, %v2991_v37  ;;  %v3050_v40 = vpop.f32.mrf.mxu2 }
 0x53a   : > { %v3031_v41 = vadd.f32 %v3030_v39, %v3011_v38 }
 0x53b   : > { %3798 = vmatpush.xpose.msra.mxu0 %v1428_v43 }
 0x53c   : > { %3818 = vmatpush.xpose.msra.mxu1 %v1429_v46  ;;  %v3051_v42 = vadd.f32 %v3050_v40, %v3031_v41  ;;  %v3070_v43 = vpop.f32.mrf.mxu3  ;;  %v3090_v44 = vpop.f32.mrf.mxu0 }
 0x53e   : > { %v3071_v45 = vadd.f32 %v3070_v43, %v3051_v42 }
 0x53f   : > { %3799 = vmatpush.xpose.msra.mxu0 %v1330_v48  ;;  %v3110_v47 = vpop.f32.mrf.mxu1 }
 0x540   : > { %3819 = vmatpush.xpose.msra.mxu1 %v1331_v51  ;;  %v3091_v46 = vadd.f32 %v3090_v44, %v3071_v45  ;;  %v3130_v48 = vpop.f32.mrf.mxu2 }
 0x542   : > { %v3111_v49 = vadd.f32 %v3110_v47, %v3091_v46 }
 0x543   : > { %3800 = vmatpush.xpose.msra.mxu0 %v1232_v54 }
 0x544   : > { %3820 = vmatpush.xpose.msra.mxu1 %v1233_v56  ;;  %v3131_v50 = vadd.f32 %v3130_v48, %v3111_v49  ;;  %v3150_v51 = vpop.f32.mrf.mxu3  ;;  %v3170_v52 = vpop.f32.mrf.mxu0 }
 0x546   : > { %v3151_v53 = vadd.f32 %v3150_v51, %v3131_v50 }
 0x547   : > { %3801 = vmatpush.xpose.msra.mxu0 %v1134_v58  ;;  %v3190_v55 = vpop.f32.mrf.mxu1 }
 0x548   : > { %3821 = vmatpush.xpose.msra.mxu1 %v1135_v61  ;;  %v3171_v54 = vadd.f32 %v3170_v52, %v3151_v53  ;;  %v3210_v56 = vpop.f32.mrf.mxu2 }
 0x54a   : > { %v3191_v57 = vadd.f32 %v3190_v55, %v3171_v54  ;;  %v326_v55 = vld [vmem:[#allocation2] sm:$0x3] }
 0x54b   : > { %3802 = vmatpush.xpose.msra.mxu0 %v1036_v63 }
 0x54c   : > { %3822 = vmatpush.xpose.msra.mxu1 %v1037_v1  ;;  %v3211_v58 = vadd.f32 %v3210_v56, %v3191_v57  ;;  %v3230_v59 = vpop.f32.mrf.mxu3  ;;  %v3250_v60 = vpop.f32.mrf.mxu0 }
 0x54e   : > { %v3231_v61 = vadd.f32 %v3230_v59, %v3211_v58 }
 0x54f   : > { %3803 = vmatpush.xpose.msra.mxu0 %v938_v4  ;;  %v3270_v63 = vpop.f32.mrf.mxu1 }
 0x550   : > { %3823 = vmatpush.xpose.msra.mxu1 %v939_v6  ;;  %v3251_v62 = vadd.f32 %v3250_v60, %v3231_v61  ;;  %v3290_v0 = vpop.f32.mrf.mxu2 }
 0x552   : > { %v3271_v1 = vadd.f32 %v3270_v63, %v3251_v62 }
 0x553   : > { %3804 = vmatpush.xpose.msra.mxu0 %v840_v8 }
 0x554   : > { %3824 = vmatpush.xpose.msra.mxu1 %v841_v11  ;;  %v3291_v2 = vadd.f32 %v3290_v0, %v3271_v1  ;;  %v3310_v3 = vpop.f32.mrf.mxu3  ;;  %v3330_v4 = vpop.f32.mrf.mxu0 }
 0x556   : > { %v3311_v5 = vadd.f32 %v3310_v3, %v3291_v2 }
 0x557   : > { %3805 = vmatpush.xpose.msra.mxu0 %v742_v13  ;;  %v3350_v7 = vpop.f32.mrf.mxu1 }
 0x558   : > { %3825 = vmatpush.xpose.msra.mxu1 %v743_v15  ;;  %v3331_v6 = vadd.f32 %v3330_v4, %v3311_v5  ;;  %v3370_v8 = vpop.f32.mrf.mxu2 }
 0x55a   : > { %v3351_v9 = vadd.f32 %v3350_v7, %v3331_v6 }
 0x55b   : > { %3806 = vmatpush.xpose.msra.mxu0 %v644_v18 }
 0x55c   : > { %3826 = vmatpush.xpose.msra.mxu1 %v645_v20  ;;  %v3371_v10 = vadd.f32 %v3370_v8, %v3351_v9  ;;  %v3390_v11 = vpop.f32.mrf.mxu3  ;;  %v3410_v12 = vpop.f32.mrf.mxu0 }
 0x55e   : > { %v3391_v13 = vadd.f32 %v3390_v11, %v3371_v10 }
 0x55f   : > { %3807 = vmatpush.xpose.msra.mxu0 %v546_v22  ;;  %v3430_v15 = vpop.f32.mrf.mxu1 }
 0x560   : > { %3827 = vmatpush.xpose.msra.mxu1 %v547_v25  ;;  %v3411_v14 = vadd.f32 %v3410_v12, %v3391_v13  ;;  %v3450_v16 = vpop.f32.mrf.mxu2 }
 0x562   : > { %v3431_v17 = vadd.f32 %v3430_v15, %v3411_v14 }
 0x563   : > { %3808 = vmatpush.xpose.msra.mxu0 %v448_v27 }
 0x564   : > { %3828 = vmatpush.xpose.msra.mxu1 %v449_v29  ;;  %v3451_v18 = vadd.f32 %v3450_v16, %v3431_v17  ;;  %v3470_v19 = vpop.f32.mrf.mxu3  ;;  %v3490_v20 = vpop.f32.mrf.mxu0 }
 0x566   : > { %3809 = vmatmul.f32.vlgmr.msra.gmra.mxu0 %v1773_v31  ;;  %v3471_v21 = vadd.f32 %v3470_v19, %v3451_v18 }
 0x567   : > { %3829 = vmatmul.f32.vlgmr.msra.gmra.mxu1 %v1774_v33  ;;  %v3510_v23 = vpop.f32.mrf.mxu1 }
 0x568   : > { %v3491_v22 = vadd.f32 %v3490_v20, %v3471_v21  ;;  %v3530_v24 = vpop.f32.mrf.mxu2 }
 0x56a   : > { %v3511_v25 = vadd.f32 %v3510_v23, %v3491_v22 }
 0x56c   : > { %v3531_v26 = vadd.f32 %v3530_v24, %v3511_v25  ;;  %v3550_v27 = vpop.f32.mrf.mxu3  ;;  %v3570_v28 = vpop.f32.mrf.mxu0 }
 0x56e   : > { %v3551_v29 = vadd.f32 %v3550_v27, %v3531_v26 }
 0x56f   : > { %v3590_v31 = vpop.f32.mrf.mxu1 }
 0x570   : > { %v3571_v30 = vadd.f32 %v3570_v28, %v3551_v29  ;;  %v3610_v32 = vpop.f32.mrf.mxu2 }
 0x572   : > { %v3591_v33 = vadd.f32 %v3590_v31, %v3571_v30 }
 0x574   : > { %v3611_v34 = vadd.f32 %v3610_v32, %v3591_v33  ;;  %v3630_v35 = vpop.f32.mrf.mxu3 }
 0x576   : > { %v3631_v37 = vadd.f32 %v3630_v35, %v3611_v34 }
 0x57b   : > { %v3650_v36 = vpop.f32.mrf.mxu0 }
 0x57c   : > { %v3651_v38 = vadd.f32 %v3650_v36, %v3631_v37 }
 0x57e   : > { %v3670_v39 = vpop.f32.mrf.mxu1 }
 0x57f   : > { %v3671_v41 = vadd.f32 %v3670_v39, %v3651_v38 }
 0x581   : > { %v3690_v40 = vpop.f32.mrf.mxu2 }
 0x582   : > { %v3691_v42 = vadd.f32 %v3690_v40, %v3671_v41 }
 0x584   : > { %v3710_v43 = vpop.f32.mrf.mxu3 }
 0x585   : > { %v3711_v45 = vadd.f32 %v3710_v43, %v3691_v42 }
 0x5af   : > { %v3730_v44 = vpop.f32.mrf.mxu0 }
 0x5b0   : > { %v3731_v46 = vadd.f32 %v3730_v44, %v3711_v45  ;;  %v3750_v47 = vpop.f32.mrf.mxu1 }
 0x5b2   : > { %v3751_v49 = vadd.f32 %v3750_v47, %v3731_v46 }
 0x5b5   : > { %v3770_v48 = vpop.f32.mrf.mxu2 }
 0x5b6   : > { %v3771_v50 = vadd.f32 %v3770_v48, %v3751_v49 }
 0x5b7   : > { %v3790_v51 = vpop.f32.mrf.mxu3 }
 0x5b8   : > { %v3791_v52 = vadd.f32 %v3790_v51, %v3771_v50 }
 0x5e3   : > { %v3810_v53 = vpop.f32.mrf.mxu0 }
 0x5e4   : > { %v3811_v54 = vadd.f32 %v3810_v53, %v3791_v52  ;;  %v3830_v56 = vpop.f32.mrf.mxu1 }
 0x5e6   : > { %v3831_v57 = vadd.f32 %v3830_v56, %v3811_v54  ;;  %3839 = sbr.rel (%p4016_p1) target bundleno = 1670 (0x686), region = 68 }
 0x5e8   : > { %v3833_v58 = vadd.f32 %v3831_v57, %v326_v55 }
 0x5ea   : > { %3835 = vst.msk [vmem:[#allocation2] sm:$0x3] %vm3834_vm1, %v3833_v58 }
 0x5eb   : > { %v3859_v59 = vld [vmem:[#allocation9 + $0x60] sm:$0xf]  ;;  %vm3868_vm2 = vcmask 1043456   ;;  %v3858_v60 = vld [vmem:[#allocation9 + $0x58] sm:$0xff]  ;;  %v3857_v61 = vld [vmem:[#allocation9 + $0x50] sm:$0xff]  ;;  %vm3864_vm3 = vcmask 818176  }
 0x5ec   : > { %4017 = vmatpush.msk.msra.mxu0 %vm3868_vm2, %v3859_v59  ;;  %v3856_v62 = vld [vmem:[#allocation9 + $0x48] sm:$0xff]  ;;  %v3855_v63 = vld [vmem:[#allocation9 + $0x40] sm:$0xff]  ;;  %v3854_v0 = vld [vmem:[#allocation9 + $0x38] sm:$0xff] }
 0x5ed   : > { %v3853_v1 = vld [vmem:[#allocation9 + $0x30] sm:$0xff]  ;;  %v3852_v2 = vld [vmem:[#allocation9 + $0x28] sm:$0xff]  ;;  %v3851_v3 = vld [vmem:[#allocation9 + $0x20] sm:$0xff] }
 0x5ee   : > { %3876 = vmatpush.msra.mxu0 %v3858_v60  ;;  %v4117_v4 = vld [vmem:[#allocation8] ss:$0 sm:$0xff]  ;;  %v3849_v7 = vld [vmem:[#allocation9 + $0x10] sm:$0xff]  ;;  %v3848_v9 = vld [vmem:[#allocation9 + $0x8] sm:$0xff] }
 0x5ef   : > { %v3850_v6 = vld [vmem:[#allocation9 + $0x18] sm:$0xff]  ;;  %v3847_v10 = vld [vmem:[#allocation9] sm:$0xff]  ;;  %v4118_v12 = vld [vmem:[#allocation11] ss:$0 sm:$0xff] }
 0x5f0   : > { %3877 = vmatpush.msra.mxu0 %v3857_v61 }
 0x5f1   : > { %v3840_v5 = vld [vmem:[#allocation2] sm:$0x3] }
 0x5f2   : > { %3878 = vmatpush.msra.mxu0 %v3856_v62  ;;  %v3845_v8 = vadd.f32 %v4117_v4, %v3840_v5 }
 0x5f4   : > { %3879 = vmatpush.msra.mxu0 %v3855_v63  ;;  %v3846_v11 = vmax.f32 %v3845_v8, 0.0 }
 0x5f6   : > { %3880 = vmatpush.msra.mxu0 %v3854_v0 }
 0x5f8   : > { %3881 = vmatpush.msra.mxu0 %v3853_v1 }
 0x5fa   : > { %3882 = vmatpush.msra.mxu0 %v3852_v2 }
 0x5fc   : > { %3883 = vmatpush.msra.mxu0 %v3851_v3 }
 0x5fe   : > { %3884 = vmatpush.msra.mxu0 %v3850_v6 }
 0x600   : > { %3885 = vmatpush.msra.mxu0 %v3849_v7 }
 0x602   : > { %3886 = vmatpush.msra.mxu0 %v3848_v9 }
 0x604   : > { %3887 = vmatpush.msra.mxu0 %v3847_v10 }
 0x605   : > { %4018 = vmatmul.msk.f32.vlgmr.msra.gmra.mxu0 %vm3864_vm3, %v3846_v11 }
 0x682   : > { %v3889_v13 = vpop.f32.mrf.mxu0 }
 0x683   : > { %v3890_v14 = vadd.f32 %v4118_v12, %v3889_v13 }
 0x685   : > { %3892 = vst [vmem:[#allocation12] sm:$0x3] %v3890_v14 }
 0x686 PF: > { %p4073_p4 = scmp.eq.s32.totalorder %s4408_s22, 11  ;;  %s4358_s23 = smov [#allocation12]  }
 0x687   : > { %s3899_s27 = sshll.u32 %s4358_s23, 4  ;;  %s3901_s12 = sshll.u32 %s5847_s5, 4  ;;  %s3900_s27 = int_to_ptr.vmem [resolvable:$true] %s3899_s27  ;;  %s3902_s12 = int_to_ptr.hbm [resolvable:$true] %s3901_s12 }
 0x688   : > { %4046 = dma.vmem_to_hbm [thread:$0]  (%p4073_p4), %s3900_s27, 32, %s3902_s12, [#allocation5]  }
 0x689   : > { %4330 = dma.done.wait (%p4073_p4), [#allocation5], 32  }
 0x68a   : > { %4332 = vsyncadd (%p4073_p4), [#allocation5], 4294967264 }
 0x68b PF: > { %s5852_s7 = smov %s4449_s18  ;;  %p20_p5 = scmp.ge.s32.totalorder %s4449_s18, 14  }
 0x68c   : > { %s5853_s18 = smov %s4339_s19  ;;  %s5854_s19 = smov %s4343_s20 }
 0x68d   : > { %s5855_s20 = smov %s4459_s26  ;;  %s5856_s21 = smov %s5852_s7 }
 0x68e   :  { %22 = sbr.rel (!%p20_p5) target bundleno = 7 (0x7), region = 111 }
 0x693   :  { %3915 = vsyncpa [#allocation4], 1 }
 0x694   :  { %3917 = vsyncpa [#allocation4 + $0x1], 1 }
 0x695   :  { %3918 = vsyncpa [#allocation7], 1 }
 0x696   :  { %3920 = vsyncpa [#allocation7 + $0x1], 1 }
 0x697   :  { %3921 = vsyncpa [#allocation10], 1 }
 0x698   :  { %3922 = vsyncpa [#allocation5], 1 }
 0x699   :  { %3924 = vsyncpa [#allocation5 + $0x1], 1 }

</bundles_post_ra>
